<compile_context>
chip_gen: v7x
topology: tpu7x:2x2x1
jax: 0.10.0
libtpu: 0.0.40
codegen_flags: <defaults>
</compile_context>

<pallas_src>
import jax
import jax.numpy as jnp
from jax import lax
from jax.experimental import pallas as pl
from jax.experimental.pallas import tpu as pltpu


# ----------------------------------------------------------------------------
# In-kernel math helpers
# ----------------------------------------------------------------------------
def _gelu(x):
    # Exact (erf-based) GELU matching torch.nn.GELU() default.
    # erf via Abramowitz & Stegun 7.1.26 rational approximation (|err|<=1.5e-7).
    a1, a2, a3, a4, a5 = (0.254829592, -0.284496736, 1.421413741,
                          -1.453152027, 1.061405429)
    p = 0.3275911
    z = x * 0.7071067811865476
    az = jnp.abs(z)
    denom = 1.0 + p * az
    # EUP approximate reciprocal + one Newton step: full f32 accuracy, no divide.
    r = pl.reciprocal(denom, approx=True)
    t = r * (2.0 - denom * r)
    poly = ((((a5 * t + a4) * t + a3) * t + a2) * t + a1) * t
    erf_az = 1.0 - poly * jnp.exp(-az * az)
    erf_z = jnp.where(z >= 0.0, erf_az, -erf_az)
    return 0.5 * x * (1.0 + erf_z)


# ----------------------------------------------------------------------------
# Pallas kernel
# ----------------------------------------------------------------------------
def _make_kernel(nb, D, H, W, C, eps=1e-5):
    Dp = D + 2
    DH, WC = D * H, W * C
    K3 = 3 * WC          # kh taps folded into the contraction dimension
    M = nb * DH          # batch-blocked matmul M

    def conv3(src_ref, wk_ref):
        # src_ref: (nb, Dp, H, 3*WC) f32 staging buffer, zero-padded in D
        #          (halo planes) with the 3 kh taps pre-folded along lanes.
        # wk_ref:  (3, 3*WC, WC) bf16 Toeplitz blocks (kw taps + W padding folded).
        acc = None
        for kd in range(3):
            # kd is a leading-dim slice (no sublane shift); reshape in f32,
            # cast to bf16 only at the MXU operand, accumulate in f32.
            slab = src_ref[:, kd:kd + D, :, :].reshape(M, K3).astype(jnp.bfloat16)
            part = jnp.dot(slab, wk_ref[kd], preferred_element_type=jnp.float32)
            acc = part if acc is None else acc + part
        return acc                                               # (M, WC) f32

    def group_norm(y, same, gamma, beta, stats_ref):
        # One-pass GroupNorm stats: a single (2*nb, WC) x (WC, WC) matmul.
        # same: (WC, WC) "same group" matrix pre-scaled by 1/(D*H*W*gs).
        for b in range(nb):
            yb = y[b * DH:(b + 1) * DH, :]                       # (DH, WC)
            stats_ref[b:b + 1, :] = jnp.sum(yb, axis=0, keepdims=True)
            stats_ref[nb + b:nb + b + 1, :] = jnp.sum(yb * yb, axis=0,
                                                      keepdims=True)
        red = jnp.dot(stats_ref[...], same,
                      preferred_element_type=jnp.float32)        # (2*nb, WC)
        mean = red[0:nb, :]                                      # (nb, WC)
        var = red[nb:2 * nb, :] - mean * mean
        inv = lax.rsqrt(var + eps)
        scale = inv * gamma                                      # (nb, WC)
        shift = beta - mean * scale
        y3 = y.reshape(nb, DH, WC)
        return y3 * scale[:, None, :] + shift[:, None, :]        # (nb, DH, WC)

    def kernel(x3_ref, xres_ref, w1_ref, w2_ref, same_ref,
               g1_ref, b1_ref, g2_ref, b2_ref, out_ref, ypad_ref, stats_ref):
        same = same_ref[...]

        # ---- branch 1: conv1 -> norm1 -> gelu ----
        y = conv3(x3_ref, w1_ref)                                # (M, WC)
        y = _gelu(group_norm(y, same, g1_ref[...], b1_ref[...], stats_ref))
        yb = y.reshape(nb, D, H, WC)

        # ---- stage into the D/H-padded, kh-folded scratch for conv2 ----
        # The halo re-zero is per-iteration on purpose: under megacore
        # ("parallel") sharding each core must fully initialize its own scratch.
        ypad_ref[:, 0:1, :, :] = jnp.zeros((nb, 1, H, K3), jnp.float32)
        ypad_ref[:, Dp - 1:Dp, :, :] = jnp.zeros((nb, 1, H, K3), jnp.float32)
        # kh = 1 tap: aligned copy.
        ypad_ref[:, 1:1 + D, :, WC:2 * WC] = yb
        # kh = 0 tap: shifted by +1 row in H; row 0 is the H halo.
        ypad_ref[:, 1:1 + D, 0:1, 0:WC] = jnp.zeros((nb, D, 1, WC), jnp.float32)
        ypad_ref[:, 1:1 + D, 1:H, 0:WC] = yb[:, :, 0:H - 1, :]
        # kh = 2 tap: shifted by -1 row in H; row H-1 is the H halo.
        ypad_ref[:, 1:1 + D, 0:H - 1, 2 * WC:3 * WC] = yb[:, :, 1:H, :]
        ypad_ref[:, 1:1 + D, H - 1:H, 2 * WC:3 * WC] = jnp.zeros(
            (nb, D, 1, WC), jnp.float32)

        # ---- branch 2: conv2 -> norm2 ----
        y = conv3(ypad_ref, w2_ref)
        y = group_norm(y, same, g2_ref[...], b2_ref[...], stats_ref)

        # ---- residual add + gelu, lane-dense (nb, DH, WC) store ----
        out_ref[...] = _gelu(y + xres_ref[...])

    return kernel


# ----------------------------------------------------------------------------
# Wrapper (layout glue + one-time parameter prep)
# ----------------------------------------------------------------------------
def _conv_to_toeplitz(w, W, C):
    """(Cout, Cin, 3, 3, 3) torch-layout conv weight -> (3, 3*W*C, W*C).

    WK[kd, kh*WC + w_in*C + ci, w_out*C + co] = w[co, ci, kd, kh, w_in-w_out+1]
    when 0 <= w_in-w_out+1 <= 2, else 0.  Folds the kw taps, the width
    zero-padding AND the kh taps into the matmul contraction dimension.
    """
    WC = W * C
    wt = jnp.transpose(w, (2, 3, 4, 1, 0)).astype(jnp.float32)   # (3,3,3,Cin,Cout)
    idx = jnp.arange(WC)
    w_pos, ch = idx // C, idx % C
    kw = w_pos[:, None] - w_pos[None, :] + 1                     # (WC, WC)
    valid = (kw >= 0) & (kw <= 2)
    kw_c = jnp.clip(kw, 0, 2)
    ci_b = jnp.broadcast_to(ch[:, None], (WC, WC))
    co_b = jnp.broadcast_to(ch[None, :], (WC, WC))
    blocks = []
    for kd in range(3):
        for kh in range(3):
            blk = wt[kd, kh][kw_c, ci_b, co_b]                   # (WC, WC)
            blocks.append(jnp.where(valid, blk, 0.0))
    return jnp.stack(blocks, axis=0).reshape(3, 3 * WC, WC)


def _pick_batch_block(N):
    # Fatten M (= nb*D*H rows per matmul) while keeping >= 2 grid steps when
    # possible so both v7x TensorCores stay busy under "parallel" sharding.
    for cand in (4, 3, 2):
        if N % cand == 0 and N // cand >= 2:
            return cand
    return 1


def resblock3d_pallas(x_ncdhw, w1, w2, g1, b1, g2, b2, groups=8, eps=1e-5,
                      nb=None):
    """x_ncdhw: (N, C, D, H, W); w*: (Cout, Cin, 3, 3, 3) in PyTorch layout."""
    N, C, D, H, W = x_ncdhw.shape
    assert C % groups == 0
    Dp = D + 2
    DH, WC = D * H, W * C
    assert WC % 128 == 0 and DH % 8 == 0, "lane-dense layout needs WC%128==0"
    gs = C // groups
    P = D * H * W

    if nb is None:
        nb = _pick_batch_block(N)
    assert N % nb == 0

    # glue: NCDHW -> lane-dense (N, D, H, W*C); pad D/H by 1; pre-fold the 3 kh
    # taps along lanes so the kernel's conv1 needs no in-kernel staging.
    x = jnp.transpose(x_ncdhw, (0, 2, 3, 4, 1)).astype(jnp.float32)    # NDHWC
    x_flat = x.reshape(N, D, H, WC)
    xpad = jnp.pad(x_flat, ((0, 0), (1, 1), (1, 1), (0, 0)))           # (N,Dp,Hp,WC)
    x3 = jnp.concatenate([xpad[:, :, kh:kh + H, :] for kh in range(3)],
                         axis=-1)                                      # (N,Dp,H,3WC)
    xres = x_flat.reshape(N, DH, WC)                                   # residual

    # one-time parameter prep (bf16 MXU weights; f32 accumulation in-kernel)
    w1k = _conv_to_toeplitz(w1, W, C).astype(jnp.bfloat16)             # (3,3WC,WC)
    w2k = _conv_to_toeplitz(w2, W, C).astype(jnp.bfloat16)
    grp = (jnp.arange(WC) % C) // gs
    same = (grp[:, None] == grp[None, :]).astype(jnp.float32) / float(P * gs)
    tile = lambda v: jnp.tile(v.astype(jnp.float32), W).reshape(1, WC)
    g1r, b1r, g2r, b2r = tile(g1), tile(b1), tile(g2), tile(b2)

    kernel = _make_kernel(nb, D, H, W, C, eps=eps)
    vec_spec = pl.BlockSpec((1, WC), lambda n: (0, 0))

    out = pl.pallas_call(
        kernel,
        out_shape=jax.ShapeDtypeStruct((N, DH, WC), jnp.float32),
        grid_spec=pltpu.PrefetchScalarGridSpec(
            num_scalar_prefetch=0,
            grid=(N // nb,),
            in_specs=[
                pl.BlockSpec((nb, Dp, H, 3 * WC), lambda n: (n, 0, 0, 0)),  # conv1 in
                pl.BlockSpec((nb, DH, WC), lambda n: (n, 0, 0)),            # residual
                pl.BlockSpec((3, 3 * WC, WC), lambda n: (0, 0, 0)),         # conv1 W
                pl.BlockSpec((3, 3 * WC, WC), lambda n: (0, 0, 0)),         # conv2 W
                pl.BlockSpec((WC, WC), lambda n: (0, 0)),                   # group mask
                vec_spec, vec_spec,                                         # gamma1, beta1
                vec_spec, vec_spec,                                         # gamma2, beta2
            ],
            out_specs=pl.BlockSpec((nb, DH, WC), lambda n: (n, 0, 0)),
            scratch_shapes=[
                pltpu.VMEM((nb, Dp, H, 3 * WC), jnp.float32),   # conv2 staging
                pltpu.VMEM((2 * nb, WC), jnp.float32),          # GN stats (sum, sumsq)
            ],
        ),
        compiler_params=pltpu.CompilerParams(
            dimension_semantics=("parallel",),
            vmem_limit_bytes=32 * 1024 * 1024),
    )(x3, xres, w1k, w2k, same, g1r, b1r, g2r, b2r)

    # glue: (N, D*H, W*C) -> NCDHW
    out = out.reshape(N, D, H, W, C)
    return jnp.transpose(out, (0, 4, 1, 2, 3))


# ----------------------------------------------------------------------------
# Pure-JAX reference (for correctness check)
# ----------------------------------------------------------------------------
def resblock3d_ref(x, w1, w2, g1, b1, g2, b2, groups=8, eps=1e-5):
    def conv(t, w):
        return lax.conv_general_dilated(
            t, w, window_strides=(1, 1, 1), padding=((1, 1),) * 3,
            dimension_numbers=("NCDHW", "OIDHW", "NCDHW"))

    def gn(t, g, b):
        N, C, D, H, W = t.shape
        tg = t.reshape(N, groups, C // groups, D, H, W)
        m = jnp.mean(tg, axis=(2, 3, 4, 5), keepdims=True)
        v = jnp.mean((tg - m) ** 2, axis=(2, 3, 4, 5), keepdims=True)
        tn = ((tg - m) / jnp.sqrt(v + eps)).reshape(N, C, D, H, W)
        return tn * g.reshape(1, C, 1, 1, 1) + b.reshape(1, C, 1, 1, 1)

    act = lambda t: jax.nn.gelu(t, approximate=False)
    y = act(gn(conv(x, w1), g1, b1))
    y = gn(conv(y, w2), g2, b2)
    return act(y + x)


# ----------------------------------------------------------------------------
if __name__ == "__main__":
    # channels must be divisible by 8 for GroupNorm(8, channels);
    # W*C = 128 keeps the layout lane-dense; N=4 -> nb=2, grid=(2,), M=128.
    N, C, D, H, W = 4, 16, 8, 8, 8

    key = jax.random.PRNGKey(0)
    kx, k1, k2, k3, k4, k5, k6 = jax.random.split(key, 7)
    x = jax.random.normal(kx, (N, C, D, H, W), jnp.float32)

    # deterministic synthetic params (shapes from nn.Conv3d / nn.GroupNorm)
    fan_in = C * 3 * 3 * 3
    bound = 1.0 / (fan_in ** 0.5)
    w1 = jax.random.uniform(k1, (C, C, 3, 3, 3), jnp.float32, -bound, bound)
    w2 = jax.random.uniform(k2, (C, C, 3, 3, 3), jnp.float32, -bound, bound)
    g1 = 1.0 + 0.05 * jax.random.normal(k3, (C,), jnp.float32)
    b1 = 0.05 * jax.random.normal(k4, (C,), jnp.float32)
    g2 = 1.0 + 0.05 * jax.random.normal(k5, (C,), jnp.float32)
    b2 = 0.05 * jax.random.normal(k6, (C,), jnp.float32)

    out = jax.block_until_ready(resblock3d_pallas(x, w1, w2, g1, b1, g2, b2))
    ref = resblock3d_ref(x, w1, w2, g1, b1, g2, b2)
    assert out.shape == ref.shape == (N, C, D, H, W)

    max_err = float(jnp.max(jnp.abs(out - ref)))
    mean_err = float(jnp.mean(jnp.abs(out - ref)))
    # bf16 MXU operands (f32 accumulation) dominate the error budget.
    assert max_err < 1e-1, f"max abs err too large: {max_err}"
    assert mean_err < 2e-2, f"mean abs err too large: {mean_err}"

    print("KERNEL_OK")
</pallas_src>

<mosaic_0001>
module attributes {stable_mosaic.version = 11 : i64} {
  func.func @kernel(%arg0: i32, %arg1: memref<2x10x8x384xf32, #tpu.memory_space<vmem>>, %arg2: memref<2x64x128xf32, #tpu.memory_space<vmem>>, %arg3: memref<3x384x128xbf16, #tpu.memory_space<vmem>>, %arg4: memref<3x384x128xbf16, #tpu.memory_space<vmem>>, %arg5: memref<128x128xf32, #tpu.memory_space<vmem>>, %arg6: memref<1x128xf32, #tpu.memory_space<vmem>>, %arg7: memref<1x128xf32, #tpu.memory_space<vmem>>, %arg8: memref<1x128xf32, #tpu.memory_space<vmem>>, %arg9: memref<1x128xf32, #tpu.memory_space<vmem>>, %arg10: memref<2x64x128xf32, #tpu.memory_space<vmem>>, %arg11: memref<2x10x8x384xf32, #tpu.memory_space<vmem>>, %arg12: memref<4x128xf32, #tpu.memory_space<vmem>>) attributes {dimension_semantics = [#tpu.dimension_semantics<parallel>], iteration_bounds = array<i64: 2>, scalar_prefetch = 0 : i64, scratch_operands = 2 : i64, tpu.core_type = #tpu.core_type<tc>, window_params = [{transform_indices = @transform_0, window_bounds = array<i64: 2, 10, 8, 384>}, {transform_indices = @transform_1, window_bounds = array<i64: 2, 64, 128>}, {pipeline_mode = #tpu.pipeline_mode<synchronous>, transform_indices = @transform_2, window_bounds = array<i64: 3, 384, 128>}, {pipeline_mode = #tpu.pipeline_mode<synchronous>, transform_indices = @transform_3, window_bounds = array<i64: 3, 384, 128>}, {pipeline_mode = #tpu.pipeline_mode<synchronous>, transform_indices = @transform_4, window_bounds = array<i64: 128, 128>}, {pipeline_mode = #tpu.pipeline_mode<synchronous>, transform_indices = @transform_5, window_bounds = array<i64: 1, 128>}, {pipeline_mode = #tpu.pipeline_mode<synchronous>, transform_indices = @transform_6, window_bounds = array<i64: 1, 128>}, {pipeline_mode = #tpu.pipeline_mode<synchronous>, transform_indices = @transform_7, window_bounds = array<i64: 1, 128>}, {pipeline_mode = #tpu.pipeline_mode<synchronous>, transform_indices = @transform_8, window_bounds = array<i64: 1, 128>}, {transform_indices = @transform_9, window_bounds = array<i64: 2, 64, 128>}]} {
    %c0 = arith.constant 0 : index
    %c0_0 = arith.constant 0 : index
    %0 = vector.load %arg5[%c0, %c0_0] : memref<128x128xf32, #tpu.memory_space<vmem>>, vector<128x128xf32>
    %c0_1 = arith.constant 0 : index
    %c0_2 = arith.constant 0 : index
    %c0_3 = arith.constant 0 : index
    %c0_4 = arith.constant 0 : index
    %1 = vector.load %arg1[%c0_1, %c0_2, %c0_3, %c0_4] : memref<2x10x8x384xf32, #tpu.memory_space<vmem>>, vector<2x8x8x384xf32>
    %2 = vector.shape_cast %1 : vector<2x8x8x384xf32> to vector<128x384xf32>
    %3 = arith.truncf %2 : vector<128x384xf32> to vector<128x384xbf16>
    %c0_5 = arith.constant 0 : index
    %c0_6 = arith.constant 0 : index
    %c0_7 = arith.constant 0 : index
    %4 = vector.load %arg3[%c0_5, %c0_6, %c0_7] : memref<3x384x128xbf16, #tpu.memory_space<vmem>>, vector<1x384x128xbf16>
    %5 = vector.shape_cast %4 : vector<1x384x128xbf16> to vector<384x128xbf16>
    %cst = arith.constant dense<0.000000e+00> : vector<128x128xf32>
    %6 = tpu.matmul %3, %5, %cst {dimension_numbers = #tpu.dot_dimension_numbers<[1], [0], [0], [1], [0, 0, 1, 1], [], []>} : vector<128x384xbf16>, vector<384x128xbf16>, vector<128x128xf32> -> vector<128x128xf32>
    %c0_8 = arith.constant 0 : index
    %c1 = arith.constant 1 : index
    %c0_9 = arith.constant 0 : index
    %c0_10 = arith.constant 0 : index
    %7 = vector.load %arg1[%c0_8, %c1, %c0_9, %c0_10] : memref<2x10x8x384xf32, #tpu.memory_space<vmem>>, vector<2x8x8x384xf32>
    %8 = vector.shape_cast %7 : vector<2x8x8x384xf32> to vector<128x384xf32>
    %9 = arith.truncf %8 : vector<128x384xf32> to vector<128x384xbf16>
    %c1_11 = arith.constant 1 : index
    %c0_12 = arith.constant 0 : index
    %c0_13 = arith.constant 0 : index
    %10 = vector.load %arg3[%c1_11, %c0_12, %c0_13] : memref<3x384x128xbf16, #tpu.memory_space<vmem>>, vector<1x384x128xbf16>
    %11 = vector.shape_cast %10 : vector<1x384x128xbf16> to vector<384x128xbf16>
    %cst_14 = arith.constant dense<0.000000e+00> : vector<128x128xf32>
    %12 = tpu.matmul %9, %11, %cst_14 {dimension_numbers = #tpu.dot_dimension_numbers<[1], [0], [0], [1], [0, 0, 1, 1], [], []>} : vector<128x384xbf16>, vector<384x128xbf16>, vector<128x128xf32> -> vector<128x128xf32>
    %13 = arith.addf %6, %12 : vector<128x128xf32>
    %c0_15 = arith.constant 0 : index
    %c2 = arith.constant 2 : index
    %c0_16 = arith.constant 0 : index
    %c0_17 = arith.constant 0 : index
    %14 = vector.load %arg1[%c0_15, %c2, %c0_16, %c0_17] : memref<2x10x8x384xf32, #tpu.memory_space<vmem>>, vector<2x8x8x384xf32>
    %15 = vector.shape_cast %14 : vector<2x8x8x384xf32> to vector<128x384xf32>
    %16 = arith.truncf %15 : vector<128x384xf32> to vector<128x384xbf16>
    %c2_18 = arith.constant 2 : index
    %c0_19 = arith.constant 0 : index
    %c0_20 = arith.constant 0 : index
    %17 = vector.load %arg3[%c2_18, %c0_19, %c0_20] : memref<3x384x128xbf16, #tpu.memory_space<vmem>>, vector<1x384x128xbf16>
    %18 = vector.shape_cast %17 : vector<1x384x128xbf16> to vector<384x128xbf16>
    %cst_21 = arith.constant dense<0.000000e+00> : vector<128x128xf32>
    %19 = tpu.matmul %16, %18, %cst_21 {dimension_numbers = #tpu.dot_dimension_numbers<[1], [0], [0], [1], [0, 0, 1, 1], [], []>} : vector<128x384xbf16>, vector<384x128xbf16>, vector<128x128xf32> -> vector<128x128xf32>
    %20 = arith.addf %13, %19 : vector<128x128xf32>
    %c0_22 = arith.constant 0 : index
    %c0_23 = arith.constant 0 : index
    %21 = vector.load %arg6[%c0_22, %c0_23] : memref<1x128xf32, #tpu.memory_space<vmem>>, vector<1x128xf32>
    %c0_24 = arith.constant 0 : index
    %c0_25 = arith.constant 0 : index
    %22 = vector.load %arg7[%c0_24, %c0_25] : memref<1x128xf32, #tpu.memory_space<vmem>>, vector<1x128xf32>
    %23 = vector.extract_strided_slice %20 {offsets = [0, 0], sizes = [64, 128], strides = [1, 1]} : vector<128x128xf32> to vector<64x128xf32>
    %cst_26 = arith.constant dense<0.000000e+00> : vector<128xf32>
    %24 = vector.multi_reduction <add>, %23, %cst_26 [0] : vector<64x128xf32> to vector<128xf32>
    %25 = vector.shape_cast %24 : vector<128xf32> to vector<1x128xf32>
    %c0_27 = arith.constant 0 : index
    %c0_28 = arith.constant 0 : index
    %26 = vector.load %arg12[%c0_27, %c0_28] : memref<4x128xf32, #tpu.memory_space<vmem>>, vector<1x128xf32>
    tpu.vector_store %arg12[%c0_27, %c0_28], %25 {strides = array<i32>} : memref<4x128xf32, #tpu.memory_space<vmem>>, vector<1x128xf32>,
    %27 = arith.mulf %23, %23 : vector<64x128xf32>
    %cst_29 = arith.constant dense<0.000000e+00> : vector<128xf32>
    %28 = vector.multi_reduction <add>, %27, %cst_29 [0] : vector<64x128xf32> to vector<128xf32>
    %29 = vector.shape_cast %28 : vector<128xf32> to vector<1x128xf32>
    %c2_30 = arith.constant 2 : index
    %c0_31 = arith.constant 0 : index
    %30 = vector.load %arg12[%c2_30, %c0_31] : memref<4x128xf32, #tpu.memory_space<vmem>>, vector<1x128xf32>
    tpu.vector_store %arg12[%c2_30, %c0_31], %29 {strides = array<i32>} : memref<4x128xf32, #tpu.memory_space<vmem>>, vector<1x128xf32>,
    %31 = vector.extract_strided_slice %20 {offsets = [64, 0], sizes = [64, 128], strides = [1, 1]} : vector<128x128xf32> to vector<64x128xf32>
    %cst_32 = arith.constant dense<0.000000e+00> : vector<128xf32>
    %32 = vector.multi_reduction <add>, %31, %cst_32 [0] : vector<64x128xf32> to vector<128xf32>
    %33 = vector.shape_cast %32 : vector<128xf32> to vector<1x128xf32>
    %c1_33 = arith.constant 1 : index
    %c0_34 = arith.constant 0 : index
    %34 = vector.load %arg12[%c1_33, %c0_34] : memref<4x128xf32, #tpu.memory_space<vmem>>, vector<1x128xf32>
    tpu.vector_store %arg12[%c1_33, %c0_34], %33 {strides = array<i32>} : memref<4x128xf32, #tpu.memory_space<vmem>>, vector<1x128xf32>,
    %35 = arith.mulf %31, %31 : vector<64x128xf32>
    %cst_35 = arith.constant dense<0.000000e+00> : vector<128xf32>
    %36 = vector.multi_reduction <add>, %35, %cst_35 [0] : vector<64x128xf32> to vector<128xf32>
    %37 = vector.shape_cast %36 : vector<128xf32> to vector<1x128xf32>
    %c3 = arith.constant 3 : index
    %c0_36 = arith.constant 0 : index
    %38 = vector.load %arg12[%c3, %c0_36] : memref<4x128xf32, #tpu.memory_space<vmem>>, vector<1x128xf32>
    tpu.vector_store %arg12[%c3, %c0_36], %37 {strides = array<i32>} : memref<4x128xf32, #tpu.memory_space<vmem>>, vector<1x128xf32>,
    %c0_37 = arith.constant 0 : index
    %c0_38 = arith.constant 0 : index
    %39 = vector.load %arg12[%c0_37, %c0_38] : memref<4x128xf32, #tpu.memory_space<vmem>>, vector<4x128xf32>
    %cst_39 = arith.constant dense<0.000000e+00> : vector<4x128xf32>
    %40 = tpu.matmul %39, %0, %cst_39 {dimension_numbers = #tpu.dot_dimension_numbers<[1], [0], [0], [1], [0, 0, 1, 1], [], []>} : vector<4x128xf32>, vector<128x128xf32>, vector<4x128xf32> -> vector<4x128xf32>
    %41 = vector.extract_strided_slice %40 {offsets = [0, 0], sizes = [2, 128], strides = [1, 1]} : vector<4x128xf32> to vector<2x128xf32>
    %42 = vector.extract_strided_slice %40 {offsets = [2, 0], sizes = [2, 128], strides = [1, 1]} : vector<4x128xf32> to vector<2x128xf32>
    %43 = arith.mulf %41, %41 : vector<2x128xf32>
    %44 = arith.subf %42, %43 : vector<2x128xf32>
    %cst_40 = arith.constant 9.99999974E-6 : f32
    %45 = vector.broadcast %cst_40 : f32 to vector<2x128xf32>
    %46 = arith.addf %44, %45 : vector<2x128xf32>
    %47 = math.rsqrt %46 : vector<2x128xf32>
    %48 = vector.broadcast %21 : vector<1x128xf32> to vector<2x128xf32>
    %49 = arith.mulf %47, %48 : vector<2x128xf32>
    %50 = arith.mulf %41, %49 : vector<2x128xf32>
    %51 = vector.broadcast %22 : vector<1x128xf32> to vector<2x128xf32>
    %52 = arith.subf %51, %50 : vector<2x128xf32>
    %53 = vector.shape_cast %20 : vector<128x128xf32> to vector<2x64x128xf32>
    %54 = vector.shape_cast %49 : vector<2x128xf32> to vector<2x1x128xf32>
    %55 = vector.broadcast %54 : vector<2x1x128xf32> to vector<2x64x128xf32>
    %56 = arith.mulf %53, %55 : vector<2x64x128xf32>
    %57 = vector.shape_cast %52 : vector<2x128xf32> to vector<2x1x128xf32>
    %58 = vector.broadcast %57 : vector<2x1x128xf32> to vector<2x64x128xf32>
    %59 = arith.addf %56, %58 : vector<2x64x128xf32>
    %cst_41 = arith.constant 0.707106769 : f32
    %60 = vector.broadcast %cst_41 : f32 to vector<2x64x128xf32>
    %61 = arith.mulf %59, %60 : vector<2x64x128xf32>
    %62 = math.absf %61 : vector<2x64x128xf32>
    %cst_42 = arith.constant 0.327591091 : f32
    %63 = vector.broadcast %cst_42 : f32 to vector<2x64x128xf32>
    %64 = arith.mulf %63, %62 : vector<2x64x128xf32>
    %cst_43 = arith.constant 1.000000e+00 : f32
    %65 = vector.broadcast %cst_43 : f32 to vector<2x64x128xf32>
    %66 = arith.addf %65, %64 : vector<2x64x128xf32>
    %67 = tpu.reciprocal %66 {approx = true} : vector<2x64x128xf32> -> vector<2x64x128xf32>
    %68 = arith.mulf %66, %67 : vector<2x64x128xf32>
    %cst_44 = arith.constant 2.000000e+00 : f32
    %69 = vector.broadcast %cst_44 : f32 to vector<2x64x128xf32>
    %70 = arith.subf %69, %68 : vector<2x64x128xf32>
    %71 = arith.mulf %67, %70 : vector<2x64x128xf32>
    %cst_45 = arith.constant 1.06140542 : f32
    %72 = vector.broadcast %cst_45 : f32 to vector<2x64x128xf32>
    %73 = arith.mulf %72, %71 : vector<2x64x128xf32>
    %cst_46 = arith.constant -1.45315206 : f32
    %74 = vector.broadcast %cst_46 : f32 to vector<2x64x128xf32>
    %75 = arith.addf %73, %74 : vector<2x64x128xf32>
    %76 = arith.mulf %75, %71 : vector<2x64x128xf32>
    %cst_47 = arith.constant 1.42141378 : f32
    %77 = vector.broadcast %cst_47 : f32 to vector<2x64x128xf32>
    %78 = arith.addf %76, %77 : vector<2x64x128xf32>
    %79 = arith.mulf %78, %71 : vector<2x64x128xf32>
    %cst_48 = arith.constant -0.284496725 : f32
    %80 = vector.broadcast %cst_48 : f32 to vector<2x64x128xf32>
    %81 = arith.addf %79, %80 : vector<2x64x128xf32>
    %82 = arith.mulf %81, %71 : vector<2x64x128xf32>
    %cst_49 = arith.constant 0.254829586 : f32
    %83 = vector.broadcast %cst_49 : f32 to vector<2x64x128xf32>
    %84 = arith.addf %82, %83 : vector<2x64x128xf32>
    %85 = arith.mulf %84, %71 : vector<2x64x128xf32>
    %cst_50 = arith.constant 0.000000e+00 : f32
    %86 = vector.broadcast %cst_50 : f32 to vector<2x64x128xf32>
    %87 = arith.subf %86, %62 : vector<2x64x128xf32>
    %88 = arith.mulf %87, %62 : vector<2x64x128xf32>
    %89 = math.exp %88 : vector<2x64x128xf32>
    %90 = arith.mulf %85, %89 : vector<2x64x128xf32>
    %cst_51 = arith.constant 1.000000e+00 : f32
    %91 = vector.broadcast %cst_51 : f32 to vector<2x64x128xf32>
    %92 = arith.subf %91, %90 : vector<2x64x128xf32>
    %cst_52 = arith.constant 0.000000e+00 : f32
    %93 = vector.broadcast %cst_52 : f32 to vector<2x64x128xf32>
    %94 = arith.cmpf oge, %61, %93 : vector<2x64x128xf32>
    %cst_53 = arith.constant 0.000000e+00 : f32
    %95 = vector.broadcast %cst_53 : f32 to vector<2x64x128xf32>
    %96 = arith.subf %95, %92 : vector<2x64x128xf32>
    %97 = arith.select %94, %92, %96 : vector<2x64x128xi1>, vector<2x64x128xf32>
    %cst_54 = arith.constant 5.000000e-01 : f32
    %98 = vector.broadcast %cst_54 : f32 to vector<2x64x128xf32>
    %99 = arith.mulf %98, %59 : vector<2x64x128xf32>
    %cst_55 = arith.constant 1.000000e+00 : f32
    %100 = vector.broadcast %cst_55 : f32 to vector<2x64x128xf32>
    %101 = arith.addf %100, %97 : vector<2x64x128xf32>
    %102 = arith.mulf %99, %101 : vector<2x64x128xf32>
    %103 = vector.shape_cast %102 : vector<2x64x128xf32> to vector<2x8x8x128xf32>
    %cst_56 = arith.constant 0.000000e+00 : f32
    %104 = vector.broadcast %cst_56 : f32 to vector<2x1x8x384xf32>
    %c0_57 = arith.constant 0 : index
    %c0_58 = arith.constant 0 : index
    %c0_59 = arith.constant 0 : index
    %c0_60 = arith.constant 0 : index
    %105 = vector.load %arg11[%c0_57, %c0_58, %c0_59, %c0_60] : memref<2x10x8x384xf32, #tpu.memory_space<vmem>>, vector<2x1x8x384xf32>
    tpu.vector_store %arg11[%c0_57, %c0_58, %c0_59, %c0_60], %104 {strides = array<i32>} : memref<2x10x8x384xf32, #tpu.memory_space<vmem>>, vector<2x1x8x384xf32>,
    %cst_61 = arith.constant 0.000000e+00 : f32
    %106 = vector.broadcast %cst_61 : f32 to vector<2x1x8x384xf32>
    %c0_62 = arith.constant 0 : index
    %c9 = arith.constant 9 : index
    %c0_63 = arith.constant 0 : index
    %c0_64 = arith.constant 0 : index
    %107 = vector.load %arg11[%c0_62, %c9, %c0_63, %c0_64] : memref<2x10x8x384xf32, #tpu.memory_space<vmem>>, vector<2x1x8x384xf32>
    tpu.vector_store %arg11[%c0_62, %c9, %c0_63, %c0_64], %106 {strides = array<i32>} : memref<2x10x8x384xf32, #tpu.memory_space<vmem>>, vector<2x1x8x384xf32>,
    %c0_65 = arith.constant 0 : index
    %c1_66 = arith.constant 1 : index
    %c0_67 = arith.constant 0 : index
    %c128 = arith.constant 128 : index
    %108 = vector.load %arg11[%c0_65, %c1_66, %c0_67, %c128] : memref<2x10x8x384xf32, #tpu.memory_space<vmem>>, vector<2x8x8x128xf32>
    tpu.vector_store %arg11[%c0_65, %c1_66, %c0_67, %c128], %103 {strides = array<i32>} : memref<2x10x8x384xf32, #tpu.memory_space<vmem>>, vector<2x8x8x128xf32>,
    %cst_68 = arith.constant 0.000000e+00 : f32
    %109 = vector.broadcast %cst_68 : f32 to vector<2x8x1x128xf32>
    %c0_69 = arith.constant 0 : index
    %c1_70 = arith.constant 1 : index
    %c0_71 = arith.constant 0 : index
    %c0_72 = arith.constant 0 : index
    %110 = vector.load %arg11[%c0_69, %c1_70, %c0_71, %c0_72] : memref<2x10x8x384xf32, #tpu.memory_space<vmem>>, vector<2x8x1x128xf32>
    tpu.vector_store %arg11[%c0_69, %c1_70, %c0_71, %c0_72], %109 {strides = array<i32>} : memref<2x10x8x384xf32, #tpu.memory_space<vmem>>, vector<2x8x1x128xf32>,
    %111 = vector.extract_strided_slice %103 {offsets = [0, 0, 0, 0], sizes = [2, 8, 7, 128], strides = [1, 1, 1, 1]} : vector<2x8x8x128xf32> to vector<2x8x7x128xf32>
    %c0_73 = arith.constant 0 : index
    %c1_74 = arith.constant 1 : index
    %c1_75 = arith.constant 1 : index
    %c0_76 = arith.constant 0 : index
    %112 = vector.load %arg11[%c0_73, %c1_74, %c1_75, %c0_76] : memref<2x10x8x384xf32, #tpu.memory_space<vmem>>, vector<2x8x7x128xf32>
    tpu.vector_store %arg11[%c0_73, %c1_74, %c1_75, %c0_76], %111 {strides = array<i32>} : memref<2x10x8x384xf32, #tpu.memory_space<vmem>>, vector<2x8x7x128xf32>,
    %113 = vector.extract_strided_slice %103 {offsets = [0, 0, 1, 0], sizes = [2, 8, 7, 128], strides = [1, 1, 1, 1]} : vector<2x8x8x128xf32> to vector<2x8x7x128xf32>
    %c0_77 = arith.constant 0 : index
    %c1_78 = arith.constant 1 : index
    %c0_79 = arith.constant 0 : index
    %c256 = arith.constant 256 : index
    %114 = vector.load %arg11[%c0_77, %c1_78, %c0_79, %c256] : memref<2x10x8x384xf32, #tpu.memory_space<vmem>>, vector<2x8x7x128xf32>
    tpu.vector_store %arg11[%c0_77, %c1_78, %c0_79, %c256], %113 {strides = array<i32>} : memref<2x10x8x384xf32, #tpu.memory_space<vmem>>, vector<2x8x7x128xf32>,
    %cst_80 = arith.constant 0.000000e+00 : f32
    %115 = vector.broadcast %cst_80 : f32 to vector<2x8x1x128xf32>
    %c0_81 = arith.constant 0 : index
    %c1_82 = arith.constant 1 : index
    %c7 = arith.constant 7 : index
    %c256_83 = arith.constant 256 : index
    %116 = vector.load %arg11[%c0_81, %c1_82, %c7, %c256_83] : memref<2x10x8x384xf32, #tpu.memory_space<vmem>>, vector<2x8x1x128xf32>
    tpu.vector_store %arg11[%c0_81, %c1_82, %c7, %c256_83], %115 {strides = array<i32>} : memref<2x10x8x384xf32, #tpu.memory_space<vmem>>, vector<2x8x1x128xf32>,
    %c0_84 = arith.constant 0 : index
    %c0_85 = arith.constant 0 : index
    %c0_86 = arith.constant 0 : index
    %c0_87 = arith.constant 0 : index
    %117 = vector.load %arg11[%c0_84, %c0_85, %c0_86, %c0_87] : memref<2x10x8x384xf32, #tpu.memory_space<vmem>>, vector<2x8x8x384xf32>
    %118 = vector.shape_cast %117 : vector<2x8x8x384xf32> to vector<128x384xf32>
    %119 = arith.truncf %118 : vector<128x384xf32> to vector<128x384xbf16>
    %c0_88 = arith.constant 0 : index
    %c0_89 = arith.constant 0 : index
    %c0_90 = arith.constant 0 : index
    %120 = vector.load %arg4[%c0_88, %c0_89, %c0_90] : memref<3x384x128xbf16, #tpu.memory_space<vmem>>, vector<1x384x128xbf16>
    %121 = vector.shape_cast %120 : vector<1x384x128xbf16> to vector<384x128xbf16>
    %cst_91 = arith.constant dense<0.000000e+00> : vector<128x128xf32>
    %122 = tpu.matmul %119, %121, %cst_91 {dimension_numbers = #tpu.dot_dimension_numbers<[1], [0], [0], [1], [0, 0, 1, 1], [], []>} : vector<128x384xbf16>, vector<384x128xbf16>, vector<128x128xf32> -> vector<128x128xf32>
    %c0_92 = arith.constant 0 : index
    %c1_93 = arith.constant 1 : index
    %c0_94 = arith.constant 0 : index
    %c0_95 = arith.constant 0 : index
    %123 = vector.load %arg11[%c0_92, %c1_93, %c0_94, %c0_95] : memref<2x10x8x384xf32, #tpu.memory_space<vmem>>, vector<2x8x8x384xf32>
    %124 = vector.shape_cast %123 : vector<2x8x8x384xf32> to vector<128x384xf32>
    %125 = arith.truncf %124 : vector<128x384xf32> to vector<128x384xbf16>
    %c1_96 = arith.constant 1 : index
    %c0_97 = arith.constant 0 : index
    %c0_98 = arith.constant 0 : index
    %126 = vector.load %arg4[%c1_96, %c0_97, %c0_98] : memref<3x384x128xbf16, #tpu.memory_space<vmem>>, vector<1x384x128xbf16>
    %127 = vector.shape_cast %126 : vector<1x384x128xbf16> to vector<384x128xbf16>
    %cst_99 = arith.constant dense<0.000000e+00> : vector<128x128xf32>
    %128 = tpu.matmul %125, %127, %cst_99 {dimension_numbers = #tpu.dot_dimension_numbers<[1], [0], [0], [1], [0, 0, 1, 1], [], []>} : vector<128x384xbf16>, vector<384x128xbf16>, vector<128x128xf32> -> vector<128x128xf32>
    %129 = arith.addf %122, %128 : vector<128x128xf32>
    %c0_100 = arith.constant 0 : index
    %c2_101 = arith.constant 2 : index
    %c0_102 = arith.constant 0 : index
    %c0_103 = arith.constant 0 : index
    %130 = vector.load %arg11[%c0_100, %c2_101, %c0_102, %c0_103] : memref<2x10x8x384xf32, #tpu.memory_space<vmem>>, vector<2x8x8x384xf32>
    %131 = vector.shape_cast %130 : vector<2x8x8x384xf32> to vector<128x384xf32>
    %132 = arith.truncf %131 : vector<128x384xf32> to vector<128x384xbf16>
    %c2_104 = arith.constant 2 : index
    %c0_105 = arith.constant 0 : index
    %c0_106 = arith.constant 0 : index
    %133 = vector.load %arg4[%c2_104, %c0_105, %c0_106] : memref<3x384x128xbf16, #tpu.memory_space<vmem>>, vector<1x384x128xbf16>
    %134 = vector.shape_cast %133 : vector<1x384x128xbf16> to vector<384x128xbf16>
    %cst_107 = arith.constant dense<0.000000e+00> : vector<128x128xf32>
    %135 = tpu.matmul %132, %134, %cst_107 {dimension_numbers = #tpu.dot_dimension_numbers<[1], [0], [0], [1], [0, 0, 1, 1], [], []>} : vector<128x384xbf16>, vector<384x128xbf16>, vector<128x128xf32> -> vector<128x128xf32>
    %136 = arith.addf %129, %135 : vector<128x128xf32>
    %c0_108 = arith.constant 0 : index
    %c0_109 = arith.constant 0 : index
    %137 = vector.load %arg8[%c0_108, %c0_109] : memref<1x128xf32, #tpu.memory_space<vmem>>, vector<1x128xf32>
    %c0_110 = arith.constant 0 : index
    %c0_111 = arith.constant 0 : index
    %138 = vector.load %arg9[%c0_110, %c0_111] : memref<1x128xf32, #tpu.memory_space<vmem>>, vector<1x128xf32>
    %139 = vector.extract_strided_slice %136 {offsets = [0, 0], sizes = [64, 128], strides = [1, 1]} : vector<128x128xf32> to vector<64x128xf32>
    %cst_112 = arith.constant dense<0.000000e+00> : vector<128xf32>
    %140 = vector.multi_reduction <add>, %139, %cst_112 [0] : vector<64x128xf32> to vector<128xf32>
    %141 = vector.shape_cast %140 : vector<128xf32> to vector<1x128xf32>
    %c0_113 = arith.constant 0 : index
    %c0_114 = arith.constant 0 : index
    %142 = vector.load %arg12[%c0_113, %c0_114] : memref<4x128xf32, #tpu.memory_space<vmem>>, vector<1x128xf32>
    tpu.vector_store %arg12[%c0_113, %c0_114], %141 {strides = array<i32>} : memref<4x128xf32, #tpu.memory_space<vmem>>, vector<1x128xf32>,
    %143 = arith.mulf %139, %139 : vector<64x128xf32>
    %cst_115 = arith.constant dense<0.000000e+00> : vector<128xf32>
    %144 = vector.multi_reduction <add>, %143, %cst_115 [0] : vector<64x128xf32> to vector<128xf32>
    %145 = vector.shape_cast %144 : vector<128xf32> to vector<1x128xf32>
    %c2_116 = arith.constant 2 : index
    %c0_117 = arith.constant 0 : index
    %146 = vector.load %arg12[%c2_116, %c0_117] : memref<4x128xf32, #tpu.memory_space<vmem>>, vector<1x128xf32>
    tpu.vector_store %arg12[%c2_116, %c0_117], %145 {strides = array<i32>} : memref<4x128xf32, #tpu.memory_space<vmem>>, vector<1x128xf32>,
    %147 = vector.extract_strided_slice %136 {offsets = [64, 0], sizes = [64, 128], strides = [1, 1]} : vector<128x128xf32> to vector<64x128xf32>
    %cst_118 = arith.constant dense<0.000000e+00> : vector<128xf32>
    %148 = vector.multi_reduction <add>, %147, %cst_118 [0] : vector<64x128xf32> to vector<128xf32>
    %149 = vector.shape_cast %148 : vector<128xf32> to vector<1x128xf32>
    %c1_119 = arith.constant 1 : index
    %c0_120 = arith.constant 0 : index
    %150 = vector.load %arg12[%c1_119, %c0_120] : memref<4x128xf32, #tpu.memory_space<vmem>>, vector<1x128xf32>
    tpu.vector_store %arg12[%c1_119, %c0_120], %149 {strides = array<i32>} : memref<4x128xf32, #tpu.memory_space<vmem>>, vector<1x128xf32>,
    %151 = arith.mulf %147, %147 : vector<64x128xf32>
    %cst_121 = arith.constant dense<0.000000e+00> : vector<128xf32>
    %152 = vector.multi_reduction <add>, %151, %cst_121 [0] : vector<64x128xf32> to vector<128xf32>
    %153 = vector.shape_cast %152 : vector<128xf32> to vector<1x128xf32>
    %c3_122 = arith.constant 3 : index
    %c0_123 = arith.constant 0 : index
    %154 = vector.load %arg12[%c3_122, %c0_123] : memref<4x128xf32, #tpu.memory_space<vmem>>, vector<1x128xf32>
    tpu.vector_store %arg12[%c3_122, %c0_123], %153 {strides = array<i32>} : memref<4x128xf32, #tpu.memory_space<vmem>>, vector<1x128xf32>,
    %c0_124 = arith.constant 0 : index
    %c0_125 = arith.constant 0 : index
    %155 = vector.load %arg12[%c0_124, %c0_125] : memref<4x128xf32, #tpu.memory_space<vmem>>, vector<4x128xf32>
    %cst_126 = arith.constant dense<0.000000e+00> : vector<4x128xf32>
    %156 = tpu.matmul %155, %0, %cst_126 {dimension_numbers = #tpu.dot_dimension_numbers<[1], [0], [0], [1], [0, 0, 1, 1], [], []>} : vector<4x128xf32>, vector<128x128xf32>, vector<4x128xf32> -> vector<4x128xf32>
    %157 = vector.extract_strided_slice %156 {offsets = [0, 0], sizes = [2, 128], strides = [1, 1]} : vector<4x128xf32> to vector<2x128xf32>
    %158 = vector.extract_strided_slice %156 {offsets = [2, 0], sizes = [2, 128], strides = [1, 1]} : vector<4x128xf32> to vector<2x128xf32>
    %159 = arith.mulf %157, %157 : vector<2x128xf32>
    %160 = arith.subf %158, %159 : vector<2x128xf32>
    %cst_127 = arith.constant 9.99999974E-6 : f32
    %161 = vector.broadcast %cst_127 : f32 to vector<2x128xf32>
    %162 = arith.addf %160, %161 : vector<2x128xf32>
    %163 = math.rsqrt %162 : vector<2x128xf32>
    %164 = vector.broadcast %137 : vector<1x128xf32> to vector<2x128xf32>
    %165 = arith.mulf %163, %164 : vector<2x128xf32>
    %166 = arith.mulf %157, %165 : vector<2x128xf32>
    %167 = vector.broadcast %138 : vector<1x128xf32> to vector<2x128xf32>
    %168 = arith.subf %167, %166 : vector<2x128xf32>
    %169 = vector.shape_cast %136 : vector<128x128xf32> to vector<2x64x128xf32>
    %170 = vector.shape_cast %165 : vector<2x128xf32> to vector<2x1x128xf32>
    %171 = vector.broadcast %170 : vector<2x1x128xf32> to vector<2x64x128xf32>
    %172 = arith.mulf %169, %171 : vector<2x64x128xf32>
    %173 = vector.shape_cast %168 : vector<2x128xf32> to vector<2x1x128xf32>
    %174 = vector.broadcast %173 : vector<2x1x128xf32> to vector<2x64x128xf32>
    %175 = arith.addf %172, %174 : vector<2x64x128xf32>
    %c0_128 = arith.constant 0 : index
    %c0_129 = arith.constant 0 : index
    %c0_130 = arith.constant 0 : index
    %176 = vector.load %arg2[%c0_128, %c0_129, %c0_130] : memref<2x64x128xf32, #tpu.memory_space<vmem>>, vector<2x64x128xf32>
    %177 = arith.addf %175, %176 : vector<2x64x128xf32>
    %cst_131 = arith.constant 0.707106769 : f32
    %178 = vector.broadcast %cst_131 : f32 to vector<2x64x128xf32>
    %179 = arith.mulf %177, %178 : vector<2x64x128xf32>
    %180 = math.absf %179 : vector<2x64x128xf32>
    %cst_132 = arith.constant 0.327591091 : f32
    %181 = vector.broadcast %cst_132 : f32 to vector<2x64x128xf32>
    %182 = arith.mulf %181, %180 : vector<2x64x128xf32>
    %cst_133 = arith.constant 1.000000e+00 : f32
    %183 = vector.broadcast %cst_133 : f32 to vector<2x64x128xf32>
    %184 = arith.addf %183, %182 : vector<2x64x128xf32>
    %185 = tpu.reciprocal %184 {approx = true} : vector<2x64x128xf32> -> vector<2x64x128xf32>
    %186 = arith.mulf %184, %185 : vector<2x64x128xf32>
    %cst_134 = arith.constant 2.000000e+00 : f32
    %187 = vector.broadcast %cst_134 : f32 to vector<2x64x128xf32>
    %188 = arith.subf %187, %186 : vector<2x64x128xf32>
    %189 = arith.mulf %185, %188 : vector<2x64x128xf32>
    %cst_135 = arith.constant 1.06140542 : f32
    %190 = vector.broadcast %cst_135 : f32 to vector<2x64x128xf32>
    %191 = arith.mulf %190, %189 : vector<2x64x128xf32>
    %cst_136 = arith.constant -1.45315206 : f32
    %192 = vector.broadcast %cst_136 : f32 to vector<2x64x128xf32>
    %193 = arith.addf %191, %192 : vector<2x64x128xf32>
    %194 = arith.mulf %193, %189 : vector<2x64x128xf32>
    %cst_137 = arith.constant 1.42141378 : f32
    %195 = vector.broadcast %cst_137 : f32 to vector<2x64x128xf32>
    %196 = arith.addf %194, %195 : vector<2x64x128xf32>
    %197 = arith.mulf %196, %189 : vector<2x64x128xf32>
    %cst_138 = arith.constant -0.284496725 : f32
    %198 = vector.broadcast %cst_138 : f32 to vector<2x64x128xf32>
    %199 = arith.addf %197, %198 : vector<2x64x128xf32>
    %200 = arith.mulf %199, %189 : vector<2x64x128xf32>
    %cst_139 = arith.constant 0.254829586 : f32
    %201 = vector.broadcast %cst_139 : f32 to vector<2x64x128xf32>
    %202 = arith.addf %200, %201 : vector<2x64x128xf32>
    %203 = arith.mulf %202, %189 : vector<2x64x128xf32>
    %cst_140 = arith.constant 0.000000e+00 : f32
    %204 = vector.broadcast %cst_140 : f32 to vector<2x64x128xf32>
    %205 = arith.subf %204, %180 : vector<2x64x128xf32>
    %206 = arith.mulf %205, %180 : vector<2x64x128xf32>
    %207 = math.exp %206 : vector<2x64x128xf32>
    %208 = arith.mulf %203, %207 : vector<2x64x128xf32>
    %cst_141 = arith.constant 1.000000e+00 : f32
    %209 = vector.broadcast %cst_141 : f32 to vector<2x64x128xf32>
    %210 = arith.subf %209, %208 : vector<2x64x128xf32>
    %cst_142 = arith.constant 0.000000e+00 : f32
    %211 = vector.broadcast %cst_142 : f32 to vector<2x64x128xf32>
    %212 = arith.cmpf oge, %179, %211 : vector<2x64x128xf32>
    %cst_143 = arith.constant 0.000000e+00 : f32
    %213 = vector.broadcast %cst_143 : f32 to vector<2x64x128xf32>
    %214 = arith.subf %213, %210 : vector<2x64x128xf32>
    %215 = arith.select %212, %210, %214 : vector<2x64x128xi1>, vector<2x64x128xf32>
    %cst_144 = arith.constant 5.000000e-01 : f32
    %216 = vector.broadcast %cst_144 : f32 to vector<2x64x128xf32>
    %217 = arith.mulf %216, %177 : vector<2x64x128xf32>
    %cst_145 = arith.constant 1.000000e+00 : f32
    %218 = vector.broadcast %cst_145 : f32 to vector<2x64x128xf32>
    %219 = arith.addf %218, %215 : vector<2x64x128xf32>
    %220 = arith.mulf %217, %219 : vector<2x64x128xf32>
    %c0_146 = arith.constant 0 : index
    %c0_147 = arith.constant 0 : index
    %c0_148 = arith.constant 0 : index
    %221 = vector.load %arg10[%c0_146, %c0_147, %c0_148] : memref<2x64x128xf32, #tpu.memory_space<vmem>>, vector<2x64x128xf32>
    tpu.vector_store %arg10[%c0_146, %c0_147, %c0_148], %220 {strides = array<i32>} : memref<2x64x128xf32, #tpu.memory_space<vmem>>, vector<2x64x128xf32>,
    return
  }
  func.func @transform_0(%arg0: i32) -> (i32, i32, i32, i32) {
    %c0_i32 = arith.constant 0 : i32
    %c0_i32_0 = arith.constant 0 : i32
    %c0_i32_1 = arith.constant 0 : i32
    %c0_i32_2 = arith.constant 0 : i32
    return %arg0, %c0_i32, %c0_i32_0, %c0_i32_1 : i32, i32, i32, i32
  }
  func.func @transform_1(%arg0: i32) -> (i32, i32, i32) {
    %c0_i32 = arith.constant 0 : i32
    %c0_i32_0 = arith.constant 0 : i32
    %c0_i32_1 = arith.constant 0 : i32
    return %arg0, %c0_i32, %c0_i32_0 : i32, i32, i32
  }
  func.func @transform_2(%arg0: i32) -> (i32, i32, i32) {
    %c0_i32 = arith.constant 0 : i32
    %c0_i32_0 = arith.constant 0 : i32
    %c0_i32_1 = arith.constant 0 : i32
    %c0_i32_2 = arith.constant 0 : i32
    return %c0_i32, %c0_i32_0, %c0_i32_1 : i32, i32, i32
  }
  func.func @transform_3(%arg0: i32) -> (i32, i32, i32) {
    %c0_i32 = arith.constant 0 : i32
    %c0_i32_0 = arith.constant 0 : i32
    %c0_i32_1 = arith.constant 0 : i32
    %c0_i32_2 = arith.constant 0 : i32
    return %c0_i32, %c0_i32_0, %c0_i32_1 : i32, i32, i32
  }
  func.func @transform_4(%arg0: i32) -> (i32, i32) {
    %c0_i32 = arith.constant 0 : i32
    %c0_i32_0 = arith.constant 0 : i32
    %c0_i32_1 = arith.constant 0 : i32
    return %c0_i32, %c0_i32_0 : i32, i32
  }
  func.func @transform_5(%arg0: i32) -> (i32, i32) {
    %c0_i32 = arith.constant 0 : i32
    %c0_i32_0 = arith.constant 0 : i32
    %c0_i32_1 = arith.constant 0 : i32
    return %c0_i32, %c0_i32_0 : i32, i32
  }
  func.func @transform_6(%arg0: i32) -> (i32, i32) {
    %c0_i32 = arith.constant 0 : i32
    %c0_i32_0 = arith.constant 0 : i32
    %c0_i32_1 = arith.constant 0 : i32
    return %c0_i32, %c0_i32_0 : i32, i32
  }
  func.func @transform_7(%arg0: i32) -> (i32, i32) {
    %c0_i32 = arith.constant 0 : i32
    %c0_i32_0 = arith.constant 0 : i32
    %c0_i32_1 = arith.constant 0 : i32
    return %c0_i32, %c0_i32_0 : i32, i32
  }
  func.func @transform_8(%arg0: i32) -> (i32, i32) {
    %c0_i32 = arith.constant 0 : i32
    %c0_i32_0 = arith.constant 0 : i32
    %c0_i32_1 = arith.constant 0 : i32
    return %c0_i32, %c0_i32_0 : i32, i32
  }
  func.func @transform_9(%arg0: i32) -> (i32, i32, i32) {
    %c0_i32 = arith.constant 0 : i32
    %c0_i32_0 = arith.constant 0 : i32
    %c0_i32_1 = arith.constant 0 : i32
    return %arg0, %c0_i32, %c0_i32_0 : i32, i32, i32
  }
}

</mosaic_0001>

<bundles_post_ra>
// kernel: tpu_custom_call.1
= control target key start
LH: loop header
LB: loop body
LE: loop exit
PB: predicated region body
PF: predicated region fallthrough
CT: control target
= control target key end

     0   :  { %s9297_s0 = inlined_call_operand.hbm [shape: f32[4,10,8,384], index: 0, kind: input, shape index: {}]   ;;  %s9298_s1 = inlined_call_operand.hbm [shape: f32[4,64,128], index: 1, kind: input, shape index: {}]   ;;  %s9299_s2 = inlined_call_operand.hbm [shape: bf16[3,384,128], index: 2, kind: input, shape index: {}]   ;;  %s9300_s3 = inlined_call_operand.hbm [shape: bf16[3,384,128], index: 3, kind: input, shape index: {}]   ;;  %s9301_s4 = inlined_call_operand.hbm [shape: f32[128,128], index: 4, kind: input, shape index: {}]   ;;  %s9302_s5 = inlined_call_operand.vmem [shape: f32[1,128], index: 5, kind: input, shape index: {}]   ;;  %s9303_s6 = inlined_call_operand.vmem [shape: f32[1,128], index: 6, kind: input, shape index: {}]   ;;  %s9304_s7 = inlined_call_operand.vmem [shape: f32[1,128], index: 7, kind: input, shape index: {}]   ;;  %s9305_s8 = inlined_call_operand.vmem [shape: f32[1,128], index: 8, kind: input, shape index: {}]   ;;  %s9306_s9 = inlined_call_operand.hbm [shape: f32[4,64,128], index: 9, kind: output, shape index: {}]  }
   0x1   :  { %9416 = sst [smem:[#allocation58_spill]] %s9297_s0 }
   0x2   :  { %9417 = sst [smem:[#allocation59_spill]] %s9299_s2 }
   0x3   :  { %9418 = sst [smem:[#allocation60_spill]] %s9300_s3 }
   0x4   :  { %9419 = sst [smem:[#allocation61_spill]] %s9301_s4 }
   0x5   :  { %9420 = sst [smem:[#allocation62_spill]] %s9306_s9 }
   0x6   :  { %14 = vsyncpa [#allocation5], 0 }
   0x7   :  { %16 = vsyncpa [#allocation5 + $0x1], 0 }
   0x8   :  { %17 = vsyncpa [#allocation8], 0 }
   0x9   :  { %19 = vsyncpa [#allocation8 + $0x1], 0 }
   0xa   :  { %20 = vsyncpa [#allocation11], 0 }
   0xb   :  { %21 = vsyncpa [#allocation6], 0 }
   0xc   :  { %23 = vsyncpa [#allocation6 + $0x1], 0  ;;  %s6993_s30 = smov 0   ;;  %s6995_s10 = smov 0  }
   0xd   :  { %s6997_s11 = smov 0   ;;  %s6999_s12 = smov 0  }
   0xe LB: > { %9421 = sst [smem:[#allocation19_spill]] %s6911_s30  ;;  %s7014_s13 = sadd.s32 4294967295, %s6923_s12   ;;  %s6923_s12 = sphi %s6999_s12, %s9594_s12   ;;  %s6919_s11 = sphi %s6997_s11, %s9593_s11   ;;  %s6915_s10 = sphi %s6995_s10, %s9592_s10   ;;  %s6911_s30 = sphi %s6993_s30, %s9591_s30  }
   0xf   : > { %s5070_s14 = sadd.s32 4294967294, %s6923_s12   ;;  %p49_p0 = scmp.ne.s32.totalorder %s6915_s10, %s6911_s30 }
  0x10   : > { %p9307_p1 = scmp.eq.s32.totalorder %s7014_s13, 0  ;;  %p252_p3 = scmp.eq.s32.totalorder %s5070_s14, 1 }
  0x11   : > { %p5071_p5 = scmp.ge.s32.totalorder %s6923_s12, 1  ;;  %p259_p7 = scmp.lt.s32.totalorder %s6923_s12, 3 }
  0x12   : > { %p7023_p4 = por %p9307_p1, %p49_p0  ;;  %p7028_p6 = por %p252_p3, %p49_p0 }
  0x13   : > { %p7033_p8 = pnand %p5071_p5, %p259_p7  ;;  %s6925_s18 = smov [#allocation9]  }
  0x14   : > { %s9422_s15 = scalar_select %p7023_p4, 1, 0 }
  0x15   : > { %s9423_s16 = scalar_select %p7028_p6, 1, 0 }
  0x16   : > { %s9425_s17 = scalar_select %p7033_p8, 1, 0 }
  0x17   : > { %9424 = sst [smem:[#allocation20_spill]] %s9423_s16  ;;  %s271_s19 = sshll.u32 %s6925_s18, 4  ;;  %s7037_s19 = int_to_ptr.vmem [resolvable:$true] %s271_s19 }
  0x18   : > { %p6348_p9 = pneg %p7033_p8  ;;  %s6926_s21 = smov [#allocation10]  }
  0x19   : > { %s284_s22 = sshll.u32 %s6926_s21, 4  ;;  %s6927_s23 = smov [#allocation12]   ;;  %s7048_s22 = int_to_ptr.vmem [resolvable:$true] %s284_s22 }
  0x1a   : > { %p7044_p11 = pnand %p6348_p9, %p9307_p1  ;;  %s7050_s24 = sshll.u32 %s6927_s23, 4  ;;  %s298_s24 = int_to_ptr.vmem [resolvable:$true] %s7050_s24 }
  0x1b   : > { %s9427_s2 = sld [smem:[#allocation59_spill]] }
  0x1c   : > { %p7060_p13 = pneg %p7044_p11 }
  0x21   : > { %s6701_s27 = scalar_lea.hbm %s9427_s2, 9216 }
  0x22   : > { %p6702_p12 = scmp.ne.s32.totalorder %s9427_s2, %s6701_s27  ;;  %p6708_p5 = scmp.lt.u32.totalorder %s6701_s27, %s9427_s2 }
  0x24   : > { %p6704_p0 = pnand %p7060_p13, %p6702_p12 }
  0x26   : > { %p6705_p3 = pneg %p6704_p0 }
  0x28   : > { %p6710_p7 = pnand %p6708_p5, %p6705_p3 }
  0x2a   : > { %6713 = shalt.err (!%p6710_p7)
}
  0x2b   : > { %s6714_s23 = scalar_lea.vmem %s7037_s19, 9216  ;;  %p6722_p2 = scmp.lt.s32.totalorder %s7037_s19, %s7037_s19 }
  0x2c   : > { %p6715_p9 = scmp.ne.s32.totalorder %s7037_s19, %s6714_s23  ;;  %p6723_p6 = scmp.lt.s32.totalorder %s6714_s23, %s6714_s23 }
  0x2e   : > { %p6717_p10 = pnand %p6715_p9, %p7060_p13  ;;  %p6724_p12 = por %p6723_p6, %p6722_p2 }
  0x30   : > { %p6718_p1 = pneg %p6717_p10 }
  0x32   : > { %p6725_p0 = pnand %p6724_p12, %p6718_p1 }
  0x34   : > { %6728 = shalt.err (!%p6725_p0)
}
  0x35   : > { %s6928_s25 = smov 64   ;;  %s6929_s26 = smov 4  }
  0x36   : > { %6351 = dma.hbm_to_vmem [thread:$0]  (!%p7044_p11), %s9427_s2, 9216, %s7037_s19, [#allocation8], %s6928_s25, %s6928_s25, %s6929_s26  }
  0x37   : > { %s9429_s3 = sld [smem:[#allocation60_spill]] }
  0x3d   : > { %s6729_s21 = scalar_lea.hbm %s9429_s3, 9216 }
  0x3e   : > { %p6730_p2 = scmp.ne.s32.totalorder %s9429_s3, %s6729_s21  ;;  %p6736_p10 = scmp.lt.u32.totalorder %s6729_s21, %s9429_s3 }
  0x40   : > { %p6732_p1 = pnand %p6730_p2, %p7060_p13 }
  0x42   : > { %p6733_p6 = pneg %p6732_p1 }
  0x44   : > { %p6738_p3 = pnand %p6736_p10, %p6733_p6 }
  0x46   : > { %6741 = shalt.err (!%p6738_p3)
}
  0x47   : > { %s6742_s19 = scalar_lea.vmem %s7048_s22, 9216  ;;  %p6750_p12 = scmp.lt.s32.totalorder %s7048_s22, %s7048_s22 }
  0x48   : > { %p6743_p5 = scmp.ne.s32.totalorder %s7048_s22, %s6742_s19  ;;  %p6751_p0 = scmp.lt.s32.totalorder %s6742_s19, %s6742_s19 }
  0x4a   : > { %p6745_p7 = pnand %p6743_p5, %p7060_p13  ;;  %p6752_p2 = por %p6751_p0, %p6750_p12 }
  0x4c   : > { %p6746_p9 = pneg %p6745_p7 }
  0x4e   : > { %p6753_p1 = pnand %p6752_p2, %p6746_p9 }
  0x50   : > { %6756 = shalt.err (!%p6753_p1)
}
  0x51   : > { %6354 = dma.hbm_to_vmem [thread:$0]  (!%p7044_p11), %s9429_s3, 9216, %s7048_s22, [#allocation11], %s6928_s25, %s6928_s25, %s6929_s26  }
  0x52   : > { %s9430_s4 = sld [smem:[#allocation61_spill]] }
  0x58   : > { %s6757_s28 = scalar_lea.hbm %s9430_s4, 2048 }
  0x59   : > { %p6758_p6 = scmp.ne.s32.totalorder %s9430_s4, %s6757_s28  ;;  %p6764_p5 = scmp.lt.u32.totalorder %s6757_s28, %s9430_s4 }
  0x5b   : > { %p6760_p10 = pnand %p6758_p6, %p7060_p13 }
  0x5d   : > { %p6761_p3 = pneg %p6760_p10 }
  0x5f   : > { %p6766_p7 = pnand %p6764_p5, %p6761_p3 }
  0x61   : > { %6769 = shalt.err (!%p6766_p7)
}
  0x62   : > { %s6770_s19 = scalar_lea.vmem %s298_s24, 2048  ;;  %p6778_p2 = scmp.lt.s32.totalorder %s298_s24, %s298_s24 }
  0x63   : > { %p6771_p9 = scmp.ne.s32.totalorder %s298_s24, %s6770_s19  ;;  %p6779_p1 = scmp.lt.s32.totalorder %s6770_s19, %s6770_s19 }
  0x65   : > { %p6773_p12 = pnand %p6771_p9, %p7060_p13  ;;  %p6780_p4 = por %p6779_p1, %p6778_p2 }
  0x67   : > { %p6774_p0 = pneg %p6773_p12 }
  0x69   : > { %p6781_p8 = pnand %p6780_p4, %p6774_p0 }
  0x6b   : > { %6784 = shalt.err (!%p6781_p8)
}
  0x6c   : > { %s9313_s22 = smov 128   ;;  %s9314_s14 = smov 8  }
  0x6d   : > { %6357 = dma.hbm_to_vmem [thread:$0]  (!%p7044_p11), %s9430_s4, 2048, %s298_s24, [#allocation11], %s9313_s22, %s9313_s22, %s9314_s14  }
  0x6e   : > { %s7127_s9 = sadd.s32 1, %s6923_s12   ;;  %s36_s16 = sadd.s32 1, %s6919_s11 }
  0x6f   : > { %s33_s30 = ssub.s32 %s6923_s12, %s7127_s9  ;;  %p43_p8 = scmp.ne.s32.totalorder %s6919_s11, %s6915_s10 }
  0x70   : > { %p34_p4 = scmp.eq.s32.totalorder %s33_s30, 0  ;;  %p44_p13 = scmp.eq.s32.totalorder %s6923_s12, 0 }
  0x71   : > { %p6372_p6 = scmp.lt.s32.totalorder %s6923_s12, 2  ;;  %p9431_p3 = scmp.eq.s32.totalorder %s7014_s13, 1 }
  0x72   : > { %s7137_s27 = scalar_select %p34_p4, %s6919_s11, %s36_s16  }
  0x73   : > { %p45_p10 = por %p44_p13, %p43_p8  ;;  %p7141_p5 = por %p9431_p3, %p43_p8 }
  0x74   : > { %s7146_s28 = sand.u32 1, %s6919_s11   ;;  %s6328_s24 = smul.u32 7680, %s6923_s12 }
  0x75   : > { %s6327_s29 = smul.u32 480, %s7146_s28  ;;  %s9433_s0 = sld [smem:[#allocation58_spill]] }
  0x76   : > { %p7155_p11 = pnand %p6372_p6, %p45_p10  ;;  %s324_s30 = scalar_lea.sflag [#allocation5], %s7146_s28 }
  0x77   : > { %s327_s25 = scalar_lea.vmem [#allocation4], %s6327_s29 }
  0x78   : > { %s335_s26 = sshll.u32 %s327_s25, 4  ;;  %p6787_p9 = pneg %p7155_p11  ;;  %s7159_s26 = int_to_ptr.vmem [resolvable:$true] %s335_s26 }
  0x7b   : > { %s7153_s23 = scalar_lea.hbm %s9433_s0, %s6328_s24  ;;  %s6790_s21 = scalar_lea.hbm %s9433_s0, 15360 }
  0x7c   : > { %s6785_s16 = scalar_lea.hbm %s7153_s23, 7680  ;;  %p6791_p2 = scmp.lt.u32.totalorder %s7153_s23, %s9433_s0 }
  0x7d   : > { %p6786_p7 = scmp.ne.s32.totalorder %s7153_s23, %s6785_s16  ;;  %p6792_p1 = scmp.lt.u32.totalorder %s6790_s21, %s6785_s16 }
  0x7e   : > { %p6794_p8 = scmp.lt.u32.totalorder %s6785_s16, %s7153_s23 }
  0x7f   : > { %p6788_p12 = pnand %p6787_p9, %p6786_p7  ;;  %p6793_p4 = por %p6792_p1, %p6791_p2 }
  0x81   : > { %p6789_p0 = pneg %p6788_p12  ;;  %p6795_p13 = por %p6794_p8, %p6793_p4 }
  0x83   : > { %p6796_p6 = pnand %p6795_p13, %p6789_p0 }
  0x85   : > { %6799 = shalt.err (!%p6796_p6)
}
  0x86   : > { %s6800_s29 = scalar_lea.vmem %s7159_s26, 7680  ;;  %s6932_s25 = smov [#allocation4]  }
  0x87   : > { %p6801_p10 = scmp.ne.s32.totalorder %s7159_s26, %s6800_s29  ;;  %s6805_s24 = sshll.u32 %s6932_s25, 4  ;;  %s6806_s24 = int_to_ptr.vmem [resolvable:$false] %s6805_s24 }
  0x88   : > { %s6807_s22 = scalar_lea.vmem %s6806_s24, 15360  ;;  %p6808_p12 = scmp.lt.s32.totalorder %s7159_s26, %s6806_s24 }
  0x89   : > { %p6803_p3 = pnand %p6801_p10, %p6787_p9  ;;  %p6809_p2 = scmp.lt.s32.totalorder %s6807_s22, %s6800_s29 }
  0x8b   : > { %p6804_p7 = pneg %p6803_p3  ;;  %p6810_p1 = por %p6809_p2, %p6808_p12 }
  0x8d   : > { %p6811_p4 = pnand %p6810_p1, %p6804_p7 }
  0x8f   : > { %6814 = shalt.err (!%p6811_p4)
}
  0x90   : > { %s6933_s14 = smov 384   ;;  %s6934_s16 = smov 24  }
  0x91   : > { %6361 = dma.hbm_to_vmem [thread:$0]  (!%p7155_p11), %s7153_s23, 7680, %s7159_s26, %s324_s30, %s6933_s14, %s6933_s14, %s6934_s16  }
  0x92   : > { %s345_s18 = sand.u32 1, %s6923_s12   ;;  %s5079_s21 = sshll.u32 %s7146_s28, 7 }
  0x93   : > { %s5340_s25 = sshll.u32 %s6923_s12, 11  ;;  %s349_s29 = scalar_lea.vmem [#allocation7], %s5079_s21 }
  0x94   : > { %s357_s24 = sshll.u32 %s349_s29, 4  ;;  %s7195_s2 = scalar_lea.hbm %s9298_s1, %s5340_s25  ;;  %s7197_s24 = int_to_ptr.vmem [resolvable:$true] %s357_s24 }
  0x95   : > { %s7199_s3 = scalar_lea.sflag [#allocation8], %s345_s18  ;;  %s6815_s4 = scalar_lea.hbm %s7195_s2, 2048 }
  0x96   : > { %p6816_p0 = scmp.ne.s32.totalorder %s7195_s2, %s6815_s4  ;;  %s6820_s0 = scalar_lea.hbm %s9298_s1, 4096 }
  0x97   : > { %p6821_p6 = scmp.lt.u32.totalorder %s7195_s2, %s9298_s1  ;;  %p6822_p10 = scmp.lt.u32.totalorder %s6820_s0, %s6815_s4 }
  0x98   : > { %p6818_p8 = pnand %p6816_p0, %p6787_p9  ;;  %p6824_p7 = scmp.lt.u32.totalorder %s6815_s4, %s7195_s2 }
  0x99   : > { %p6823_p3 = por %p6822_p10, %p6821_p6 }
  0x9a   : > { %p6819_p13 = pneg %p6818_p8 }
  0x9b   : > { %p6825_p12 = por %p6824_p7, %p6823_p3 }
  0x9d   : > { %p6826_p2 = pnand %p6825_p12, %p6819_p13 }
  0x9f   : > { %6829 = shalt.err (!%p6826_p2)
}
  0xa0   : > { %s6830_s14 = scalar_lea.vmem %s7197_s24, 2048  ;;  %s6935_s16 = smov [#allocation7]  }
  0xa1   : > { %p6831_p1 = scmp.ne.s32.totalorder %s7197_s24, %s6830_s14  ;;  %s6835_s18 = sshll.u32 %s6935_s16, 4  ;;  %s6836_s18 = int_to_ptr.vmem [resolvable:$false] %s6835_s18 }
  0xa2   : > { %s6837_s21 = scalar_lea.vmem %s6836_s18, 4096  ;;  %p6838_p8 = scmp.lt.s32.totalorder %s7197_s24, %s6836_s18 }
  0xa3   : > { %p6833_p4 = pnand %p6831_p1, %p6787_p9  ;;  %p6839_p6 = scmp.lt.s32.totalorder %s6837_s21, %s6830_s14 }
  0xa5   : > { %p6834_p0 = pneg %p6833_p4  ;;  %p6840_p10 = por %p6839_p6, %p6838_p8 }
  0xa7   : > { %p6841_p3 = pnand %p6840_p10, %p6834_p0 }
  0xa9   : > { %6844 = shalt.err (!%p6841_p3)
}
  0xaa   : > { %s9435_s4 = smov 8   ;;  %s9436_s25 = smov 128  }
  0xab   : > { %6364 = dma.hbm_to_vmem [thread:$0]  (!%p7155_p11), %s7195_s2, 2048, %s7197_s24, %s7199_s3, %s9436_s25, %s9436_s25, %s9435_s4  }
  0xac   : > { %p9437_p9 = scmp.ne.s32.totalorder %s9425_s17, 0 }
  0xae   : > { %369 = sbr.rel (%p9437_p9) target bundleno = 1807 (0x70f), region = 56 }
  0xb5   : > { %s7231_s29 = sand.u32 1, %s6915_s10   ;;  %p9438_p13 = scmp.ne.s32.totalorder %s9422_s15, 0 }
  0xb6   : > { %s6329_s22 = smul.u32 480, %s7231_s29  ;;  %s372_s28 = scalar_lea.sflag [#allocation5], %s7231_s29 }
  0xb8   : > { %s7235_s23 = scalar_lea.vmem [#allocation4], %s6329_s22 }
  0xb9   : > { %6890 = dma.done.wait (%p9438_p13), %s372_s28, 7680  }
  0xba   : > { %6892 = vsyncadd (%p9438_p13), %s372_s28, 4294959616  ;;  %s380_s2 = sand.u32 1, %s7014_s13   ;;  %s5084_s3 = sshll.u32 %s7231_s29, 7 }
  0xbb   : > { %s381_s17 = scalar_lea.sflag [#allocation8], %s380_s2  ;;  %s7245_s19 = scalar_lea.vmem [#allocation7], %s5084_s3 }
  0xbc   : > { %6894 = dma.done.wait (%p9438_p13), %s381_s17, 2048  }
  0xbd   : > { %6896 = vsyncadd (%p9438_p13), %s381_s17, 4294965248  ;;  %p9439_p11 = scmp.eq.s32.totalorder %s7014_s13, 0 }
  0xbf   : > { %6898 = dma.done.wait (%p9439_p11), [#allocation8], 9216   ;;  %p9440_p7 = pmov %p9439_p11 }
  0xc1   : > { %6900 = vsyncadd (%p9440_p7), [#allocation8], 4294958080  ;;  %p9441_p12 = pmov %p9440_p7 }
  0xc2   : > { %p9442_p2 = pmov %p9440_p7 }
  0xc3   : > { %6902 = dma.done.wait (%p9441_p12), [#allocation11], 11264  }
  0xc4   : > { %6904 = vsyncadd (%p9442_p2), [#allocation11], 4294956032  ;;  %v6424_v0 = vld [vmem:[#allocation9 + $0x100] sm:$0xff]   ;;  %v6427_v3 = vld [vmem:[#allocation9 + $0x108] sm:$0xff]   ;;  %vm6938_vm0 = vmmov 0   ;;  %s5342_s21 = sshll.u32 %s7014_s13, 11 }
  0xc5   : > { %v6425_v1 = vld [vmem:[#allocation9 + $0x140] sm:$0xff]   ;;  %5343 = vmatprep.subr.bf16.mxu0 %v6424_v0  ;;  %v6428_v4 = vld [vmem:[#allocation9 + $0x148] sm:$0xff]   ;;  %v6430_v6 = vld [vmem:[#allocation9 + $0x110] sm:$0xff]   ;;  %s9229_s4 = scalar_lea.vmem [#allocation13], %s5084_s3  ;;  %s9586_s28 = sld [smem:[#allocation62_spill]] }
  0xc6   : > { %v6426_v2 = vld [vmem:[#allocation9 + $0xc0] sm:$0xff]   ;;  %5857 = vmatprep.subr.bf16.mxu1 %v6425_v1  ;;  %v6429_v5 = vld [vmem:[#allocation9 + $0xc8] sm:$0xff]   ;;  %v6431_v7 = vld [vmem:[#allocation9 + $0x150] sm:$0xff]   ;;  %s4946_s25 = sshll.u32 %s9229_s4, 4  ;;  %s4932_s2 = scalar_lea.sflag [#allocation6], %s7231_s29  ;;  %s9241_s25 = int_to_ptr.vmem [resolvable:$true] %s4946_s25 }
  0xc7   : > { %5344 = vmatpush3.bf16.msra.mxu0 %v6426_v2  ;;  %5858 = vmatpush3.bf16.msra.mxu1 %v6425_v1  ;;  %v6432_v8 = vld [vmem:[#allocation9 + $0xd0] sm:$0xff]   ;;  %v6433_v9 = vld [vmem:[#allocation9 + $0x118] sm:$0xff]   ;;  %v6436_v12 = vld [vmem:[#allocation9 + $0x120] sm:$0xff]   ;;  %s6845_s3 = scalar_lea.vmem %s9241_s25, 2048  ;;  %s6940_s17 = smov [#allocation13]  }
  0xc8   : > { %5345 = vmatprep.subr.bf16.mxu0 %v6427_v3  ;;  %5859 = vmatprep.subr.bf16.mxu1 %v6428_v4  ;;  %v6434_v10 = vld [vmem:[#allocation9 + $0x158] sm:$0xff]   ;;  %v6437_v13 = vld [vmem:[#allocation9 + $0x160] sm:$0xff]   ;;  %v6439_v15 = vld [vmem:[#allocation9 + $0x128] sm:$0xff]   ;;  %p6846_p1 = scmp.ne.s32.totalorder %s9241_s25, %s6845_s3 }
  0xc9   : > { %v6435_v11 = vld [vmem:[#allocation9 + $0xd8] sm:$0xff]   ;;  %v6438_v14 = vld [vmem:[#allocation9 + $0xe0] sm:$0xff]   ;;  %v6440_v16 = vld [vmem:[#allocation9 + $0x168] sm:$0xff]  }
  0xca   : > { %v6441_v17 = vld [vmem:[#allocation9 + $0xe8] sm:$0xff]   ;;  %v6442_v18 = vld [vmem:[#allocation9 + $0x130] sm:$0xff]   ;;  %v7260_v21 = vld [vmem:[%s7235_s23 + $0x20] sm:$0xff]  ;;  %p6847_p4 = pnand %p6846_p1, %p7141_p5 }
  0xcb   : > { %5346 = vmatpush3.bf16.msra.mxu0 %v6429_v5  ;;  %5860 = vmatpush3.bf16.msra.mxu1 %v6428_v4  ;;  %v6443_v19 = vld [vmem:[#allocation9 + $0x170] sm:$0xff]   ;;  %v7263_v22 = vld [vmem:[%s7235_s23 + $0x38] sm:$0xff]  ;;  %v7266_v23 = vld [vmem:[%s7235_s23 + $0x28] sm:$0xff] }
  0xcc   : > { %5347 = vmatprep.subr.bf16.mxu0 %v6430_v6  ;;  %5861 = vmatprep.subr.bf16.mxu1 %v6431_v7  ;;  %v6444_v20 = vld [vmem:[#allocation9 + $0xf0] sm:$0xff]   ;;  %v6445_v24 = vld [vmem:[#allocation9 + $0x138] sm:$0xff]   ;;  %v626_v26 = vpack.c.bf16 %v7263_v22, %v7260_v21  ;;  %v5094_v27 = vld [vmem:[%s7235_s23 + $0x40] sm:$0xff]  ;;  %p6848_p0 = pneg %p6847_p4 }
  0xcd   : > { %v6446_v25 = vld [vmem:[#allocation9 + $0x178] sm:$0xff]   ;;  %v627_v29 = vpack.c.bf16 %v5094_v27, %v7266_v23  ;;  %v7277_v32 = vld [vmem:[%s7235_s23 + $0x30] sm:$0xff]  ;;  %v6448_v35 = vld [vmem:[#allocation9 + $0x40] sm:$0xff]  }
  0xce   : > { %v6447_v28 = vld [vmem:[#allocation9 + $0xf8] sm:$0xff]   ;;  %874 = vmatprep.mubr.bf16.mxu0 %v626_v26  ;;  %v5100_v34 = vld [vmem:[%s7235_s23 + $0x70] sm:$0xff]  ;;  %v7288_v39 = vld [vmem:[%s7235_s23 + $0x68] sm:$0xff] }
  0xcf   : > { %5348 = vmatpush3.bf16.msra.mxu0 %v6432_v8  ;;  %5862 = vmatpush3.bf16.msra.mxu1 %v6431_v7  ;;  %v7273_v30 = vld [vmem:[%s7235_s23 + $0x18] sm:$0xff]  ;;  %v7283_v36 = vld [vmem:[%s7235_s23 + $0x50] sm:$0xff]  ;;  %v5103_v40 = vld [vmem:[%s7235_s23 + $0x88] sm:$0xff] }
  0xd0   : > { %5349 = vmatprep.subr.bf16.mxu0 %v6433_v9  ;;  %5863 = vmatprep.subr.bf16.mxu1 %v6434_v10  ;;  %v5097_v31 = vld [vmem:[%s7235_s23 + $0x58] sm:$0xff]  ;;  %v625_v37 = vpack.c.bf16 %v7277_v32, %v7273_v30  ;;  %v5106_v41 = vld [vmem:[%s7235_s23 + $0xa0] sm:$0xff]  ;;  %v629_v43 = vpack.c.bf16 %v7288_v39, %v7283_v36  ;;  %v7295_v45 = vpack.c.bf16 %v5103_v40, %v5100_v34  ;;  %v6450_v46 = vld [vmem:[#allocation9 + $0x48] sm:$0xff]  }
  0xd1   : > { %v7279_v33 = vpack.c.bf16 %v5097_v31, %v5094_v27  ;;  %5873 = vmatprep.mubr.bf16.mxu1 %v627_v29  ;;  %v630_v38 = vpack.c.bf16 %v5100_v34, %v5097_v31  ;;  %v6449_v42 = vld [vmem:[#allocation9] sm:$0xff]   ;;  %v5109_v44 = vld [vmem:[%s7235_s23 + $0xb8] sm:$0xff]  ;;  %v633_v47 = vpack.c.bf16 %v5106_v41, %v5103_v40  ;;  %v6451_v49 = vld [vmem:[#allocation9 + $0x8] sm:$0xff]  }
  0xd2   : > { %v7297_v48 = vpack.c.bf16 %v5109_v44, %v5106_v41  ;;  %v7300_v50 = vld [vmem:[%s7235_s23 + $0x48] sm:$0xff]  ;;  %v7303_v51 = vld [vmem:[%s7235_s23 + $0x60] sm:$0xff]  ;;  %v7306_v52 = vld [vmem:[%s7235_s23 + $0xd0] sm:$0xff] }
  0xd3   : > { %5350 = vmatpush3.bf16.msra.mxu0 %v6435_v11  ;;  %5864 = vmatpush3.bf16.msra.mxu1 %v6434_v10  ;;  %v6452_v53 = vld [vmem:[#allocation9 + $0x50] sm:$0xff]   ;;  %v7309_v54 = vld [vmem:[%s7235_s23 + $0x80] sm:$0xff]  ;;  %v7312_v55 = vld [vmem:[%s7235_s23 + $0x98] sm:$0xff]  ;;  %v628_v58 = vpack.c.bf16 %v7303_v51, %v7300_v50  ;;  %v636_v59 = vpack.c.bf16 %v7306_v52, %v5109_v44 }
  0xd4   : > { %5351 = vmatprep.subr.bf16.mxu0 %v6436_v12  ;;  %5865 = vmatprep.subr.bf16.mxu1 %v6437_v13  ;;  %v7315_v56 = vld [vmem:[%s7235_s23 + $0x118] sm:$0xff]  ;;  %v5118_v57 = vld [vmem:[%s7235_s23 + $0x130] sm:$0xff]  ;;  %v5121_v60 = vld [vmem:[%s7235_s23 + $0x148] sm:$0xff]  ;;  %v632_v62 = vpack.c.bf16 %v7312_v55, %v7309_v54 }
  0xd5   : > { %v6453_v61 = vld [vmem:[#allocation9 + $0x10] sm:$0xff]   ;;  %v7324_v63 = vpack.c.bf16 %v5121_v60, %v5118_v57  ;;  %v6454_v0 = vld [vmem:[#allocation9 + $0x58] sm:$0xff]   ;;  %v639_v1 = vpack.c.bf16 %v5118_v57, %v7315_v56  ;;  %v5124_v5 = vld [vmem:[%s7235_s23 + $0x160] sm:$0xff] }
  0xd6   : > { %v6455_v2 = vld [vmem:[#allocation9 + $0x18] sm:$0xff]   ;;  %v7331_v4 = vld [vmem:[%s7235_s23 + $0x90] sm:$0xff]  ;;  %v6456_v7 = vld [vmem:[#allocation9 + $0x60] sm:$0xff]  }
  0xd7   : > { %5352 = vmatpush3.bf16.msra.mxu0 %v6438_v14  ;;  %5866 = vmatpush3.bf16.msra.mxu1 %v6437_v13  ;;  %v7328_v3 = vld [vmem:[%s7235_s23 + $0x78] sm:$0xff]  ;;  %v7336_v8 = vld [vmem:[%s7235_s23 + $0xb0] sm:$0xff]  ;;  %v7339_v9 = vld [vmem:[%s7235_s23 + $0xc8] sm:$0xff]  ;;  %v642_v14 = vpack.c.bf16 %v5124_v5, %v5121_v60 }
  0xd8   : > { %5353 = vmatprep.subr.bf16.mxu0 %v6439_v15  ;;  %5867 = vmatprep.subr.bf16.mxu1 %v6440_v16  ;;  %v5127_v6 = vld [vmem:[%s7235_s23 + $0x178] sm:$0xff]  ;;  %v5130_v11 = vld [vmem:[%s7235_s23 + $0x190] sm:$0xff]  ;;  %v5133_v12 = vld [vmem:[%s7235_s23 + $0x1a8] sm:$0xff]  ;;  %v631_v13 = vpack.c.bf16 %v7331_v4, %v7328_v3 }
  0xd9   : > { %v7341_v10 = vpack.c.bf16 %v5127_v6, %v5124_v5  ;;  %v7347_v15 = vpack.c.bf16 %v5133_v12, %v5130_v11  ;;  %v7358_v26 = vld [vmem:[%s7235_s23 + $0x1c0] sm:$0xff]  ;;  %v6460_v27 = vld [vmem:[#allocation9 + $0x70] sm:$0xff]   ;;  %v7364_v29 = vld [vmem:[%s7235_s23 + $0x128] sm:$0xff]  ;;  %v7393_v5 = vpack.c.bf16 %v7283_v36, %v7263_v22 }
  0xda   : > { %v457_v31 = vld [vmem:[%s7235_s23 + $0x8] sm:$0xff]  ;;  %v6461_v34 = vld [vmem:[#allocation9 + $0x30] sm:$0xff]   ;;  %v6466_v40 = vld [vmem:[#allocation9 + $0x180] sm:$0xff]  }
  0xdb   : > { %5354 = vmatpush3.bf16.msra.mxu0 %v6441_v17  ;;  %5868 = vmatpush3.bf16.msra.mxu1 %v6440_v16  ;;  %v6457_v16 = vld [vmem:[#allocation9 + $0x20] sm:$0xff]   ;;  %v635_v17 = vpack.c.bf16 %v7339_v9, %v7336_v8  ;;  %v505_v44 = vpack.c.bf16 %v7260_v21, %v457_v31  ;;  %v6468_v57 = vld [vmem:[#allocation9 + $0x188] sm:$0xff]   ;;  %v6470_v60 = vld [vmem:[#allocation9 + $0x1d0] sm:$0xff]  }
  0xdc   : > { %5355 = vmatprep.subr.bf16.mxu0 %v6442_v18  ;;  %5869 = vmatprep.subr.bf16.mxu1 %v6443_v19  ;;  %v6458_v18 = vld [vmem:[#allocation9 + $0x68] sm:$0xff]   ;;  %v7384_v21 = vld [vmem:[%s7235_s23 + $0x158] sm:$0xff]  ;;  %v6474_v22 = vld [vmem:[#allocation9 + $0x90] sm:$0xff]  }
  0xdd   : > { %v7424_v31 = vld [vmem:[%s7235_s23 + $0x180] sm:$0xff] }
  0xdf   : > { %5356 = vmatpush3.bf16.msra.mxu0 %v6444_v20  ;;  %5870 = vmatpush3.bf16.msra.mxu1 %v6443_v19  ;;  %v645_v19 = vpack.c.bf16 %v5130_v11, %v5127_v6  ;;  %v6459_v20 = vld [vmem:[#allocation9 + $0x28] sm:$0xff]   ;;  %v6472_v6 = vld [vmem:[#allocation9 + $0x1d8] sm:$0xff]   ;;  %v7399_v11 = vld [vmem:[%s7235_s23 + $0x150] sm:$0xff] }
  0xe0   : > { %5357 = vmatprep.subr.bf16.mxu0 %v6445_v24  ;;  %5871 = vmatprep.subr.bf16.mxu1 %v6446_v25  ;;  %v7352_v24 = vld [vmem:[%s7235_s23 + $0xa8] sm:$0xff] }
  0xe3   : > { %5358 = vmatpush3.bf16.msra.mxu0 %v6447_v28  ;;  %5872 = vmatpush3.bf16.msra.mxu1 %v6446_v25  ;;  %v7355_v25 = vld [vmem:[%s7235_s23 + $0xc0] sm:$0xff]  ;;  %v7361_v28 = vld [vmem:[%s7235_s23 + $0x110] sm:$0xff] }
  0xe4   : > { %5423 = vmatprep.subr.bf16.mxu1 %v6448_v35  ;;  %v6465_v35 = vld [vmem:[#allocation9 + $0x1c0] sm:$0xff]   ;;  %v638_v41 = vpack.c.bf16 %v7364_v29, %v7361_v28 }
  0xe5   : > { %5503 = vmatprep.subr.bf16.mxu0 %v6465_v35  ;;  %v6484_v35 = vld [vmem:[#allocation9 + $0xa0] sm:$0xff]  }
  0xe6   : > { %875 = vmatmul.mubr.bf16.vlgmr.msra.gmra.mrb[0].mxu0 %v625_v37  ;;  %5874 = vmatmul.mubr.bf16.vlgmr.msra.gmra.mrb[0].mxu1 %v630_v38  ;;  %v634_v37 = vpack.c.bf16 %v7355_v25, %v7352_v24  ;;  %v648_v38 = vpack.c.bf16 %v7358_v26, %v5133_v12  ;;  %v6473_v12 = vld [vmem:[#allocation9 + $0x198] sm:$0xff]  }
  0xe7   : > { %5424 = vmatpush3.bf16.msra.mxu1 %v6449_v42  ;;  %882 = vmatprep.mubr.bf16.mxu0 %v629_v43  ;;  %v6467_v42 = vld [vmem:[#allocation9 + $0x1c8] sm:$0xff]   ;;  %v6462_v43 = vld [vmem:[#allocation9 + $0x78] sm:$0xff]  }
  0xe8   : > { %5425 = vmatprep.subr.bf16.mxu1 %v6450_v46  ;;  %5877 = vmatprep.mubr.bf16.mxu1 %v633_v47  ;;  %v6463_v46 = vld [vmem:[#allocation9 + $0x38] sm:$0xff]   ;;  %v7374_v47 = vld [vmem:[%s7235_s23 + $0x108] sm:$0xff] }
  0xe9   : > { %5504 = vmatpush3.bf16.msra.mxu0 %v6466_v40 }
  0xea   : > { %5505 = vmatprep.subr.bf16.mxu0 %v6467_v42  ;;  %v6481_v42 = vld [vmem:[#allocation9 + $0x1b0] sm:$0xff]  }
  0xeb   : > { %5426 = vmatpush3.bf16.msra.mxu1 %v6451_v49  ;;  %v7377_v49 = vld [vmem:[%s7235_s23 + $0x120] sm:$0xff] }
  0xec   : > { %5427 = vmatprep.subr.bf16.mxu1 %v6452_v53  ;;  %v456_v53 = vld [vmem:[%s7235_s23] sm:$0xff] }
  0xed   : > { %5506 = vmatpush3.bf16.msra.mxu0 %v6468_v57  ;;  %v513_v57 = vpack.c.bf16 %v7352_v24, %v7331_v4 }
  0xee   : > { %883 = vmatmul.mubr.bf16.gmra.mrb[4].mxu0 %v628_v58  ;;  %5878 = vmatmul.mubr.bf16.gmra.mrb[4].mxu1 %v636_v59  ;;  %v6464_v58 = vld [vmem:[#allocation9 + $0x80] sm:$0xff]  }
  0xef   : > { %5428 = vmatpush3.bf16.msra.mxu1 %v6453_v61  ;;  %890 = vmatprep.mubr.bf16.mxu0 %v632_v62  ;;  %v7381_v59 = vld [vmem:[%s7235_s23 + $0x140] sm:$0xff]  ;;  %v6471_v61 = vld [vmem:[#allocation9 + $0x190] sm:$0xff]   ;;  %v637_v62 = vpack.c.bf16 %v7377_v49, %v7374_v47 }
  0xf0   : > { %5429 = vmatprep.subr.bf16.mxu1 %v6454_v0  ;;  %5881 = vmatprep.mubr.bf16.mxu1 %v639_v1  ;;  %v504_v0 = vpack.c.bf16 %v7273_v30, %v456_v53  ;;  %v641_v1 = vpack.c.bf16 %v7384_v21, %v7381_v59  ;;  %v7402_v30 = vld [vmem:[%s7235_s23 + $0x170] sm:$0xff]  ;;  %v520_v4 = vpack.c.bf16 %v7381_v59, %v7364_v29 }
  0xf1   : > { %5507 = vmatprep.subr.bf16.mxu0 %v6470_v60  ;;  %v7444_v53 = vld [vmem:[%s7235_s23 + $0x1b0] sm:$0xff]  ;;  %v6487_v60 = vld [vmem:[#allocation9 + $0xb8] sm:$0xff]  }
  0xf2   : > { %5508 = vmatpush3.bf16.msra.mxu0 %v6471_v61  ;;  %v480_v61 = vld [vmem:[%s7235_s23 + $0xf0] sm:$0xff] }
  0xf3   : > { %5430 = vmatpush3.bf16.msra.mxu1 %v6455_v2  ;;  %v6469_v2 = vld [vmem:[#allocation9 + $0x88] sm:$0xff]   ;;  %5509 = vmatprep.subr.bf16.mxu0 %v6472_v6 }
  0xf4   : > { %5431 = vmatprep.subr.bf16.mxu1 %v6456_v7  ;;  %v7396_v7 = vld [vmem:[%s7235_s23 + $0x138] sm:$0xff] }
  0xf5   : > { %v640_v36 = vpack.c.bf16 %v7399_v11, %v7396_v7  ;;  %v519_v24 = vpack.c.bf16 %v7396_v7, %v7377_v49  ;;  %v458_v49 = vld [vmem:[%s7235_s23 + $0x10] sm:$0xff]  ;;  %v6489_v7 = vld [vmem:[#allocation9 + $0x208] sm:$0xff]  }
  0xf6   : > { %891 = vmatmul.mubr.bf16.gmra.mrb[8].mxu0 %v631_v13  ;;  %5882 = vmatmul.mubr.bf16.gmra.mrb[8].mxu1 %v642_v14  ;;  %v7405_v13 = vld [vmem:[%s7235_s23 + $0x188] sm:$0xff]  ;;  %v6475_v14 = vld [vmem:[#allocation9 + $0x1e0] sm:$0xff]   ;;  %v506_v6 = vpack.c.bf16 %v7266_v23, %v458_v49  ;;  %v447_v49 = vld [vmem:[#allocation12 + $0x38] sm:$0xff] }
  0xf7   : > { %5432 = vmatpush3.bf16.msra.mxu1 %v6457_v16  ;;  %898 = vmatprep.mubr.bf16.mxu0 %v635_v17  ;;  %v7412_v16 = vpack.c.bf16 %v7300_v50, %v7277_v32  ;;  %v644_v17 = vpack.c.bf16 %v7405_v13, %v7402_v30  ;;  %v6479_v32 = vld [vmem:[#allocation9 + $0x98] sm:$0xff]   ;;  %v6478_v50 = vld [vmem:[#allocation9 + $0x1a8] sm:$0xff]  }
  0xf8   : > { %5433 = vmatprep.subr.bf16.mxu1 %v6458_v18  ;;  %5885 = vmatprep.mubr.bf16.mxu1 %v645_v19  ;;  %v7418_v18 = vpack.c.bf16 %v7309_v54, %v7288_v39  ;;  %v6476_v19 = vld [vmem:[#allocation9 + $0x1a0] sm:$0xff]   ;;  %v7432_v39 = vld [vmem:[%s7235_s23 + $0x1b8] sm:$0xff]  ;;  %v6480_v54 = vld [vmem:[#allocation9 + $0x1f0] sm:$0xff]  }
  0xf9   : > { %5510 = vmatpush3.bf16.msra.mxu0 %v6473_v12  ;;  %v6491_v12 = vld [vmem:[#allocation9 + $0x218] sm:$0xff]  }
  0xfa   : > { %5511 = vmatprep.subr.bf16.mxu0 %v6475_v14 }
  0xfb   : > { %5434 = vmatpush3.bf16.msra.mxu1 %v6459_v20  ;;  %v6477_v20 = vld [vmem:[#allocation9 + $0x1e8] sm:$0xff]  }
  0xfc   : > { %5435 = vmatprep.subr.bf16.mxu1 %v6460_v27  ;;  %v7421_v27 = vld [vmem:[%s7235_s23 + $0x168] sm:$0xff] }
  0xfd   : > { %5512 = vmatpush3.bf16.msra.mxu0 %v6476_v19  ;;  %v522_v29 = vpack.c.bf16 %v7421_v27, %v7399_v11  ;;  %v482_v11 = vld [vmem:[%s7235_s23 + $0x100] sm:$0xff]  ;;  %v5232_v19 = vld [vmem:[%s7235_s23 + $0x1d8] sm:$0xff] }
  0xfe   : > { %899 = vmatmul.mubr.bf16.gmra.mrb[12].mxu0 %v634_v37  ;;  %5886 = vmatmul.mubr.bf16.gmra.mrb[12].mxu1 %v648_v38  ;;  %v643_v37 = vpack.c.bf16 %v7424_v31, %v7421_v27  ;;  %v510_v38 = vpack.c.bf16 %v7328_v3, %v7303_v51  ;;  %v6483_v51 = vld [vmem:[#allocation9 + $0x1b8] sm:$0xff]   ;;  %v518_v23 = vpack.c.bf16 %v7315_v56, %v482_v11  ;;  %v5230_v56 = vld [vmem:[%s7235_s23 + $0x1c8] sm:$0xff] }
  0xff   : > { %5436 = vmatpush3.bf16.msra.mxu1 %v6461_v34  ;;  %906 = vmatprep.mubr.bf16.mxu0 %v638_v41  ;;  %v7429_v34 = vld [vmem:[%s7235_s23 + $0x1a0] sm:$0xff]  ;;  %v514_v41 = vpack.c.bf16 %v7336_v8, %v7312_v55  ;;  %v481_v3 = vld [vmem:[%s7235_s23 + $0xf8] sm:$0xff]  ;;  %v6486_v55 = vld [vmem:[#allocation9 + $0xb0] sm:$0xff]  }
 0x100   : > { %5437 = vmatprep.subr.bf16.mxu1 %v6462_v43  ;;  %1212 = vmatprep.mubr.bf16.mxu1 %v505_v44  ;;  %v647_v40 = vpack.c.bf16 %v7432_v39, %v7429_v34  ;;  %v6482_v43 = vld [vmem:[#allocation9 + $0x1f8] sm:$0xff]   ;;  %v526_v59 = vpack.c.bf16 %v7429_v34, %v7405_v13  ;;  %v6493_v13 = vld [vmem:[#allocation9 + $0x228] sm:$0xff]  }
 0x101   : > { %5513 = vmatprep.subr.bf16.mxu0 %v6477_v20  ;;  %v5131_v44 = vld [vmem:[%s7235_s23 + $0x198] sm:$0xff]  ;;  %v1446_v20 = vpack.c.bf16 %v5232_v19, %v7358_v26  ;;  %v441_v27 = vld [vmem:[#allocation12 + $0x8] sm:$0xff] }
 0x102   : > { %5514 = vmatpush3.bf16.msra.mxu0 %v6478_v50  ;;  %v646_v8 = vpack.c.bf16 %v7444_v53, %v5131_v44 }
 0x103   : > { %5438 = vmatpush3.bf16.msra.mxu1 %v6463_v46  ;;  %5515 = vmatprep.subr.bf16.mxu0 %v6480_v54  ;;  %v6485_v46 = vld [vmem:[#allocation9 + $0xa8] sm:$0xff]   ;;  %v442_v54 = vld [vmem:[#allocation12 + $0x10] sm:$0xff] }
 0x104   : > { %5889 = vmatprep.subr.bf16.mxu1 %v6464_v58 }
 0x106   : > { %907 = vmatmul.mubr.bf16.gmra.mrb[16].mxu0 %v637_v62  ;;  %1213 = vmatmul.mubr.bf16.vlgmr.msra.gmra.mrb[16].mxu1 %v504_v0  ;;  %v6488_v62 = vld [vmem:[#allocation9 + $0x200] sm:$0xff]   ;;  %v516_v0 = vpack.c.bf16 %v7374_v47, %v480_v61 }
 0x107   : > { %5890 = vmatpush3.bf16.msra.mxu1 %v6464_v58  ;;  %914 = vmatprep.mubr.bf16.mxu0 %v641_v1  ;;  %v517_v58 = vpack.c.bf16 %v7361_v28, %v481_v3  ;;  %v523_v28 = vpack.c.bf16 %v7402_v30, %v7384_v21  ;;  %v5207_v47 = vld [vmem:[%s7235_s23 + $0xe0] sm:$0xff]  ;;  %v525_v21 = vpack.c.bf16 %v5131_v44, %v7424_v31  ;;  %v5231_v30 = vld [vmem:[%s7235_s23 + $0x1d0] sm:$0xff] }
 0x108   : > { %1220 = vmatprep.mubr.bf16.mxu1 %v7393_v5  ;;  %5891 = vmatprep.subr.bf16.mxu1 %v6469_v2  ;;  %v1433_v1 = vpack.c.bf16 %v5207_v47, %v7339_v9  ;;  %v6490_v9 = vld [vmem:[#allocation9 + $0x210] sm:$0xff]   ;;  %v1445_v14 = vpack.c.bf16 %v5231_v30, %v7432_v39 }
 0x109   : > { %5516 = vmatpush3.bf16.msra.mxu0 %v6481_v42 }
 0x10a   : > { %5517 = vmatprep.subr.bf16.mxu0 %v6482_v43 }
 0x10b   : > { %5892 = vmatpush3.bf16.msra.mxu1 %v6469_v2  ;;  %v5206_v2 = vld [vmem:[%s7235_s23 + $0xd8] sm:$0xff] }
 0x10c   : > { %5893 = vmatprep.subr.bf16.mxu1 %v6474_v22 }
 0x10d   : > { %5518 = vmatpush3.bf16.msra.mxu0 %v6483_v51 }
 0x10e   : > { %915 = vmatmul.mubr.bf16.gmra.mrb[20].mxu0 %v640_v36  ;;  %1221 = vmatmul.mubr.bf16.gmra.mrb[20].mxu1 %v7412_v16  ;;  %v1444_v36 = vpack.c.bf16 %v5230_v56, %v7444_v53  ;;  %v449_v56 = vld [vmem:[#allocation12 + $0x48] sm:$0xff] }
 0x10f   : > { %922 = vmatprep.mubr.bf16.mxu0 %v644_v17  ;;  %1228 = vmatprep.mubr.bf16.mxu1 %v7418_v18  ;;  %v5208_v17 = vld [vmem:[%s7235_s23 + $0xe8] sm:$0xff]  ;;  %s9239_s23 = scalar_lea.hbm %s9586_s28, %s5342_s21 }
 0x110   : > { %5894 = vmatpush3.bf16.msra.mxu1 %v6474_v22  ;;  %v6494_v22 = vld [vmem:[#allocation9 + $0x230] sm:$0xff]  }
 0x111   : > { %5895 = vmatprep.subr.bf16.mxu1 %v6479_v32 }
 0x114   : > { %5896 = vmatpush3.bf16.msra.mxu1 %v6479_v32 }
 0x115   : > { %5897 = vmatprep.subr.bf16.mxu1 %v6484_v35 }
 0x116   : > { %923 = vmatmul.mubr.bf16.gmra.mrb[24].mxu0 %v643_v37  ;;  %1229 = vmatmul.mubr.bf16.gmra.mrb[24].mxu1 %v510_v38 }
 0x117   : > { %930 = vmatprep.mubr.bf16.mxu0 %v647_v40  ;;  %1236 = vmatprep.mubr.bf16.mxu1 %v514_v41 }
 0x118   : > { %5898 = vmatpush3.bf16.msra.mxu1 %v6484_v35  ;;  %v443_v35 = vld [vmem:[#allocation12 + $0x18] sm:$0xff] }
 0x119   : > { %5899 = vmatprep.subr.bf16.mxu1 %v6485_v46 }
 0x11c   : > { %5900 = vmatpush3.bf16.msra.mxu1 %v6485_v46 }
 0x11d   : > { %5901 = vmatprep.subr.bf16.mxu1 %v6486_v55 }
 0x11e   : > { %931 = vmatmul.mubr.bf16.gmra.mrb[28].mxu0 %v646_v8  ;;  %1237 = vmatmul.mubr.bf16.gmra.mrb[28].mxu1 %v513_v57 }
 0x11f   : > { %1244 = vmatprep.mubr.bf16.mxu1 %v517_v58  ;;  %1672 = vmatprep.mubr.bf16.mxu0 %v7393_v5  ;;  %v1432_v5 = vpack.c.bf16 %v5206_v2, %v7355_v25  ;;  %v6492_v25 = vld [vmem:[#allocation9 + $0x220] sm:$0xff]   ;;  %v446_v2 = vld [vmem:[#allocation12 + $0x30] sm:$0xff] }
 0x120   : > { %5902 = vmatpush3.bf16.msra.mxu1 %v6486_v55 }
 0x121   : > { %5903 = vmatprep.subr.bf16.mxu1 %v6487_v60 }
 0x124   : > { %5904 = vmatpush3.bf16.msra.mxu1 %v6487_v60 }
 0x125   : > { %5921 = vmatprep.subr.bf16.mxu1 %v6488_v62 }
 0x126   : > { %1245 = vmatmul.mubr.bf16.gmra.mrb[32].mxu1 %v516_v0  ;;  %1673 = vmatmul.mubr.bf16.vlgmr.msra.gmra.mrb[32].mxu0 %v7412_v16  ;;  %v6495_v16 = vld [vmem:[#allocation9 + $0x238] sm:$0xff]   ;;  %v445_v0 = vld [vmem:[#allocation12 + $0x28] sm:$0xff] }
 0x127   : > { %1252 = vmatprep.mubr.bf16.mxu1 %v520_v4  ;;  %1680 = vmatprep.mubr.bf16.mxu0 %v7418_v18  ;;  %v1434_v18 = vpack.c.bf16 %v5208_v17, %v7306_v52 }
 0x12e   : > { %1253 = vmatmul.mubr.bf16.gmra.mrb[36].mxu1 %v519_v24  ;;  %1681 = vmatmul.mubr.bf16.gmra.mrb[36].mxu0 %v510_v38  ;;  %v7500_v38 = vpack.c.bf16 %v443_v35, %v442_v54  ;;  %v453_v54 = vld [vmem:[#allocation12 + $0x68] sm:$0xff] }
 0x12f   : > { %1260 = vmatprep.mubr.bf16.mxu1 %v523_v28  ;;  %1688 = vmatprep.mubr.bf16.mxu0 %v514_v41 }
 0x130   : > { %9444 = vst [vmem:[#allocation22_spill] sm:$0xff] %v7500_v38 }
 0x136   : > { %1261 = vmatmul.mubr.bf16.gmra.mrb[40].mxu1 %v522_v29  ;;  %1689 = vmatmul.mubr.bf16.gmra.mrb[40].mxu0 %v513_v57 }
 0x137   : > { %1268 = vmatprep.mubr.bf16.mxu1 %v526_v59  ;;  %1696 = vmatprep.mubr.bf16.mxu0 %v1433_v1 }
 0x13e   : > { %1269 = vmatmul.mubr.bf16.gmra.mrb[44].mxu1 %v525_v21  ;;  %1697 = vmatmul.mubr.bf16.gmra.mrb[44].mxu0 %v1432_v5 }
 0x13f   : > { %5905 = vmatprep.mubr.bf16.mxu1 %v506_v6  ;;  %1704 = vmatprep.mubr.bf16.mxu0 %v520_v4  ;;  %v7517_v6 = vpack.c.bf16 %v447_v49, %v446_v2 }
 0x141   : > { %9446 = vst [vmem:[#allocation24_spill] sm:$0xff] %v7517_v6 }
 0x146   : > { %5906 = vmatmul.mubr.bf16.vlgmr.msra.gmra.mrb[0].mxu1 %v7279_v33  ;;  %1705 = vmatmul.mubr.bf16.gmra.mrb[48].mxu0 %v519_v24 }
 0x147   : > { %5922 = vmatpush3.bf16.msra.mxu1 %v6488_v62  ;;  %5909 = vmatprep.mubr.bf16.mxu1 %v7295_v45  ;;  %v444_v62 = vld [vmem:[#allocation12 + $0x20] sm:$0xff] }
 0x148   : > { %5923 = vmatprep.subr.bf16.mxu1 %v6489_v7  ;;  %1712 = vmatprep.mubr.bf16.mxu0 %v523_v28  ;;  %v7512_v28 = vpack.c.bf16 %v445_v0, %v444_v62  ;;  %v6937_v62 = vmov 0.0  }
 0x149   : > { %2583 = vst [vmem:[#allocation2] sm:$0xff] %v6937_v62  ;;  %2613 = vst [vmem:[#allocation2 + $0x18] sm:$0x1] %v6937_v62 }
 0x14a   : > { %9445 = vst [vmem:[#allocation23_spill] sm:$0xff] %v7512_v28  ;;  %2614 = vst [vmem:[#allocation2 + $0x30] sm:$0x1] %v6937_v62 }
 0x14b   : > { %5924 = vmatpush3.bf16.msra.mxu1 %v6489_v7  ;;  %2615 = vst [vmem:[#allocation2 + $0x48] sm:$0x1] %v6937_v62  ;;  %2616 = vst [vmem:[#allocation2 + $0x60] sm:$0x1] %v6937_v62 }
 0x14c   : > { %5925 = vmatprep.subr.bf16.mxu1 %v6490_v9  ;;  %2617 = vst [vmem:[#allocation2 + $0x78] sm:$0x1] %v6937_v62  ;;  %2618 = vst [vmem:[#allocation2 + $0x90] sm:$0x1] %v6937_v62 }
 0x14d   : > { %2619 = vst [vmem:[#allocation2 + $0xa8] sm:$0x1] %v6937_v62  ;;  %2620 = vst [vmem:[#allocation2 + $0xc0] sm:$0x1] %v6937_v62 }
 0x14e   : > { %5910 = vmatmul.mubr.bf16.gmra.mrb[4].mxu1 %v7297_v48  ;;  %1713 = vmatmul.mubr.bf16.gmra.mrb[52].mxu0 %v522_v29  ;;  %2621 = vst [vmem:[#allocation2 + $0x108] sm:$0x1] %v6937_v62  ;;  %2622 = vst [vmem:[#allocation2 + $0x120] sm:$0x1] %v6937_v62 }
 0x14f   : > { %5926 = vmatpush3.bf16.msra.mxu1 %v6490_v9  ;;  %5913 = vmatprep.mubr.bf16.mxu1 %v518_v23  ;;  %2623 = vst [vmem:[#allocation2 + $0x138] sm:$0x1] %v6937_v62  ;;  %2624 = vst [vmem:[#allocation2 + $0x150] sm:$0x1] %v6937_v62 }
 0x150   : > { %5927 = vmatprep.subr.bf16.mxu1 %v6491_v12  ;;  %1720 = vmatprep.mubr.bf16.mxu0 %v526_v59  ;;  %2625 = vst [vmem:[#allocation2 + $0x168] sm:$0x1] %v6937_v62  ;;  %2626 = vst [vmem:[#allocation2 + $0x180] sm:$0x1] %v6937_v62 }
 0x151   : > { %2627 = vst [vmem:[#allocation2 + $0x198] sm:$0x1] %v6937_v62  ;;  %2628 = vst [vmem:[#allocation2 + $0x1b0] sm:$0x1] %v6937_v62 }
 0x152   : > { %2741 = vst [vmem:[#allocation2 + $0x2f] sm:$0x1] %v6937_v62  ;;  %2742 = vst [vmem:[#allocation2 + $0x47] sm:$0x1] %v6937_v62 }
 0x153   : > { %5928 = vmatpush3.bf16.msra.mxu1 %v6491_v12  ;;  %2743 = vst [vmem:[#allocation2 + $0x5f] sm:$0x1] %v6937_v62  ;;  %2744 = vst [vmem:[#allocation2 + $0x77] sm:$0x1] %v6937_v62 }
 0x154   : > { %5929 = vmatprep.subr.bf16.mxu1 %v6492_v25  ;;  %2745 = vst [vmem:[#allocation2 + $0x8f] sm:$0x1] %v6937_v62  ;;  %2746 = vst [vmem:[#allocation2 + $0xa7] sm:$0x1] %v6937_v62 }
 0x155   : > { %2747 = vst [vmem:[#allocation2 + $0xbf] sm:$0x1] %v6937_v62  ;;  %2748 = vst [vmem:[#allocation2 + $0xd7] sm:$0x1] %v6937_v62 }
 0x156   : > { %5914 = vmatmul.mubr.bf16.gmra.mrb[8].mxu1 %v7324_v63  ;;  %1721 = vmatmul.mubr.bf16.gmra.mrb[56].mxu0 %v525_v21  ;;  %2749 = vst [vmem:[#allocation2 + $0x11f] sm:$0x1] %v6937_v62  ;;  %2750 = vst [vmem:[#allocation2 + $0x137] sm:$0x1] %v6937_v62 }
 0x157   : > { %5930 = vmatpush3.bf16.msra.mxu1 %v6492_v25  ;;  %5917 = vmatprep.mubr.bf16.mxu1 %v7341_v10  ;;  %2751 = vst [vmem:[#allocation2 + $0x14f] sm:$0x1] %v6937_v62  ;;  %2752 = vst [vmem:[#allocation2 + $0x167] sm:$0x1] %v6937_v62 }
 0x158   : > { %5931 = vmatprep.subr.bf16.mxu1 %v6493_v13  ;;  %1728 = vmatprep.mubr.bf16.mxu0 %v1445_v14  ;;  %v448_v14 = vld [vmem:[#allocation12 + $0x40] sm:$0xff]  ;;  %2753 = vst [vmem:[#allocation2 + $0x17f] sm:$0x1] %v6937_v62  ;;  %2754 = vst [vmem:[#allocation2 + $0x197] sm:$0x1] %v6937_v62 }
 0x159   : > { %2755 = vst [vmem:[#allocation2 + $0x1af] sm:$0x1] %v6937_v62  ;;  %2756 = vst [vmem:[#allocation2 + $0x1c7] sm:$0x1] %v6937_v62 }
 0x15b   : > { %5932 = vmatpush3.bf16.msra.mxu1 %v6493_v13 }
 0x15c   : > { %5933 = vmatprep.subr.bf16.mxu1 %v6494_v22 }
 0x15e   : > { %5918 = vmatmul.mubr.bf16.gmra.mrb[12].mxu1 %v7347_v15  ;;  %1729 = vmatmul.mubr.bf16.gmra.mrb[60].mxu0 %v1444_v36 }
 0x15f   : > { %5934 = vmatpush3.bf16.msra.mxu1 %v6494_v22  ;;  %5937 = vmatprep.mubr.bf16.mxu1 %v7279_v33  ;;  %v9315_v33 = vmov 0.0|0.0  }
 0x160   : > { %5935 = vmatprep.subr.bf16.mxu1 %v6495_v16  ;;  %6119 = vmatprep.subr.bf16.mxu0 %v9315_v33 }
 0x161   : > { %5985 = vmatprep.mubr.msk.f32.mxu0 %vm6938_vm0, %v6937_v62 }
 0x163   : > { %5936 = vmatpush3.bf16.msra.mxu1 %v6495_v16 }
 0x166   : > { %5938 = vmatmul.mubr.bf16.vlgmr.msra.gmra.mrb[0].mxu1 %v7295_v45  ;;  %v440_v45 = vld [vmem:[#allocation12] sm:$0xff] }
 0x167   : > { %5941 = vmatprep.mubr.bf16.mxu1 %v7297_v48  ;;  %v7496_v48 = vpack.c.bf16 %v441_v27, %v440_v45 }
 0x169   : > { %9443 = vst [vmem:[#allocation21_spill] sm:$0xff] %v7496_v48  ;;  %6121 = vmatpush3.bf16.msra.mxu0 %v7496_v48 }
 0x16a   : > { %6122 = vmatprep.subr.bf16.mxu0 %v9315_v33 }
 0x16d   : > { %6124 = vmatpush3.bf16.msra.mxu0 %v7500_v38 }
 0x16e   : > { %5942 = vmatmul.mubr.bf16.gmra.mrb[4].mxu1 %v1434_v18  ;;  %6125 = vmatprep.subr.bf16.mxu0 %v9315_v33  ;;  %v7530_v18 = vpack.c.bf16 %v449_v56, %v448_v14 }
 0x16f   : > { %5945 = vmatprep.mubr.bf16.mxu1 %v7324_v63 }
 0x170   : > { %9447 = vst [vmem:[#allocation25_spill] sm:$0xff] %v7530_v18 }
 0x171   : > { %6127 = vmatpush3.bf16.msra.mxu0 %v7512_v28 }
 0x172   : > { %6128 = vmatprep.subr.bf16.mxu0 %v9315_v33 }
 0x175   : > { %6130 = vmatpush3.bf16.msra.mxu0 %v7517_v6 }
 0x176   : > { %5946 = vmatmul.mubr.bf16.gmra.mrb[8].mxu1 %v7341_v10  ;;  %6131 = vmatprep.subr.bf16.mxu0 %v9315_v33 }
 0x177   : > { %5949 = vmatprep.mubr.bf16.mxu1 %v7347_v15 }
 0x179   : > { %6133 = vmatpush3.bf16.msra.mxu0 %v7530_v18 }
 0x17a   : > { %6134 = vmatprep.subr.bf16.mxu0 %v9315_v33 }
 0x17e   : > { %5950 = vmatmul.mubr.bf16.gmra.mrb[12].mxu1 %v1446_v20 }
 0x1b9   : > { %v5359_v52 = vpop.f32.mrb[0].mxu0 }
 0x1ba   : > { %v5360_v63 = vpop.f32.mrb[1].mxu0 }
 0x1bb   : > { %v5361_v10 = vadd.f32 %v5360_v63, %v5359_v52  ;;  %v5362_v31 = vpop.f32.mrb[2].mxu0  ;;  %v450_v63 = vld [vmem:[#allocation12 + $0x50] sm:$0xff] }
 0x1bc   : > { %v5363_v15 = vpop.f32.mrb[3].mxu0 }
 0x1bd   : > { %v5364_v32 = vadd.f32 %v5363_v15, %v5362_v31 }
 0x1c1   : > { %v5365_v50 = vpop.f32.mrb[4].mxu0 }
 0x1c2   : > { %v5366_v26 = vpop.f32.mrb[5].mxu0 }
 0x1c3   : > { %v5367_v34 = vadd.f32 %v5366_v26, %v5365_v50  ;;  %v5368_v39 = vpop.f32.mrb[6].mxu0 }
 0x1c4   : > { %v5369_v37 = vpop.f32.mrb[7].mxu0 }
 0x1c5   : > { %v5370_v40 = vadd.f32 %v5369_v37, %v5368_v39  ;;  %v452_v39 = vld [vmem:[#allocation12 + $0x60] sm:$0xff] }
 0x1c9   : > { %v5371_v41 = vpop.f32.mrb[8].mxu0 }
 0x1ca   : > { %v5372_v42 = vpop.f32.mrb[9].mxu0 }
 0x1cb   : > { %v7504_v43 = vadd.f32 %v5372_v42, %v5371_v41  ;;  %v5374_v44 = vpop.f32.mrb[10].mxu0 }
 0x1cc   : > { %v5375_v46 = vpop.f32.mrb[11].mxu0 }
 0x1cd   : > { %v7506_v53 = vadd.f32 %v5375_v46, %v5374_v44  ;;  %v7546_v44 = vpack.c.bf16 %v453_v54, %v452_v39 }
 0x1cf   : > { %9449 = vst [vmem:[#allocation27_spill] sm:$0xff] %v7546_v44 }
 0x1d1   : > { %v5377_v51 = vpop.f32.mrb[12].mxu0 }
 0x1d2   : > { %v5378_v3 = vpop.f32.mrb[13].mxu0 }
 0x1d3   : > { %v7508_v55 = vadd.f32 %v5378_v3, %v5377_v51  ;;  %v5380_v8 = vpop.f32.mrb[14].mxu0  ;;  %v454_v51 = vld [vmem:[#allocation12 + $0x70] sm:$0xff]  ;;  %v455_v3 = vld [vmem:[#allocation12 + $0x78] sm:$0xff] }
 0x1d4   : > { %v5381_v57 = vpop.f32.mrb[15].mxu0 }
 0x1d5   : > { %v7510_v58 = vadd.f32 %v5381_v57, %v5380_v8 }
 0x1d9   : > { %v5439_v60 = vpop.f32.mrb[16].mxu1  ;;  %v5383_v61 = vpop.f32.mrb[16].mxu0 }
 0x1da   : > { %v5440_v4 = vpop.f32.mrb[17].mxu1  ;;  %v5384_v24 = vpop.f32.mrb[17].mxu0 }
 0x1db   : > { %v5441_v47 = vadd.f32 %v5440_v4, %v5439_v60  ;;  %v5442_v29 = vpop.f32.mrb[18].mxu1  ;;  %v7514_v59 = vadd.f32 %v5384_v24, %v5383_v61  ;;  %v5386_v1 = vpop.f32.mrb[18].mxu0  ;;  %v7554_v61 = vpack.c.bf16 %v455_v3, %v454_v51 }
 0x1dc   : > { %v5443_v21 = vpop.f32.mrb[19].mxu1  ;;  %v5387_v5 = vpop.f32.mrb[19].mxu0 }
 0x1dd   : > { %v7519_v7 = vadd.f32 %v5441_v47, %v5361_v10  ;;  %v5444_v9 = vadd.f32 %v5443_v21, %v5442_v29  ;;  %v7521_v11 = vadd.f32 %v5387_v5, %v5386_v1  ;;  %v451_v10 = vld [vmem:[#allocation12 + $0x58] sm:$0xff]  ;;  %9450 = vst [vmem:[#allocation28_spill] sm:$0xff] %v7554_v61 }
 0x1de   : > { %v7540_v15 = vpack.c.bf16 %v451_v10, %v450_v63 }
 0x1df   : > { %v7524_v12 = vadd.f32 %v5444_v9, %v5364_v32 }
 0x1e0   : > { %9448 = vst [vmem:[#allocation26_spill] sm:$0xff] %v7540_v15  ;;  %6136 = vmatpush3.bf16.msra.mxu0 %v7540_v15 }
 0x1e1   : > { %v5445_v23 = vpop.f32.mrb[20].mxu1  ;;  %v5389_v25 = vpop.f32.mrb[20].mxu0  ;;  %6137 = vmatprep.subr.bf16.mxu0 %v9315_v33 }
 0x1e2   : > { %v5446_v30 = vpop.f32.mrb[21].mxu1  ;;  %v5390_v13 = vpop.f32.mrb[21].mxu0 }
 0x1e3   : > { %v5447_v22 = vadd.f32 %v5446_v30, %v5445_v23  ;;  %v5448_v36 = vpop.f32.mrb[22].mxu1  ;;  %v7528_v16 = vadd.f32 %v5390_v13, %v5389_v25  ;;  %v5392_v17 = vpop.f32.mrb[22].mxu0 }
 0x1e4   : > { %v5449_v19 = vpop.f32.mrb[23].mxu1  ;;  %v5393_v20 = vpop.f32.mrb[23].mxu0  ;;  %6139 = vmatpush3.bf16.msra.mxu0 %v7546_v44 }
 0x1e5   : > { %v7532_v45 = vadd.f32 %v5447_v22, %v5367_v34  ;;  %v5450_v27 = vadd.f32 %v5449_v19, %v5448_v36  ;;  %v7534_v52 = vadd.f32 %v5393_v20, %v5392_v17  ;;  %6140 = vmatprep.subr.bf16.mxu0 %v9315_v33 }
 0x1e7   : > { %v7538_v31 = vadd.f32 %v5450_v27, %v5370_v40 }
 0x1e8   : > { %6142 = vmatpush3.bf16.msra.mxu0 %v7554_v61 }
 0x1e9   : > { %v5451_v32 = vpop.f32.mrb[24].mxu1  ;;  %v5395_v50 = vpop.f32.mrb[24].mxu0 }
 0x1ea   : > { %v5452_v26 = vpop.f32.mrb[25].mxu1  ;;  %v5396_v34 = vpop.f32.mrb[25].mxu0 }
 0x1eb   : > { %v5453_v35 = vadd.f32 %v5452_v26, %v5451_v32  ;;  %v5454_v37 = vpop.f32.mrb[26].mxu1  ;;  %v7544_v41 = vadd.f32 %v5396_v34, %v5395_v50  ;;  %v5398_v42 = vpop.f32.mrb[26].mxu0 }
 0x1ec   : > { %v5455_v40 = vpop.f32.mrb[27].mxu1  ;;  %v5399_v46 = vpop.f32.mrb[27].mxu0 }
 0x1ed   : > { %v7549_v8 = vadd.f32 %v5453_v35, %v7504_v43  ;;  %v5456_v57 = vadd.f32 %v5455_v40, %v5454_v37  ;;  %v7551_v60 = vadd.f32 %v5399_v46, %v5398_v42 }
 0x1ef   : > { %v7559_v43 = vadd.f32 %v5456_v57, %v7506_v53 }
 0x1f1   : > { %v5457_v0 = vpop.f32.mrb[28].mxu1  ;;  %v5401_v4 = vpop.f32.mrb[28].mxu0 }
 0x1f2   : > { %v5458_v24 = vpop.f32.mrb[29].mxu1  ;;  %v5402_v47 = vpop.f32.mrb[29].mxu0 }
 0x1f3   : > { %v5459_v29 = vadd.f32 %v5458_v24, %v5457_v0  ;;  %v5460_v1 = vpop.f32.mrb[30].mxu1  ;;  %v7562_v2 = vadd.f32 %v5402_v47, %v5401_v4  ;;  %v5404_v49 = vpop.f32.mrb[30].mxu0 }
 0x1f4   : > { %v5461_v21 = vpop.f32.mrb[31].mxu1  ;;  %v5405_v5 = vpop.f32.mrb[31].mxu0 }
 0x1f5   : > { %v7565_v9 = vadd.f32 %v5459_v29, %v7508_v55  ;;  %v5462_v23 = vadd.f32 %v5461_v21, %v5460_v1  ;;  %v7567_v25 = vadd.f32 %v5405_v5, %v5404_v49 }
 0x1f7   : > { %v7570_v53 = vadd.f32 %v5462_v23, %v7510_v58 }
 0x1f9   : > { %v5463_v30 = vpop.f32.mrb[32].mxu1  ;;  %v5519_v13 = vpop.f32.mrb[32].mxu0 }
 0x1fa   : > { %v5464_v14 = vpop.f32.mrb[33].mxu1  ;;  %v5520_v56 = vpop.f32.mrb[33].mxu0 }
 0x1fb   : > { %v5465_v22 = vadd.f32 %v5464_v14, %v5463_v30  ;;  %v5521_v36 = vadd.f32 %v5520_v56, %v5519_v13  ;;  %v5466_v17 = vpop.f32.mrb[34].mxu1  ;;  %v5522_v19 = vpop.f32.mrb[34].mxu0 }
 0x1fc   : > { %v5467_v20 = vpop.f32.mrb[35].mxu1  ;;  %v5523_v27 = vpop.f32.mrb[35].mxu0 }
 0x1fd   : > { %v6194_v63 = vadd.f32 %v5465_v22, %v7514_v59  ;;  %v5468_v55 = vadd.f32 %v5467_v20, %v5466_v17  ;;  %v5524_v10 = vadd.f32 %v5523_v27, %v5522_v19  ;;  %v7574_v32 = vadd.f32 %v7519_v7, %v5521_v36 }
 0x1ff   : > { %v6200_v58 = vadd.f32 %v5468_v55, %v7521_v11  ;;  %v7578_v50 = vadd.f32 %v7524_v12, %v5524_v10 }
 0x201   : > { %v5469_v26 = vpop.f32.mrb[36].mxu1  ;;  %v5525_v34 = vpop.f32.mrb[36].mxu0 }
 0x202   : > { %v5470_v39 = vpop.f32.mrb[37].mxu1  ;;  %v5526_v54 = vpop.f32.mrb[37].mxu0 }
 0x203   : > { %v5471_v35 = vadd.f32 %v5470_v39, %v5469_v26  ;;  %v5527_v37 = vadd.f32 %v5526_v54, %v5525_v34  ;;  %v5472_v42 = vpop.f32.mrb[38].mxu1  ;;  %v5528_v40 = vpop.f32.mrb[38].mxu0 }
 0x204   : > { %v5473_v46 = vpop.f32.mrb[39].mxu1  ;;  %v5529_v59 = vpop.f32.mrb[39].mxu0 }
 0x205   : > { %v6191_v51 = vadd.f32 %v5471_v35, %v7528_v16  ;;  %v5474_v3 = vadd.f32 %v5473_v46, %v5472_v42  ;;  %v5530_v7 = vadd.f32 %v5529_v59, %v5528_v40  ;;  %v7582_v57 = vadd.f32 %v7532_v45, %v5527_v37 }
 0x207   : > { %v6197_v11 = vadd.f32 %v5474_v3, %v7534_v52  ;;  %v7586_v12 = vadd.f32 %v7538_v31, %v5530_v7 }
 0x209   : > { %v5475_v62 = vpop.f32.mrb[40].mxu1  ;;  %v5531_v0 = vpop.f32.mrb[40].mxu0 }
 0x20a   : > { %v5476_v4 = vpop.f32.mrb[41].mxu1  ;;  %v5532_v24 = vpop.f32.mrb[41].mxu0 }
 0x20b   : > { %v5477_v47 = vadd.f32 %v5476_v4, %v5475_v62  ;;  %v5533_v29 = vadd.f32 %v5532_v24, %v5531_v0  ;;  %v5478_v1 = vpop.f32.mrb[42].mxu1  ;;  %v5534_v49 = vpop.f32.mrb[42].mxu0 }
 0x20c   : > { %v5479_v21 = vpop.f32.mrb[43].mxu1  ;;  %v5535_v16 = vpop.f32.mrb[43].mxu0 }
 0x20d   : > { %v6206_v5 = vadd.f32 %v5477_v47, %v7544_v41  ;;  %v5480_v23 = vadd.f32 %v5479_v21, %v5478_v1  ;;  %v5536_v45 = vadd.f32 %v5535_v16, %v5534_v49  ;;  %v7590_v30 = vadd.f32 %v7549_v8, %v5533_v29 }
 0x20f   : > { %v6212_v52 = vadd.f32 %v5480_v23, %v7551_v60  ;;  %v7594_v31 = vadd.f32 %v7559_v43, %v5536_v45 }
 0x211   : > { %v5481_v13 = vpop.f32.mrb[44].mxu1  ;;  %v5537_v14 = vpop.f32.mrb[44].mxu0 }
 0x212   : > { %v5482_v56 = vpop.f32.mrb[45].mxu1  ;;  %v5538_v22 = vpop.f32.mrb[45].mxu0 }
 0x213   : > { %v5483_v36 = vadd.f32 %v5482_v56, %v5481_v13  ;;  %v5539_v17 = vadd.f32 %v5538_v22, %v5537_v14  ;;  %v5484_v19 = vpop.f32.mrb[46].mxu1  ;;  %v5540_v20 = vpop.f32.mrb[46].mxu0 }
 0x214   : > { %v5485_v27 = vpop.f32.mrb[47].mxu1  ;;  %v5541_v41 = vpop.f32.mrb[47].mxu0 }
 0x215   : > { %v6203_v55 = vadd.f32 %v5483_v36, %v7562_v2  ;;  %v5486_v10 = vadd.f32 %v5485_v27, %v5484_v19  ;;  %v5542_v8 = vadd.f32 %v5541_v41, %v5540_v20  ;;  %v6180_v26 = vadd.f32 %v7565_v9, %v5539_v17 }
 0x217   : > { %v6209_v60 = vadd.f32 %v5486_v10, %v7567_v25  ;;  %v6186_v43 = vadd.f32 %v7570_v53, %v5542_v8 }
 0x219   : > { %v5543_v34 = vpop.f32.mrb[48].mxu0 }
 0x21a   : > { %v5544_v39 = vpop.f32.mrb[49].mxu0 }
 0x21b   : > { %v5545_v54 = vadd.f32 %v5544_v39, %v5543_v34  ;;  %v5546_v35 = vpop.f32.mrb[50].mxu0 }
 0x21c   : > { %v5547_v37 = vpop.f32.mrb[51].mxu0 }
 0x21d   : > { %v5548_v42 = vadd.f32 %v5547_v37, %v5546_v35  ;;  %v7600_v40 = vadd.f32 %v6194_v63, %v5545_v54 }
 0x21f   : > { %v7602_v46 = vadd.f32 %v6200_v58, %v5548_v42 }
 0x221   : > { %v5549_v59 = vpop.f32.mrb[52].mxu0 }
 0x222   : > { %v5550_v2 = vpop.f32.mrb[53].mxu0 }
 0x223   : > { %v5551_v3 = vadd.f32 %v5550_v2, %v5549_v59  ;;  %v5552_v7 = vpop.f32.mrb[54].mxu0 }
 0x224   : > { %v5553_v62 = vpop.f32.mrb[55].mxu0 }
 0x225   : > { %v5554_v9 = vadd.f32 %v5553_v62, %v5552_v7  ;;  %v6192_v0 = vadd.f32 %v6191_v51, %v5551_v3 }
 0x227   : > { %v6198_v25 = vadd.f32 %v6197_v11, %v5554_v9 }
 0x229   : > { %v5555_v4 = vpop.f32.mrb[56].mxu0 }
 0x22a   : > { %v5556_v53 = vpop.f32.mrb[57].mxu0 }
 0x22b   : > { %v5557_v24 = vadd.f32 %v5556_v53, %v5555_v4  ;;  %v5558_v47 = vpop.f32.mrb[58].mxu0 }
 0x22c   : > { %v5559_v29 = vpop.f32.mrb[59].mxu0 }
 0x22d   : > { %v5560_v1 = vadd.f32 %v5559_v29, %v5558_v47  ;;  %v7604_v49 = vadd.f32 %v6206_v5, %v5557_v24 }
 0x22f   : > { %v7606_v63 = vadd.f32 %v6212_v52, %v5560_v1 }
 0x231   : > { %v5561_v58 = vpop.f32.mrb[60].mxu0 }
 0x232   : > { %v5562_v21 = vpop.f32.mrb[61].mxu0 }
 0x233   : > { %v5563_v16 = vadd.f32 %v5562_v21, %v5561_v58  ;;  %v5564_v23 = vpop.f32.mrb[62].mxu0 }
 0x234   : > { %v5565_v45 = vpop.f32.mrb[63].mxu0 }
 0x235   : > { %v5566_v13 = vadd.f32 %v5565_v45, %v5564_v23  ;;  %v6204_v14 = vadd.f32 %v6203_v55, %v5563_v16 }
 0x237   : > { %v7608_v56 = vadd.f32 %v6209_v60, %v5566_v13 }
 0x239   : > { %v5939_v51 = vpop.f32.mrb[0].mxu1 }
 0x23a   : > { %v7611_v11 = vadd.f32 %v7582_v57, %v5939_v51  ;;  %v1771_v22 = vpop.f32.mrb[1].mxu1 }
 0x23b   : > { %v7614_v36 = vadd.f32 %v7574_v32, %v1771_v22  ;;  %v5940_v5 = vpop.f32.mrb[2].mxu1 }
 0x23c   : > { %v7617_v52 = vadd.f32 %v7586_v12, %v5940_v5  ;;  %v1774_v17 = vpop.f32.mrb[3].mxu1  ;;  %v1868_v32 = vmul.f32 %v7611_v11, %v7611_v11 }
 0x23d   : > { %v7620_v19 = vadd.f32 %v7578_v50, %v1774_v17  ;;  %v1866_v20 = vmul.f32 %v7614_v36, %v7614_v36 }
 0x23e   : > { %v1869_v8 = vmul.f32 %v7617_v52, %v7617_v52 }
 0x23f   : > { %v1852_v27 = vadd.f32 %v7620_v19, %v7614_v36  ;;  %v1867_v57 = vmul.f32 %v7620_v19, %v7620_v19 }
 0x241   : > { %v1853_v41 = vadd.f32 %v7611_v11, %v1852_v27  ;;  %v1874_v12 = vadd.f32 %v1867_v57, %v1866_v20  ;;  %v5943_v55 = vpop.f32.mrb[4].mxu1 }
 0x242   : > { %v7631_v10 = vadd.f32 %v6180_v26, %v5943_v55  ;;  %v1787_v50 = vpop.f32.mrb[5].mxu1 }
 0x243   : > { %v1875_v60 = vadd.f32 %v1874_v12, %v1868_v32  ;;  %v7636_v34 = vadd.f32 %v7590_v30, %v1787_v50  ;;  %v1854_v39 = vadd.f32 %v7617_v52, %v1853_v41  ;;  %v5944_v54 = vpop.f32.mrb[6].mxu1 }
 0x244   : > { %v7639_v35 = vadd.f32 %v6186_v43, %v5944_v54  ;;  %v1790_v37 = vpop.f32.mrb[7].mxu1  ;;  %v1872_v43 = vmul.f32 %v7631_v10, %v7631_v10 }
 0x245   : > { %v1855_v42 = vadd.f32 %v7636_v34, %v1854_v39  ;;  %v1870_v26 = vmul.f32 %v7636_v34, %v7636_v34  ;;  %v1876_v59 = vadd.f32 %v1875_v60, %v1869_v8  ;;  %v7645_v2 = vadd.f32 %v7594_v31, %v1790_v37 }
 0x246   : > { %v1873_v31 = vmul.f32 %v7639_v35, %v7639_v35 }
 0x247   : > { %v1877_v3 = vadd.f32 %v1876_v59, %v1870_v26  ;;  %v1856_v7 = vadd.f32 %v7645_v2, %v1855_v42  ;;  %v1871_v30 = vmul.f32 %v7645_v2, %v7645_v2 }
 0x249   : > { %v1857_v62 = vadd.f32 %v7631_v10, %v1856_v7  ;;  %v1878_v9 = vadd.f32 %v1877_v3, %v1871_v30  ;;  %v5947_v4 = vpop.f32.mrb[8].mxu1 }
 0x24a   : > { %v7653_v53 = vadd.f32 %v6192_v0, %v5947_v4  ;;  %v1803_v24 = vpop.f32.mrb[9].mxu1 }
 0x24b   : > { %v1858_v47 = vadd.f32 %v7639_v35, %v1857_v62  ;;  %v1879_v29 = vadd.f32 %v1878_v9, %v1872_v43  ;;  %v7659_v1 = vadd.f32 %v7600_v40, %v1803_v24  ;;  %v5948_v58 = vpop.f32.mrb[10].mxu1 }
 0x24c   : > { %v7661_v21 = vadd.f32 %v6198_v25, %v5948_v58  ;;  %v1806_v16 = vpop.f32.mrb[11].mxu1  ;;  %v1904_v25 = vmul.f32 %v7653_v53, %v7653_v53 }
 0x24d   : > { %v1859_v23 = vrot.slane %v1858_v47, 4  ;;  %v1880_v45 = vadd.f32 %v1879_v29, %v1873_v31  ;;  %v7664_v13 = vadd.f32 %v7602_v46, %v1806_v16  ;;  %v1902_v0 = vmul.f32 %v7659_v1, %v7659_v1 }
 0x24e   : > { %v1905_v32 = vmul.f32 %v7661_v21, %v7661_v21 }
 0x24f   : > { %v1860_v51 = vadd.f32 %v1859_v23, %v1858_v47  ;;  %v1881_v22 = vrot.slane %v1880_v45, 4  ;;  %v1888_v5 = vadd.f32 %v7664_v13, %v7659_v1  ;;  %v1903_v40 = vmul.f32 %v7664_v13, %v7664_v13 }
 0x251   : > { %v1861_v17 = vrot.slane %v1860_v51, 2  ;;  %v1882_v20 = vadd.f32 %v1881_v22, %v1880_v45  ;;  %v1889_v27 = vadd.f32 %v7653_v53, %v1888_v5  ;;  %v1910_v46 = vadd.f32 %v1903_v40, %v1902_v0  ;;  %v5951_v57 = vpop.f32.mrb[12].mxu1 }
 0x252   : > { %v7677_v41 = vadd.f32 %v6204_v14, %v5951_v57  ;;  %v1819_v12 = vpop.f32.mrb[13].mxu1 }
 0x253   : > { %v1862_v55 = vadd.f32 %v1861_v17, %v1860_v51  ;;  %v1883_v50 = vrot.slane %v1882_v20, 2  ;;  %v1911_v8 = vadd.f32 %v1910_v46, %v1904_v25  ;;  %v7680_v60 = vadd.f32 %v7604_v49, %v1819_v12  ;;  %v5952_v39 = vpop.f32.mrb[14].mxu1  ;;  %v6497_v12 = vld [vmem:[#allocation10 + $0xc0] sm:$0xff]  }
 0x254   : > { %v1890_v54 = vadd.f32 %v7661_v21, %v1889_v27  ;;  %v7684_v37 = vadd.f32 %v7608_v56, %v5952_v39  ;;  %v1822_v42 = vpop.f32.mrb[15].mxu1  ;;  %v1908_v24 = vmul.f32 %v7677_v41, %v7677_v41  ;;  %v6500_v39 = vld [vmem:[#allocation10 + $0xc8] sm:$0xff]  }
 0x255   : > { %v1863_v26 = vrot.slane %v1862_v55, 1  ;;  %v1884_v59 = vadd.f32 %v1883_v50, %v1882_v20  ;;  %v1906_v14 = vmul.f32 %v7680_v60, %v7680_v60  ;;  %v1912_v3 = vadd.f32 %v1911_v8, %v1905_v32  ;;  %v6496_v32 = vld [vmem:[#allocation10 + $0x100] sm:$0xff]   ;;  %v6499_v50 = vld [vmem:[#allocation10 + $0x108] sm:$0xff]  }
 0x256   : > { %v1891_v7 = vadd.f32 %v7680_v60, %v1890_v54  ;;  %v7690_v30 = vadd.f32 %v7606_v63, %v1822_v42  ;;  %v1909_v63 = vmul.f32 %v7684_v37, %v7684_v37  ;;  %v6501_v8 = vld [vmem:[#allocation10 + $0x148] sm:$0xff]   ;;  %5600 = vmatprep.subr.bf16.mxu0 %v6496_v32  ;;  %v6502_v54 = vld [vmem:[#allocation10 + $0x110] sm:$0xff]  }
 0x257   : > { %v1864_v49 = vadd.f32 %v1863_v26, %v1862_v55  ;;  %v1885_v43 = vrot.slane %v1884_v59, 1  ;;  %v1913_v62 = vadd.f32 %v1912_v3, %v1906_v14  ;;  %v6498_v55 = vld [vmem:[#allocation10 + $0x140] sm:$0xff]   ;;  %v6504_v42 = vld [vmem:[#allocation10 + $0x150] sm:$0xff]   ;;  %v6507_v14 = vld [vmem:[#allocation10 + $0x158] sm:$0xff]  }
 0x258   : > { %v1892_v9 = vadd.f32 %v7690_v30, %v1891_v7  ;;  %v1907_v56 = vmul.f32 %v7690_v30, %v7690_v30  ;;  %5988 = vmatprep.subr.bf16.mxu1 %v6498_v55  ;;  %v6503_v26 = vld [vmem:[#allocation10 + $0xd0] sm:$0xff]   ;;  %v6506_v3 = vld [vmem:[#allocation10 + $0xd8] sm:$0xff]   ;;  %v6508_v7 = vld [vmem:[#allocation10 + $0x120] sm:$0xff]  }
 0x259   : > { %1865 = vst [vmem:[#allocation3] sm:$0x1] %v1864_v49  ;;  %v1886_v4 = vadd.f32 %v1885_v43, %v1884_v59  ;;  %5989 = vmatpush3.bf16.msra.mxu1 %v6498_v55  ;;  %v6505_v59 = vld [vmem:[#allocation10 + $0x118] sm:$0xff]   ;;  %v6510_v49 = vld [vmem:[#allocation10 + $0x160] sm:$0xff]  }
 0x25a   : > { %v1893_v31 = vadd.f32 %v7677_v41, %v1892_v9  ;;  %v1914_v47 = vadd.f32 %v1913_v62, %v1907_v56  ;;  %5990 = vmatprep.subr.bf16.mxu1 %v6501_v8  ;;  %v6509_v43 = vld [vmem:[#allocation10 + $0xe0] sm:$0xff]   ;;  %v6511_v62 = vld [vmem:[#allocation10 + $0x128] sm:$0xff]  }
 0x25b   : > { %1887 = vst [vmem:[#allocation3 + $0x2] sm:$0x1] %v1886_v4  ;;  %v6513_v9 = vld [vmem:[#allocation10 + $0x168] sm:$0xff]   ;;  %v6514_v4 = vld [vmem:[#allocation10 + $0x130] sm:$0xff]  }
 0x25c   : > { %v1894_v29 = vadd.f32 %v7684_v37, %v1893_v31  ;;  %v1915_v58 = vadd.f32 %v1914_v47, %v1908_v24  ;;  %v6512_v56 = vld [vmem:[#allocation10 + $0xe8] sm:$0xff]   ;;  %v6516_v24 = vld [vmem:[#allocation10 + $0x170] sm:$0xff]   ;;  %v6517_v47 = vld [vmem:[#allocation10 + $0x138] sm:$0xff]  }
 0x25d   : > { %5991 = vmatpush3.bf16.msra.mxu1 %v6501_v8  ;;  %v6515_v31 = vld [vmem:[#allocation10 + $0xf0] sm:$0xff]  }
 0x25e   : > { %v1895_v16 = vrot.slane %v1894_v29, 4  ;;  %v1916_v23 = vadd.f32 %v1915_v58, %v1909_v63  ;;  %5992 = vmatprep.subr.bf16.mxu1 %v6504_v42  ;;  %v6519_v63 = vld [vmem:[#allocation10 + $0x178] sm:$0xff]  }
 0x260   : > { %v1896_v45 = vadd.f32 %v1895_v16, %v1894_v29  ;;  %v1917_v0 = vrot.slane %v1916_v23, 4  ;;  %v6518_v29 = vld [vmem:[#allocation10 + $0xf8] sm:$0xff]  }
 0x261   : > { %5993 = vmatpush3.bf16.msra.mxu1 %v6504_v42 }
 0x262   : > { %v1897_v51 = vrot.slane %v1896_v45, 2  ;;  %v1918_v22 = vadd.f32 %v1917_v0, %v1916_v23  ;;  %5994 = vmatprep.subr.bf16.mxu1 %v6507_v14 }
 0x264   : > { %v1898_v5 = vadd.f32 %v1897_v51, %v1896_v45  ;;  %v1919_v40 = vrot.slane %v1918_v22, 2 }
 0x265   : > { %5995 = vmatpush3.bf16.msra.mxu1 %v6507_v14 }
 0x266   : > { %v1899_v25 = vrot.slane %v1898_v5, 1  ;;  %v1920_v17 = vadd.f32 %v1919_v40, %v1918_v22  ;;  %5996 = vmatprep.subr.bf16.mxu1 %v6510_v49  ;;  %v6939_v22 = vmov 1966171168   ;;  %v2023_v40 = vlaneseq }
 0x268   : > { %v1900_v20 = vadd.f32 %v1899_v25, %v1898_v5  ;;  %v1921_v27 = vrot.slane %v1920_v17, 1  ;;  %v2021_v5 = vunpack.c.l.s4 %v6939_v22  ;;  %v6520_v25 = vld [vmem:[#allocation10 + $0x40] sm:$0xff]  }
 0x269   : > { %5997 = vmatpush3.bf16.msra.mxu1 %v6510_v49 }
 0x26a   : > { %1901 = vst [vmem:[#allocation3 + $0x1] sm:$0x1] %v1900_v20  ;;  %v1922_v46 = vadd.f32 %v1921_v27, %v1920_v17  ;;  %5998 = vmatprep.subr.bf16.mxu1 %v6513_v9  ;;  %v2022_v17 = vunpack.c.0.s8 %v2021_v5  ;;  %v2024_v20 = vshrl.u32 %v2023_v40, 7  ;;  %v5257_v27 = vld [vmem:[%s9302_s5] ss:$0 sm:$0xff] }
 0x26c   : > { %1923 = vst [vmem:[#allocation3 + $0x3] sm:$0x1] %v1922_v46  ;;  %v7704_v46 = vsub.s32 %v2022_v17, %v2024_v20  ;;  %v7712_v14 = vsub.s32 0, %v2024_v20 }
 0x26d   : > { %5999 = vmatpush3.bf16.msra.mxu1 %v6513_v9 }
 0x26e   : > { %6000 = vmatprep.subr.bf16.mxu1 %v6516_v24  ;;  %9451 = vst [vmem:[#allocation29_spill] sm:$0xff] %v7704_v46  ;;  %9452 = vst [vmem:[#allocation30_spill] sm:$0xff] %v7712_v14 }
 0x271   : > { %6001 = vmatpush3.bf16.msra.mxu1 %v6516_v24 }
 0x272   : > { %6002 = vmatprep.subr.bf16.mxu1 %v6519_v63 }
 0x273   : > { %v1924_v57 = vld [vmem:[#allocation3] sm:$0xf] }
 0x274   : > { %5986 = vmatmul.mubr.f32.vlgmr.msra.gmra.mrb[64].mxu0 %v1924_v57 }
 0x275   : > { %5601 = vmatpush3.bf16.msra.mxu0 %v6497_v12  ;;  %6003 = vmatpush3.bf16.msra.mxu1 %v6519_v63 }
 0x276   : > { %5602 = vmatprep.subr.bf16.mxu0 %v6499_v50  ;;  %5680 = vmatprep.subr.bf16.mxu1 %v6520_v25  ;;  %v5258_v50 = vld [vmem:[%s9303_s6] ss:$0 sm:$0xff] }
 0x279   : > { %5603 = vmatpush3.bf16.msra.mxu0 %v6500_v39 }
 0x27a   : > { %5604 = vmatprep.subr.bf16.mxu0 %v6502_v54 }
 0x27d   : > { %5605 = vmatpush3.bf16.msra.mxu0 %v6503_v26 }
 0x27e   : > { %5606 = vmatprep.subr.bf16.mxu0 %v6505_v59 }
 0x281   : > { %5607 = vmatpush3.bf16.msra.mxu0 %v6506_v3 }
 0x282   : > { %5608 = vmatprep.subr.bf16.mxu0 %v6508_v7 }
 0x285   : > { %5609 = vmatpush3.bf16.msra.mxu0 %v6509_v43 }
 0x286   : > { %5610 = vmatprep.subr.bf16.mxu0 %v6511_v62 }
 0x289   : > { %5611 = vmatpush3.bf16.msra.mxu0 %v6512_v56 }
 0x28a   : > { %5612 = vmatprep.subr.bf16.mxu0 %v6514_v4 }
 0x28d   : > { %5613 = vmatpush3.bf16.msra.mxu0 %v6515_v31 }
 0x28e   : > { %5614 = vmatprep.subr.bf16.mxu0 %v6517_v47 }
 0x291   : > { %5615 = vmatpush3.bf16.msra.mxu0 %v6518_v29 }
 0x347   : > { %v1991_v58 = vpop.f32.mrb[64].mxu0 }
 0x348   : > { %v1995_v16 = vmul.f32 %v1991_v58, %v1991_v58  ;;  %v5987_v23 = vpop.f32.mrb[65].mxu0 }
 0x34a   : > { %v1997_v45 = vrot.slane %v1995_v16, 6 }
 0x34c   : > { %v1999_v0 = vsub.f32 %v1991_v58, %v1997_v45 }
 0x34e   : > { %v2000_v51 = vadd.f32 1e-05, %v1999_v0 }
 0x350   : > { %6568 = vrsqrt.f32 %v2000_v51 }
 0x35a   : > { %v6569_v57 = vpop.eup %6568 }
 0x35b   : > { %v2008_v32 = vmul.f32 %v6569_v57, %v5257_v27 }
 0x35d   : > { %v2010_v12 = vrot.slane %v2008_v32, 2  ;;  %v2026_v55 = vrot.slane %v2008_v32, %v7704_v46 }
 0x35f   : > { %v2012_v8 = vmul.f32 %v2010_v12, %v1991_v58  ;;  %v2027_v39 = vcombine.high %v2026_v55, %v2026_v55  ;;  %v2034_v42 = vrot.slane %v2026_v55, %v7704_v46 }
 0x361   : > { %v2019_v54 = vsub.f32 %v5258_v50, %v2012_v8  ;;  %v2041_v26 = vrot.slane %v2027_v39, %v7704_v46  ;;  %v2042_v59 = vcombine.high %v2034_v42, %v2034_v42 }
 0x363   : > { %v2077_v3 = vrot.slane %v2019_v54, %v7704_v46  ;;  %v2043_v7 = vcombine.high %v2041_v26, %v2041_v26  ;;  %v2047_v49 = vrot.slane %v2042_v59, %v7712_v14 }
 0x365   : > { %v2078_v43 = vcombine.high %v2077_v3, %v2077_v3  ;;  %v2085_v62 = vrot.slane %v2077_v3, %v7704_v46  ;;  %v2051_v9 = vrot.slane %v2043_v7, %v7712_v14  ;;  %v2054_v4 = vmul.f32 %v7614_v36, %v2047_v49 }
 0x366   : > { %v2055_v24 = vmul.f32 %v7620_v19, %v2047_v49  ;;  %v2056_v31 = vmul.f32 %v7611_v11, %v2047_v49  ;;  %v2057_v63 = vmul.f32 %v7617_v52, %v2047_v49  ;;  %v2058_v29 = vmul.f32 %v7636_v34, %v2047_v49 }
 0x367   : > { %v2092_v56 = vrot.slane %v2078_v43, %v7704_v46  ;;  %v2096_v47 = vrot.slane %v2085_v62, %v7712_v14  ;;  %v2059_v58 = vmul.f32 %v7645_v2, %v2047_v49  ;;  %v2060_v16 = vmul.f32 %v7631_v10, %v2047_v49 }
 0x368   : > { %v2061_v23 = vmul.f32 %v7639_v35, %v2047_v49  ;;  %v2062_v45 = vmul.f32 %v7659_v1, %v2051_v9  ;;  %v2063_v36 = vmul.f32 %v7664_v13, %v2051_v9  ;;  %v2064_v11 = vmul.f32 %v7653_v53, %v2051_v9 }
 0x369   : > { %v2100_v19 = vrot.slane %v2092_v56, %v7712_v14  ;;  %v2065_v0 = vmul.f32 %v7661_v21, %v2051_v9  ;;  %v2066_v52 = vmul.f32 %v7680_v60, %v2051_v9  ;;  %v2067_v34 = vmul.f32 %v7690_v30, %v2051_v9 }
 0x36a   : > { %v2068_v2 = vmul.f32 %v7677_v41, %v2051_v9  ;;  %v7736_v51 = vadd.f32 %v2096_v47, %v2054_v4  ;;  %v7738_v10 = vadd.f32 %v2096_v47, %v2055_v24  ;;  %v7740_v35 = vadd.f32 %v2096_v47, %v2056_v31 }
 0x36b   : > { %v2069_v1 = vmul.f32 %v7684_v37, %v2051_v9  ;;  %v7743_v13 = vadd.f32 %v2096_v47, %v2057_v63  ;;  %v7745_v22 = vadd.f32 %v2096_v47, %v2058_v29  ;;  %v7747_v53 = vadd.f32 %v2096_v47, %v2059_v58 }
 0x36c   : > { %v7749_v21 = vadd.f32 %v2096_v47, %v2060_v16  ;;  %v7751_v60 = vadd.f32 %v2096_v47, %v2061_v23  ;;  %v7753_v30 = vadd.f32 %v2100_v19, %v2062_v45  ;;  %v7755_v41 = vadd.f32 %v2100_v19, %v2063_v36 }
 0x36d   : > { %9453 = vst [vmem:[#allocation31_spill] sm:$0xff] %v7747_v53  ;;  %v7757_v5 = vadd.f32 %v2100_v19, %v2064_v11  ;;  %v7759_v40 = vadd.f32 %v2100_v19, %v2065_v0  ;;  %v7761_v25 = vadd.f32 %v2100_v19, %v2066_v52  ;;  %v7763_v37 = vadd.f32 %v2100_v19, %v2067_v34 }
 0x36e   : > { %9454 = vst [vmem:[#allocation32_spill] sm:$0xff] %v7749_v21  ;;  %9455 = vst [vmem:[#allocation33_spill] sm:$0xff] %v7751_v60  ;;  %v7765_v17 = vadd.f32 %v2100_v19, %v2068_v2  ;;  %v7768_v20 = vmul.f32 0.70710677, %v7736_v51  ;;  %v7771_v27 = vmul.f32 0.70710677, %v7738_v10  ;;  %v7776_v32 = vadd.f32 %v2100_v19, %v2069_v1 }
 0x36f   : > { %9456 = vst [vmem:[#allocation34_spill] sm:$0xff] %v7753_v30  ;;  %9457 = vst [vmem:[#allocation35_spill] sm:$0xff] %v7755_v41  ;;  %v7774_v57 = vmul.f32 0.70710677, %v7740_v35  ;;  %v7779_v12 = vmul.f32 0.70710677, %v7743_v13 }
 0x370   : > { %9458 = vst [vmem:[#allocation36_spill] sm:$0xff] %v7757_v5  ;;  %9459 = vst [vmem:[#allocation37_spill] sm:$0xff] %v7759_v40  ;;  %v7782_v55 = vmul.f32 0.70710677, %v7745_v22  ;;  %v7785_v50 = vmul.f32 0.70710677, %v7747_v53 }
 0x371   : > { %9460 = vst [vmem:[#allocation38_spill] sm:$0xff] %v7761_v25  ;;  %9461 = vst [vmem:[#allocation39_spill] sm:$0xff] %v7763_v37  ;;  %v7788_v8 = vmul.f32 0.70710677, %v7749_v21  ;;  %v7791_v39 = vmul.f32 0.70710677, %v7751_v60 }
 0x372   : > { %9462 = vst [vmem:[#allocation40_spill] sm:$0xff] %v7765_v17  ;;  %9463 = vst [vmem:[#allocation41_spill] sm:$0xff] %v7768_v20  ;;  %v7794_v54 = vmul.f32 0.70710677, %v7753_v30  ;;  %v7797_v42 = vmul.f32 0.70710677, %v7755_v41 }
 0x373   : > { %9464 = vst [vmem:[#allocation42_spill] sm:$0xff] %v7771_v27  ;;  %9465 = vst [vmem:[#allocation43_spill] sm:$0xff] %v7774_v57  ;;  %v7800_v26 = vmul.f32 0.70710677, %v7757_v5  ;;  %v7803_v59 = vmul.f32 0.70710677, %v7759_v40 }
 0x374   : > { %9466 = vst [vmem:[#allocation44_spill] sm:$0xff] %v7776_v32  ;;  %9467 = vst [vmem:[#allocation45_spill] sm:$0xff] %v7779_v12  ;;  %v7806_v3 = vmul.f32 0.70710677, %v7761_v25  ;;  %v7809_v7 = vmul.f32 0.70710677, %v7763_v37 }
 0x375   : > { %9468 = vst [vmem:[#allocation46_spill] sm:$0xff] %v7782_v55  ;;  %9469 = vst [vmem:[#allocation47_spill] sm:$0xff] %v7785_v50  ;;  %v7812_v49 = vand.u32 2147483647, %v7768_v20  ;;  %v7815_v43 = vmul.f32 0.70710677, %v7765_v17 }
 0x376   : > { %9470 = vst [vmem:[#allocation48_spill] sm:$0xff] %v7788_v8  ;;  %9471 = vst [vmem:[#allocation49_spill] sm:$0xff] %v7791_v39  ;;  %v7818_v62 = vmul.f32 0.70710677, %v7776_v32  ;;  %v7821_v9 = vand.u32 2147483647, %v7771_v27 }
 0x377   : > { %9472 = vst [vmem:[#allocation50_spill] sm:$0xff] %v7794_v54  ;;  %9473 = vst [vmem:[#allocation51_spill] sm:$0xff] %v7797_v42  ;;  %v7824_v56 = vand.u32 2147483647, %v7774_v57  ;;  %v7827_v4 = vand.u32 2147483647, %v7779_v12 }
 0x378   : > { %9474 = vst [vmem:[#allocation52_spill] sm:$0xff] %v7800_v26  ;;  %9475 = vst [vmem:[#allocation53_spill] sm:$0xff] %v7803_v59  ;;  %v7830_v24 = vand.u32 2147483647, %v7782_v55  ;;  %v7833_v31 = vand.u32 2147483647, %v7785_v50 }
 0x379   : > { %9476 = vst [vmem:[#allocation54_spill] sm:$0xff] %v7806_v3  ;;  %9477 = vst [vmem:[#allocation55_spill] sm:$0xff] %v7809_v7  ;;  %v7836_v47 = vand.u32 2147483647, %v7788_v8  ;;  %v7839_v63 = vand.u32 2147483647, %v7791_v39 }
 0x37a   : > { %9478 = vst [vmem:[#allocation56_spill] sm:$0xff] %v7815_v43  ;;  %9479 = vst [vmem:[#allocation57_spill] sm:$0xff] %v7818_v62  ;;  %v7842_v29 = vand.u32 2147483647, %v7794_v54  ;;  %v7845_v58 = vand.u32 2147483647, %v7797_v42 }
 0x37b   : > { %v2151_v16 = vmul.f32 0.3275911, %v7812_v49  ;;  %v7849_v23 = vand.u32 2147483647, %v7800_v26  ;;  %v7852_v45 = vand.u32 2147483647, %v7803_v59 }
 0x37c   : > { %v2152_v36 = vmul.f32 0.3275911, %v7821_v9  ;;  %v7856_v19 = vand.u32 2147483647, %v7806_v3  ;;  %v7859_v11 = vand.u32 2147483647, %v7809_v7 }
 0x37d   : > { %v2153_v0 = vmul.f32 0.3275911, %v7824_v56  ;;  %v7863_v52 = vand.u32 2147483647, %v7815_v43  ;;  %v7866_v34 = vand.u32 2147483647, %v7818_v62 }
 0x37e   : > { %v2154_v2 = vmul.f32 0.3275911, %v7827_v4  ;;  %v2155_v1 = vmul.f32 0.3275911, %v7830_v24  ;;  %v2156_v33 = vmul.f32 0.3275911, %v7833_v31 }
 0x37f   : > { %v7871_v14 = vadd.f32 1.0, %v2151_v16  ;;  %v2157_v46 = vmul.f32 0.3275911, %v7836_v47  ;;  %v2158_v61 = vmul.f32 0.3275911, %v7839_v63  ;;  %v7875_v44 = vadd.f32 1.0, %v2152_v36 }
 0x380   : > { %v2159_v15 = vmul.f32 0.3275911, %v7842_v29  ;;  %v2160_v18 = vmul.f32 0.3275911, %v7845_v58  ;;  %v7879_v6 = vadd.f32 1.0, %v2153_v0  ;;  %v7883_v48 = vadd.f32 1.0, %v2154_v2 }
 0x381   : > { %v2161_v28 = vmul.f32 0.3275911, %v7849_v23  ;;  %v2162_v38 = vmul.f32 0.3275911, %v7852_v45  ;;  %v2163_v16 = vmul.f32 0.3275911, %v7856_v19  ;;  %6570 = vrcp.f32 %v7871_v14 }
 0x382   : > { %v2164_v32 = vmul.f32 0.3275911, %v7859_v11  ;;  %v7887_v17 = vadd.f32 1.0, %v2155_v1  ;;  %v2165_v36 = vmul.f32 0.3275911, %v7863_v52  ;;  %v7892_v0 = vadd.f32 1.0, %v2156_v33 }
 0x383   : > { %v2166_v62 = vmul.f32 0.3275911, %v7866_v34  ;;  %6572 = vrcp.f32 %v7875_v44  ;;  %v7895_v43 = vadd.f32 1.0, %v2157_v46  ;;  %v7897_v2 = vadd.f32 1.0, %v2158_v61  ;;  %v6536_v61 = vld [vmem:[#allocation10 + $0x1c0] sm:$0xff]  }
 0x384   : > { %6574 = vrcp.f32 %v7879_v6  ;;  %v7900_v37 = vadd.f32 1.0, %v2159_v15  ;;  %v7902_v1 = vadd.f32 1.0, %v2160_v18  ;;  %v7904_v25 = vadd.f32 1.0, %v2161_v28  ;;  %5760 = vmatprep.subr.bf16.mxu0 %v6536_v61 }
 0x385   : > { %6576 = vrcp.f32 %v7883_v48  ;;  %v7907_v7 = vadd.f32 1.0, %v2162_v38  ;;  %v7909_v33 = vadd.f32 1.0, %v2163_v16  ;;  %v7911_v3 = vadd.f32 1.0, %v2164_v32 }
 0x386   : > { %6578 = vrcp.f32 %v7887_v17  ;;  %v7914_v46 = vadd.f32 1.0, %v2165_v36  ;;  %v7916_v40 = vadd.f32 1.0, %v2166_v62  ;;  %v2391_v28 = vsub.f32 0.0, %v7812_v49 }
 0x387   : > { %6580 = vrcp.f32 %v7892_v0  ;;  %v2392_v38 = vsub.f32 0.0, %v7821_v9  ;;  %v2393_v18 = vsub.f32 0.0, %v7824_v56  ;;  %v2394_v15 = vsub.f32 0.0, %v7827_v4 }
 0x388   : > { %6582 = vrcp.f32 %v7895_v43  ;;  %v2395_v32 = vsub.f32 0.0, %v7830_v24  ;;  %v2396_v62 = vsub.f32 0.0, %v7833_v31  ;;  %v2397_v16 = vsub.f32 0.0, %v7836_v47 }
 0x389   : > { %6584 = vrcp.f32 %v7897_v2  ;;  %v2398_v36 = vsub.f32 0.0, %v7839_v63  ;;  %v2399_v59 = vsub.f32 0.0, %v7842_v29  ;;  %v2400_v26 = vsub.f32 0.0, %v7845_v58 }
 0x38a   : > { %6586 = vrcp.f32 %v7900_v37  ;;  %v2401_v61 = vsub.f32 0.0, %v7849_v23  ;;  %v2402_v42 = vsub.f32 0.0, %v7852_v45  ;;  %v2403_v54 = vsub.f32 0.0, %v7856_v19 }
 0x38b   : > { %6588 = vrcp.f32 %v7902_v1  ;;  %v6571_v5 = vpop.eup %6570  ;;  %v2404_v41 = vsub.f32 0.0, %v7859_v11  ;;  %v2405_v30 = vsub.f32 0.0, %v7863_v52  ;;  %v2406_v60 = vsub.f32 0.0, %v7866_v34 }
 0x38c   : > { %6590 = vrcp.f32 %v7904_v25  ;;  %v2407_v39 = vmul.f32 %v2391_v28, %v7812_v49  ;;  %v2408_v8 = vmul.f32 %v2392_v38, %v7821_v9  ;;  %v2409_v53 = vmul.f32 %v2393_v18, %v7824_v56 }
 0x38d   : > { %v6573_v21 = vpop.eup %6572  ;;  %6592 = vrcp.f32 %v7907_v7  ;;  %v2410_v55 = vmul.f32 %v2394_v15, %v7827_v4  ;;  %v2411_v12 = vmul.f32 %v2395_v32, %v7830_v24  ;;  %v2412_v57 = vmul.f32 %v2396_v62, %v7833_v31 }
 0x38e   : > { %v6575_v50 = vpop.eup %6574  ;;  %6594 = vrcp.f32 %v7909_v33  ;;  %v2199_v20 = vmul.f32 %v6571_v5, %v7871_v14  ;;  %v2200_v49 = vmul.f32 %v6573_v21, %v7875_v44  ;;  %v2413_v9 = vmul.f32 %v2397_v16, %v7836_v47 }
 0x38f   : > { %v6577_v27 = vpop.eup %6576  ;;  %6596 = vrcp.f32 %v7911_v3  ;;  %v2414_v56 = vmul.f32 %v2398_v36, %v7839_v63  ;;  %v7955_v4 = vmul.f32 %v2399_v59, %v7842_v29  ;;  %v7958_v24 = vmul.f32 %v2400_v26, %v7845_v58 }
 0x390   : > { %v6579_v28 = vpop.eup %6578  ;;  %6598 = vrcp.f32 %v7914_v46  ;;  %v2201_v14 = vmul.f32 %v6575_v50, %v7879_v6  ;;  %v2202_v44 = vmul.f32 %v6577_v27, %v7883_v48  ;;  %v7964_v47 = vmul.f32 %v2401_v61, %v7849_v23 }
 0x391   : > { %v6581_v31 = vpop.eup %6580  ;;  %6600 = vrcp.f32 %v7916_v40  ;;  %v2203_v18 = vmul.f32 %v6579_v28, %v7887_v17  ;;  %v7968_v63 = vmul.f32 %v2402_v42, %v7852_v45  ;;  %v7971_v59 = vmul.f32 %v2403_v54, %v7856_v19 }
 0x392   : > { %v6583_v38 = vpop.eup %6582  ;;  %v7974_v26 = vmul.f32 %v2404_v41, %v7859_v11  ;;  %v2215_v58 = vsub.f32 2.0, %v2199_v20  ;;  %v2216_v6 = vsub.f32 2.0, %v2200_v49  ;;  %v7977_v48 = vmul.f32 %v2405_v30, %v7863_v52 }
 0x393   : > { %v6585_v29 = vpop.eup %6584  ;;  %v7980_v23 = vmul.f32 %v2406_v60, %v7866_v34  ;;  %v2204_v17 = vmul.f32 %v6581_v31, %v7892_v0  ;;  %v2423_v42 = vmul.f32 1.442695, %v2407_v39  ;;  %v2425_v45 = vmul.f32 1.442695, %v2408_v8 }
 0x394   : > { %v6587_v15 = vpop.eup %6586  ;;  %v2427_v32 = vmul.f32 1.442695, %v2409_v53  ;;  %v2217_v19 = vsub.f32 2.0, %v2201_v14  ;;  %v2218_v62 = vsub.f32 2.0, %v2202_v44  ;;  %v2429_v41 = vmul.f32 1.442695, %v2410_v55 }
 0x395   : > { %v6589_v54 = vpop.eup %6588  ;;  %v2431_v11 = vmul.f32 1.442695, %v2411_v12  ;;  %v2205_v20 = vmul.f32 %v6583_v38, %v7895_v43  ;;  %v2219_v36 = vsub.f32 2.0, %v2203_v18  ;;  %v2433_v30 = vmul.f32 1.442695, %v2412_v57 }
 0x396   : > { %v6591_v16 = vpop.eup %6590  ;;  %v2435_v52 = vmul.f32 1.442695, %v2413_v9  ;;  %v2206_v60 = vmul.f32 %v6585_v29, %v7897_v2  ;;  %v2207_v34 = vmul.f32 %v6587_v15, %v7900_v37  ;;  %v7986_v0 = vmul.f32 %v6571_v5, %v2215_v58 }
 0x397   : > { %v6593_v61 = vpop.eup %6592  ;;  %v7988_v8 = vmul.f32 %v6573_v21, %v2216_v6  ;;  %v2208_v39 = vmul.f32 %v6589_v54, %v7902_v1  ;;  %v2209_v12 = vmul.f32 %v6591_v16, %v7904_v25  ;;  %v2220_v55 = vsub.f32 2.0, %v2204_v17 }
 0x398   : > { %v6595_v53 = vpop.eup %6594  ;;  %6602 = vpow2.f32 %v2423_v42  ;;  %v2210_v57 = vmul.f32 %v6593_v61, %v7907_v7  ;;  %v7993_v49 = vmul.f32 %v6575_v50, %v2217_v19  ;;  %v7995_v9 = vmul.f32 %v6577_v27, %v2218_v62 }
 0x399   : > { %v6597_v43 = vpop.eup %6596  ;;  %6604 = vpow2.f32 %v2425_v45  ;;  %v2211_v21 = vmul.f32 %v6595_v53, %v7909_v33  ;;  %v2221_v5 = vsub.f32 2.0, %v2205_v20  ;;  %v8000_v2 = vmul.f32 %v6579_v28, %v2219_v36 }
 0x39a   : > { %v7997_v37 = vpop.eup %6598  ;;  %6606 = vpow2.f32 %v2427_v32  ;;  %v2212_v25 = vmul.f32 %v6597_v43, %v7911_v3  ;;  %v2222_v14 = vsub.f32 2.0, %v2206_v60  ;;  %v2223_v44 = vsub.f32 2.0, %v2207_v34 }
 0x39b   : > { %v8002_v1 = vpop.eup %6600  ;;  %6608 = vpow2.f32 %v2429_v41  ;;  %v2224_v50 = vsub.f32 2.0, %v2208_v39  ;;  %v2225_v7 = vsub.f32 2.0, %v2209_v12  ;;  %v8005_v27 = vmul.f32 %v6581_v31, %v2220_v55 }
 0x39c   : > { %v2437_v18 = vmul.f32 1.442695, %v2414_v56  ;;  %v8009_v58 = vmul.f32 %v7997_v37, %v7914_v46  ;;  %v2226_v33 = vsub.f32 2.0, %v2210_v57  ;;  %6610 = vpow2.f32 %v2431_v11 }
 0x39d   : > { %v2439_v28 = vmul.f32 1.442695, %v7955_v4  ;;  %v8014_v6 = vmul.f32 %v8002_v1, %v7916_v40  ;;  %v2227_v3 = vsub.f32 2.0, %v2211_v21  ;;  %v8016_v17 = vmul.f32 %v6583_v38, %v2221_v5 }
 0x39e   : > { %6612 = vpow2.f32 %v2433_v30  ;;  %v2228_v42 = vsub.f32 2.0, %v2212_v25  ;;  %v8018_v31 = vmul.f32 %v6585_v29, %v2222_v14  ;;  %v8020_v56 = vmul.f32 %v6587_v15, %v2223_v44 }
 0x39f   : > { %6614 = vpow2.f32 %v2435_v52  ;;  %v8022_v46 = vmul.f32 %v6589_v54, %v2224_v50  ;;  %v8024_v45 = vmul.f32 %v6591_v16, %v2225_v7  ;;  %v2441_v4 = vmul.f32 1.442695, %v7958_v24 }
 0x3a0   : > { %6616 = vpow2.f32 %v2437_v18  ;;  %v2229_v40 = vsub.f32 2.0, %v8009_v58  ;;  %v8028_v32 = vmul.f32 %v6593_v61, %v2226_v33  ;;  %v2443_v38 = vmul.f32 1.442695, %v7964_v47 }
 0x3a1   : > { %6618 = vpow2.f32 %v2439_v28  ;;  %v2230_v29 = vsub.f32 2.0, %v8014_v6  ;;  %v8034_v15 = vmul.f32 %v6595_v53, %v2227_v3  ;;  %v2247_v54 = vmul.f32 1.0614054, %v7986_v0 }
 0x3a2   : > { %v8031_v19 = vpop.eup %6602  ;;  %v2248_v62 = vmul.f32 1.0614054, %v7988_v8  ;;  %v8040_v24 = vmul.f32 %v6597_v43, %v2228_v42  ;;  %v8043_v11 = vmul.f32 1.442695, %v7968_v63  ;;  %v8046_v16 = vmul.f32 1.442695, %v7971_v59 }
 0x3a3   : > { %v8038_v41 = vpop.eup %6604  ;;  %v8049_v47 = vmul.f32 1.442695, %v7974_v26  ;;  %6620 = vpow2.f32 %v2441_v4  ;;  %v2263_v36 = vadd.f32 -1.4531521, %v2247_v54  ;;  %v2249_v52 = vmul.f32 1.0614054, %v7993_v49 }
 0x3a4   : > { %v8051_v20 = vpop.eup %6606  ;;  %v2264_v30 = vadd.f32 -1.4531521, %v2248_v62  ;;  %6622 = vpow2.f32 %v2443_v38  ;;  %v8057_v60 = vmul.f32 1.442695, %v7977_v48  ;;  %v8060_v63 = vmul.f32 0.5, %v7736_v51 }
 0x3a5   : > { %v8054_v61 = vpop.eup %6608  ;;  %v2250_v59 = vmul.f32 1.0614054, %v7995_v9  ;;  %v2279_v26 = vmul.f32 %v2263_v36, %v7986_v0  ;;  %v8066_v53 = vmul.f32 0.5, %v7738_v10  ;;  %v2265_v39 = vadd.f32 -1.4531521, %v2249_v52 }
 0x3a6   : > { %v2280_v34 = vmul.f32 %v2264_v30, %v7988_v8  ;;  %v8068_v12 = vpop.eup %6610  ;;  %v8071_v43 = vmul.f32 0.5, %v7740_v35  ;;  %v8074_v48 = vmul.f32 0.5, %v7743_v13  ;;  %v2251_v51 = vmul.f32 1.0614054, %v8000_v2 }
 0x3a7   : > { %v2266_v55 = vadd.f32 -1.4531521, %v2250_v59  ;;  %v2295_v21 = vadd.f32 1.4214138, %v2279_v26  ;;  %v2281_v25 = vmul.f32 %v2265_v39, %v7993_v49  ;;  %v2252_v10 = vmul.f32 1.0614054, %v8005_v27 }
 0x3a8   : > { %v8077_v57 = vpop.eup %6612  ;;  %v2296_v5 = vadd.f32 1.4214138, %v2280_v34  ;;  %v2267_v50 = vadd.f32 -1.4531521, %v2251_v51  ;;  %v8085_v35 = vmul.f32 0.5, %v7745_v22  ;;  %6624 = vpow2.f32 %v8043_v11 }
 0x3a9   : > { %v8081_v14 = vpop.eup %6614  ;;  %v2282_v44 = vmul.f32 %v2266_v55, %v7995_v9  ;;  %v2253_v13 = vmul.f32 1.0614054, %v8016_v17  ;;  %v2311_v18 = vmul.f32 %v2295_v21, %v7986_v0  ;;  %v2297_v28 = vadd.f32 1.4214138, %v2281_v25 }
 0x3aa   : > { %v8088_v7 = vpop.eup %6616  ;;  %v2312_v33 = vmul.f32 %v2296_v5, %v7988_v8  ;;  %v2268_v3 = vadd.f32 -1.4531521, %v2252_v10  ;;  %v2283_v38 = vmul.f32 %v2267_v50, %v8000_v2  ;;  %v2254_v54 = vmul.f32 1.0614054, %v8018_v31 }
 0x3ab   : > { %v8092_v42 = vpop.eup %6618  ;;  %v2298_v4 = vadd.f32 1.4214138, %v2282_v44  ;;  %v2269_v62 = vadd.f32 -1.4531521, %v2253_v13  ;;  %v2327_v22 = vadd.f32 -0.28449672, %v2311_v18  ;;  %v2313_v30 = vmul.f32 %v2297_v28, %v7993_v49 }
 0x3ac   : > { %v2328_v36 = vadd.f32 -0.28449672, %v2312_v33  ;;  %v2284_v52 = vmul.f32 %v2268_v3, %v8005_v27  ;;  %v2299_v26 = vadd.f32 1.4214138, %v2283_v38  ;;  %v2270_v34 = vadd.f32 -1.4531521, %v2254_v54 }
 0x3ad   : > { %v2314_v59 = vmul.f32 %v2298_v4, %v7995_v9  ;;  %v2285_v39 = vmul.f32 %v2269_v62, %v8016_v17  ;;  %v8100_v55 = vpop.eup %6620  ;;  %v2343_v51 = vmul.f32 %v2327_v22, %v7986_v0  ;;  %v2329_v5 = vadd.f32 -0.28449672, %v2313_v30  ;;  %v9480_v38 = vld [vmem:[#allocation41_spill] sm:$0xff]  ;;  %v9481_v54 = vld [vmem:[#allocation42_spill] sm:$0xff] }
 0x3ae   : > { %v2344_v21 = vmul.f32 %v2328_v36, %v7988_v8  ;;  %v2300_v25 = vadd.f32 1.4214138, %v2284_v52  ;;  %v8104_v10 = vpop.eup %6622  ;;  %v2315_v50 = vmul.f32 %v2299_v26, %v8000_v2  ;;  %v2286_v13 = vmul.f32 %v2270_v34, %v8018_v31 }
 0x3af   : > { %v2330_v44 = vadd.f32 -0.28449672, %v2314_v59  ;;  %v2301_v18 = vadd.f32 1.4214138, %v2285_v39  ;;  %v2359_v33 = vadd.f32 0.2548296, %v2343_v51  ;;  %v2345_v3 = vmul.f32 %v2329_v5, %v7993_v49 }
 0x3b0   : > { %v2360_v28 = vadd.f32 0.2548296, %v2344_v21  ;;  %v2316_v4 = vmul.f32 %v2300_v25, %v8005_v27  ;;  %vm2487_vm1 = vcmp.ge.f32.partialorder %v9480_v38, 0.0  ;;  %vm2488_vm2 = vcmp.ge.f32.partialorder %v9481_v54, 0.0  ;;  %v9482_v51 = vld [vmem:[#allocation43_spill] sm:$0xff] }
 0x3b1   : > { %v2346_v62 = vmul.f32 %v2330_v44, %v7995_v9  ;;  %v2331_v22 = vadd.f32 -0.28449672, %v2315_v50  ;;  %v2302_v36 = vadd.f32 1.4214138, %v2286_v13  ;;  %v2317_v30 = vmul.f32 %v2301_v18, %v8016_v17  ;;  %v9483_v18 = vld [vmem:[#allocation45_spill] sm:$0xff] }
 0x3b2   : > { %v2375_v52 = vmul.f32 %v2359_v33, %v7986_v0  ;;  %v2376_v59 = vmul.f32 %v2360_v28, %v7988_v8  ;;  %v2361_v26 = vadd.f32 0.2548296, %v2345_v3  ;;  %v2332_v34 = vadd.f32 -0.28449672, %v2316_v4 }
 0x3b3   : > { %v2362_v39 = vadd.f32 0.2548296, %v2346_v62  ;;  %vm2489_vm3 = vcmp.ge.f32.partialorder %v9482_v51, 0.0  ;;  %v2347_v21 = vmul.f32 %v2331_v22, %v8000_v2  ;;  %v2318_v5 = vmul.f32 %v2302_v36, %v8018_v31 }
 0x3b4   : > { %v2333_v25 = vadd.f32 -0.28449672, %v2317_v30  ;;  %v2455_v44 = vmul.f32 %v8031_v19, %v2375_v52  ;;  %v2456_v50 = vmul.f32 %v8038_v41, %v2376_v59  ;;  %v2377_v13 = vmul.f32 %v2361_v26, %v7993_v49  ;;  %v9484_v19 = vld [vmem:[#allocation46_spill] sm:$0xff]  ;;  %v9485_v59 = vld [vmem:[#allocation47_spill] sm:$0xff] }
 0x3b5   : > { %vm2490_vm4 = vcmp.ge.f32.partialorder %v9483_v18, 0.0  ;;  %v2348_v0 = vmul.f32 %v2332_v34, %v8005_v27  ;;  %v2378_v8 = vmul.f32 %v2362_v39, %v7995_v9  ;;  %v2363_v33 = vadd.f32 0.2548296, %v2347_v21 }
 0x3b6   : > { %v2334_v28 = vadd.f32 -0.28449672, %v2318_v5  ;;  %v2349_v3 = vmul.f32 %v2333_v25, %v8016_v17  ;;  %v2471_v4 = vsub.f32 1.0, %v2455_v44  ;;  %v2472_v62 = vsub.f32 1.0, %v2456_v50 }
 0x3b7   : > { %v2457_v22 = vmul.f32 %v8051_v20, %v2377_v13  ;;  %v2364_v36 = vadd.f32 0.2548296, %v2348_v0  ;;  %vm2491_vm5 = vcmp.ge.f32.partialorder %v9484_v19, 0.0  ;;  %v2458_v41 = vmul.f32 %v8054_v61, %v2378_v8  ;;  %v9486_v19 = vld [vmem:[#allocation31_spill] sm:$0xff] }
 0x3b8   : > { %v2379_v49 = vmul.f32 %v2363_v33, %v8000_v2  ;;  %v2350_v30 = vmul.f32 %v2334_v28, %v8018_v31  ;;  %v2365_v52 = vadd.f32 0.2548296, %v2349_v3  ;;  %vm2492_vm6 = vcmp.ge.f32.partialorder %v9485_v59, 0.0 }
 0x3b9   : > { %v2503_v9 = vsub.f32 0.0, %v2471_v4  ;;  %v2504_v26 = vsub.f32 0.0, %v2472_v62  ;;  %v2473_v34 = vsub.f32 1.0, %v2457_v22  ;;  %v2380_v39 = vmul.f32 %v2364_v36, %v8005_v27 }
 0x3ba   : > { %v2474_v21 = vsub.f32 1.0, %v2458_v41  ;;  %v2459_v20 = vmul.f32 %v8068_v12, %v2379_v49  ;;  %v2366_v5 = vadd.f32 0.2548296, %v2350_v30  ;;  %v2381_v25 = vmul.f32 %v2365_v52, %v8016_v17 }
 0x3bb   : > { %v2519_v61 = vsel %vm2487_vm1, %v2471_v4, %v2503_v9  ;;  %v2520_v2 = vsel %vm2488_vm2, %v2472_v62, %v2504_v26  ;;  %v2505_v44 = vsub.f32 0.0, %v2473_v34  ;;  %v2460_v50 = vmul.f32 %v8077_v57, %v2380_v39 }
 0x3bc   : > { %v2551_v13 = vadd.f32 1.0, %v2519_v61  ;;  %v2552_v0 = vadd.f32 1.0, %v2520_v2  ;;  %v2506_v8 = vsub.f32 0.0, %v2474_v21  ;;  %v2475_v33 = vsub.f32 1.0, %v2459_v20 }
 0x3bd   : > { %v2521_v27 = vsel %vm2489_vm3, %v2473_v34, %v2505_v44  ;;  %v2476_v12 = vsub.f32 1.0, %v2460_v50  ;;  %v2382_v28 = vmul.f32 %v2366_v5, %v8018_v31  ;;  %v2461_v17 = vmul.f32 %v8081_v14, %v2381_v25  ;;  %v9487_v5 = vld [vmem:[#allocation48_spill] sm:$0xff]  ;;  %v9488_v25 = vld [vmem:[#allocation49_spill] sm:$0xff] }
 0x3be   : > { %v8145_v38 = vmul.f32 %v2551_v13, %v8060_v63  ;;  %v8148_v54 = vmul.f32 %v2552_v0, %v8066_v53  ;;  %v2522_v57 = vsel %vm2490_vm4, %v2474_v21, %v2506_v8  ;;  %v2553_v3 = vadd.f32 1.0, %v2521_v27 }
 0x3bf   : > { %v2554_v4 = vadd.f32 1.0, %v2522_v57  ;;  %v2507_v62 = vsub.f32 0.0, %v2475_v33  ;;  %v2508_v22 = vsub.f32 0.0, %v2476_v12  ;;  %v2462_v51 = vmul.f32 %v8088_v7, %v2382_v28  ;;  %v9490_v28 = vld [vmem:[#allocation33_spill] sm:$0xff] }
 0x3c0   : > { %2598 = vst [vmem:[#allocation2 + $0x38] sm:$0xff] %v8148_v54  ;;  %v2926_v31 = vpack.c.bf16 %v8148_v54, %v8145_v38  ;;  %v2645_v63 = vrot.slane %v8145_v38, 7  ;;  %v2646_v14 = vrot.slane %v8148_v54, 7  ;;  %v2693_v53 = vrot.slane %v8145_v38, 1 }
 0x3c1   : > { %v2694_v18 = vrot.slane %v8148_v54, 1  ;;  %v8161_v36 = vmul.f32 %v2553_v3, %v8071_v43  ;;  %v8164_v41 = vmul.f32 %v2554_v4, %v8074_v48  ;;  %v2523_v7 = vsel %vm2491_vm5, %v2475_v33, %v2507_v62  ;;  %v9489_v33 = vld [vmem:[#allocation32_spill] sm:$0xff] }
 0x3c2   : > { %3174 = vmatprep.mubr.bf16.mxu0 %v2926_v31  ;;  %2677 = vst [vmem:[#allocation2 + $0x18] sm:$0xfe] %v2645_v63  ;;  %2678 = vst [vmem:[#allocation2 + $0x30] sm:$0xfe] %v2646_v14  ;;  %v2524_v49 = vsel %vm2492_vm6, %v2476_v12, %v2508_v22  ;;  %v2555_v30 = vadd.f32 1.0, %v2523_v7  ;;  %v2477_v52 = vsub.f32 1.0, %v2461_v17  ;;  %6626 = vpow2.f32 %v8046_v16 }
 0x3c3   : > { %2725 = vst [vmem:[#allocation2 + $0x28] sm:$0x7f] %v2693_v53  ;;  %v2478_v9 = vsub.f32 1.0, %v2462_v51  ;;  %2726 = vst [vmem:[#allocation2 + $0x40] sm:$0x7f] %v2694_v18  ;;  %v2695_v43 = vrot.slane %v8161_v36, 1  ;;  %v2929_v63 = vpack.c.bf16 %v8164_v41, %v8161_v36  ;;  %6628 = vpow2.f32 %v8049_v47 }
 0x3c4   : > { %2599 = vst [vmem:[#allocation2 + $0x50] sm:$0xff] %v8161_v36  ;;  %2600 = vst [vmem:[#allocation2 + $0x68] sm:$0xff] %v8164_v41  ;;  %v2696_v48 = vrot.slane %v8164_v41, 1  ;;  %v2540_v26 = vmul.f32 0.5, %v9486_v19  ;;  %v2556_v34 = vadd.f32 1.0, %v2524_v49  ;;  %v8176_v39 = vmul.f32 %v2555_v30, %v8085_v35  ;;  %v6538_v49 = vld [vmem:[#allocation10 + $0x180] sm:$0xff]  }
 0x3c5   : > { %v2647_v59 = vrot.slane %v8161_v36, 7  ;;  %v2648_v21 = vrot.slane %v8164_v41, 7  ;;  %v2509_v20 = vsub.f32 0.0, %v2477_v52  ;;  %vm2493_vm7 = vcmp.ge.f32.partialorder %v9487_v5, 0.0  ;;  %2727 = vst [vmem:[#allocation2 + $0x58] sm:$0x7f] %v2695_v43 }
 0x3c6   : > { %vm2494_vm8 = vcmp.ge.f32.partialorder %v9488_v25, 0.0  ;;  %2728 = vst [vmem:[#allocation2 + $0x70] sm:$0x7f] %v2696_v48  ;;  %v8182_v61 = vmul.f32 %v2556_v34, %v2540_v26  ;;  %v2510_v2 = vsub.f32 0.0, %v2478_v9  ;;  %v2697_v44 = vrot.slane %v8176_v39, 1  ;;  %v6539_v48 = vld [vmem:[#allocation10 + $0x1c8] sm:$0xff]  }
 0x3c7   : > { %2679 = vst [vmem:[#allocation2 + $0x48] sm:$0xfe] %v2647_v59  ;;  %2680 = vst [vmem:[#allocation2 + $0x60] sm:$0xfe] %v2648_v21  ;;  %v2525_v35 = vsel %vm2493_vm7, %v2477_v52, %v2509_v20  ;;  %v2255_v50 = vmul.f32 1.0614054, %v8020_v56  ;;  %v8213_v19 = vmul.f32 %v7997_v37, %v2229_v40  ;;  %v8222_v40 = vmul.f32 %v8002_v1, %v2230_v29 }
 0x3c8   : > { %v2256_v13 = vmul.f32 1.0614054, %v8022_v46  ;;  %v2698_v0 = vrot.slane %v8182_v61, 1  ;;  %2602 = vst [vmem:[#allocation2 + $0x98] sm:$0xff] %v8182_v61  ;;  %v2526_v8 = vsel %vm2494_vm8, %v2478_v9, %v2510_v2  ;;  %v2541_v27 = vmul.f32 0.5, %v9489_v33  ;;  %v6521_v59 = vld [vmem:[#allocation10] sm:$0xff]  }
 0x3c9   : > { %v2557_v12 = vadd.f32 1.0, %v2525_v35  ;;  %2729 = vst [vmem:[#allocation2 + $0x88] sm:$0x7f] %v2697_v44  ;;  %v2542_v17 = vmul.f32 0.5, %v9490_v28  ;;  %v2558_v57 = vadd.f32 1.0, %v2526_v8  ;;  %v8193_v22 = vld [vmem:[#allocation2 + $0x18] sm:$0xff]  ;;  %6630 = vpow2.f32 %v8057_v60 }
 0x3ca   : > { %v2271_v3 = vadd.f32 -1.4531521, %v2255_v50  ;;  %v2272_v4 = vadd.f32 -1.4531521, %v2256_v13  ;;  %v2453_v62 = vmul.f32 1.442695, %v7980_v23  ;;  %v2932_v33 = vpack.c.bf16 %v8182_v61, %v8176_v39 }
 0x3cb   : > { %v8195_v51 = vld [vmem:[#allocation2 + $0x30] sm:$0xff]  ;;  %v2879_v31 = vld [vmem:[#allocation2 + $0x28] sm:$0xff]  ;;  %2730 = vst [vmem:[#allocation2 + $0xa0] sm:$0x7f] %v2698_v0  ;;  %v8199_v14 = vmul.f32 %v2557_v12, %v2541_v27  ;;  %v2882_v18 = vld [vmem:[#allocation2 + $0x40] sm:$0xff]  ;;  %v8203_v7 = vmul.f32 %v2558_v57, %v2542_v17  ;;  %v2649_v9 = vrot.slane %v8176_v39, 7 }
 0x3cc   : > { %v2925_v53 = vpack.c.bf16 %v8195_v51, %v8193_v22  ;;  %v2287_v11 = vmul.f32 %v2271_v3, %v8020_v56  ;;  %v2288_v23 = vmul.f32 %v2272_v4, %v8022_v46  ;;  %v2927_v30 = vpack.c.bf16 %v2882_v18, %v2879_v31  ;;  %v2885_v26 = vld [vmem:[#allocation2 + $0x58] sm:$0xff]  ;;  %v6522_v25 = vld [vmem:[#allocation10 + $0x48] sm:$0xff]  }
 0x3cd   : > { %v2699_v52 = vrot.slane %v8199_v14, 1  ;;  %v2650_v43 = vrot.slane %v8182_v61, 7  ;;  %v2888_v34 = vld [vmem:[#allocation2 + $0x70] sm:$0xff]  ;;  %v2700_v21 = vrot.slane %v8203_v7, 1  ;;  %2681 = vst [vmem:[#allocation2 + $0x78] sm:$0xfe] %v2649_v9  ;;  %6632 = vpow2.f32 %v2453_v62 }
 0x3ce   : > { %3175 = vmatmul.mubr.bf16.vlgmr.msra.gmra.mrb[68].mxu0 %v2925_v53  ;;  %v2303_v20 = vadd.f32 1.4214138, %v2287_v11  ;;  %6004 = vmatprep.mubr.bf16.mxu1 %v2927_v30  ;;  %v2930_v5 = vpack.c.bf16 %v2888_v34, %v2885_v26  ;;  %v2304_v58 = vadd.f32 1.4214138, %v2288_v23  ;;  %v2257_v37 = vmul.f32 1.0614054, %v8024_v45 }
 0x3cf   : > { %3182 = vmatprep.mubr.bf16.mxu0 %v2929_v63  ;;  %2731 = vst [vmem:[#allocation2 + $0xb8] sm:$0x7f] %v2699_v52  ;;  %2682 = vst [vmem:[#allocation2 + $0x90] sm:$0xfe] %v2650_v43  ;;  %v6523_v16 = vld [vmem:[#allocation10 + $0x8] sm:$0xff]   ;;  %5761 = vmatpush3.bf16.msra.mxu0 %v6538_v49  ;;  %v6541_v35 = vld [vmem:[#allocation10 + $0x1d0] sm:$0xff]   ;;  %v8247_v49 = vpop.eup %6624  ;;  %v2935_v52 = vpack.c.bf16 %v8203_v7, %v8199_v14 }
 0x3d0   : > { %2732 = vst [vmem:[#allocation2 + $0xd0] sm:$0x7f] %v2700_v21  ;;  %v2319_v47 = vmul.f32 %v2303_v20, %v8020_v56  ;;  %v2258_v2 = vmul.f32 1.0614054, %v8028_v32  ;;  %v6540_v44 = vld [vmem:[#allocation10 + $0x188] sm:$0xff]   ;;  %6005 = vmatmul.mubr.bf16.vlgmr.msra.gmra.mrb[48].mxu1 %v2930_v5  ;;  %v8229_v6 = vld [vmem:[#allocation2 + $0x60] sm:$0xff]  ;;  %v2320_v1 = vmul.f32 %v2304_v58, %v8022_v46  ;;  %5762 = vmatprep.subr.bf16.mxu0 %v6539_v48 }
 0x3d1   : > { %v2891_v50 = vld [vmem:[#allocation2 + $0x88] sm:$0xff]  ;;  %v2273_v0 = vadd.f32 -1.4531521, %v2257_v37  ;;  %5681 = vmatpush3.bf16.msra.mxu1 %v6521_v59  ;;  %v9492_v12 = vld [vmem:[#allocation35_spill] sm:$0xff]  ;;  %v2259_v31 = vmul.f32 1.0614054, %v8034_v15 }
 0x3d2   : > { %v8227_v13 = vld [vmem:[#allocation2 + $0x48] sm:$0xff]  ;;  %v2894_v8 = vld [vmem:[#allocation2 + $0xa0] sm:$0xff]  ;;  %v2335_v27 = vadd.f32 -0.28449672, %v2319_v47  ;;  %v8238_v28 = vmul.f32 0.5, %v9492_v12  ;;  %5682 = vmatprep.subr.bf16.mxu1 %v6522_v25  ;;  %v6524_v3 = vld [vmem:[#allocation10 + $0x50] sm:$0xff]   ;;  %v2809_v25 = vpack.c.bf16 %v8161_v36, %v8148_v54 }
 0x3d3   : > { %v9491_v29 = vld [vmem:[#allocation34_spill] sm:$0xff]  ;;  %v2274_v17 = vadd.f32 -1.4531521, %v2258_v2  ;;  %v2933_v57 = vpack.c.bf16 %v2894_v8, %v2891_v50  ;;  %v2336_v4 = vadd.f32 -0.28449672, %v2320_v1  ;;  %v2289_v62 = vmul.f32 %v2273_v0, %v8024_v45  ;;  %5763 = vmatpush3.bf16.msra.mxu0 %v6540_v44  ;;  %v6543_v23 = vld [vmem:[#allocation10 + $0x190] sm:$0xff]   ;;  %v8267_v1 = vpop.eup %6626 }
 0x3d4   : > { %v8233_v60 = vmul.f32 0.5, %v9491_v29  ;;  %v2928_v63 = vpack.c.bf16 %v8229_v6, %v8227_v13  ;;  %v2351_v53 = vmul.f32 %v2335_v27, %v8020_v56  ;;  %v2260_v11 = vmul.f32 1.0614054, %v8040_v24  ;;  %5764 = vmatprep.subr.bf16.mxu0 %v6541_v35  ;;  %v6544_v48 = vld [vmem:[#allocation10 + $0x1d8] sm:$0xff]   ;;  %v9494_v47 = vld [vmem:[#allocation50_spill] sm:$0xff]  ;;  %v6525_v2 = vld [vmem:[#allocation10 + $0x10] sm:$0xff]  }
 0x3d5   : > { %v2290_v18 = vmul.f32 %v2274_v17, %v8028_v32  ;;  %6008 = vmatprep.mubr.bf16.mxu1 %v2933_v57  ;;  %v2352_v30 = vmul.f32 %v2336_v4, %v8022_v46  ;;  %v2305_v9 = vadd.f32 1.4214138, %v2289_v62  ;;  %v2275_v43 = vadd.f32 -1.4531521, %v2259_v31  ;;  %5683 = vmatpush3.bf16.msra.mxu1 %v6523_v16  ;;  %v8252_v59 = vld [vmem:[#allocation2 + $0x78] sm:$0xff]  ;;  %v8272_v57 = vpop.eup %6628  ;;  %v6556_v36 = vld [vmem:[#allocation10 + $0xa0] sm:$0xff]  }
 0x3d6   : > { %3183 = vmatmul.mubr.bf16.gmra.mrb[72].mxu0 %v2928_v63  ;;  %v2897_v26 = vld [vmem:[#allocation2 + $0xb8] sm:$0xff]  ;;  %v2367_v34 = vadd.f32 0.2548296, %v2351_v53  ;;  %v8254_v21 = vld [vmem:[#allocation2 + $0x90] sm:$0xff]  ;;  %v2808_v58 = vpack.c.bf16 %v8227_v13, %v8195_v51  ;;  %5684 = vmatprep.subr.bf16.mxu1 %v6524_v3  ;;  %vm2495_vm9 = vcmp.ge.f32.partialorder %v9494_v47, 0.0  ;;  %v2651_v31 = vrot.slane %v8199_v14, 7 }
 0x3d7   : > { %v9493_v20 = vld [vmem:[#allocation36_spill] sm:$0xff]  ;;  %3190 = vmatprep.mubr.bf16.mxu0 %v2932_v33  ;;  %v2900_v37 = vld [vmem:[#allocation2 + $0xd0] sm:$0xff]  ;;  %v2368_v16 = vadd.f32 0.2548296, %v2352_v30  ;;  %v2931_v44 = vpack.c.bf16 %v8254_v21, %v8252_v59  ;;  %v2306_v35 = vadd.f32 1.4214138, %v2290_v18  ;;  %v2321_v50 = vmul.f32 %v2305_v9, %v8024_v45  ;;  %5765 = vmatpush3.bf16.msra.mxu0 %v6543_v23 }
 0x3d8   : > { %v8257_v5 = vmul.f32 0.5, %v9493_v20  ;;  %v2936_v29 = vpack.c.bf16 %v2900_v37, %v2897_v26  ;;  %v2383_v0 = vmul.f32 %v2367_v34, %v8020_v56  ;;  %v9495_v8 = vld [vmem:[#allocation51_spill] sm:$0xff]  ;;  %v6526_v33 = vld [vmem:[#allocation10 + $0x58] sm:$0xff]   ;;  %v2276_v27 = vadd.f32 -1.4531521, %v2260_v11  ;;  %5766 = vmatprep.subr.bf16.mxu0 %v6544_v48  ;;  %v6546_v63 = vld [vmem:[#allocation10 + $0x1e0] sm:$0xff]   ;;  %v8277_v56 = vpop.eup %6630 }
 0x3d9   : > { %vm2496_vm10 = vcmp.ge.f32.partialorder %v9495_v8, 0.0  ;;  %v2291_v12 = vmul.f32 %v2275_v43, %v8034_v15  ;;  %v6545_v17 = vld [vmem:[#allocation10 + $0x198] sm:$0xff]   ;;  %v2384_v3 = vmul.f32 %v2368_v16, %v8022_v46  ;;  %v2322_v4 = vmul.f32 %v2306_v35, %v8028_v32  ;;  %v8282_v30 = vpop.eup %6632  ;;  %5685 = vmatpush3.bf16.msra.mxu1 %v6525_v2  ;;  %v6528_v26 = vld [vmem:[#allocation10 + $0x60] sm:$0xff]   ;;  %2683 = vst [vmem:[#allocation2 + $0xa8] sm:$0xfe] %v2651_v31  ;;  %v6557_v51 = vld [vmem:[#allocation10 + $0xa8] sm:$0xff]  }
 0x3da   : > { %v2337_v62 = vadd.f32 -0.28449672, %v2321_v50  ;;  %6009 = vmatmul.mubr.bf16.gmra.mrb[52].mxu1 %v2936_v29  ;;  %v2463_v53 = vmul.f32 %v8092_v42, %v2383_v0  ;;  %v2292_v18 = vmul.f32 %v2276_v27, %v8040_v24  ;;  %v2652_v23 = vrot.slane %v8203_v7, 7  ;;  %v6527_v9 = vld [vmem:[#allocation10 + $0x18] sm:$0xff]   ;;  %5686 = vmatprep.subr.bf16.mxu1 %v6526_v33  ;;  %v6548_v35 = vld [vmem:[#allocation10 + $0x1a0] sm:$0xff]   ;;  %v6549_v0 = vld [vmem:[#allocation10 + $0x1e8] sm:$0xff]  }
 0x3db   : > { %v2307_v11 = vadd.f32 1.4214138, %v2291_v12  ;;  %v2464_v46 = vmul.f32 %v8100_v55, %v2384_v3  ;;  %v2338_v43 = vadd.f32 -0.28449672, %v2322_v4  ;;  %v2261_v34 = vmul.f32 1.0614054, %v8213_v19  ;;  %5767 = vmatpush3.bf16.msra.mxu0 %v6545_v17 }
 0x3dc   : > { %v2353_v48 = vmul.f32 %v2337_v62, %v8024_v45  ;;  %v2479_v20 = vsub.f32 1.0, %v2463_v53  ;;  %v2308_v42 = vadd.f32 1.4214138, %v2292_v18  ;;  %2684 = vst [vmem:[#allocation2 + $0xc0] sm:$0xfe] %v2652_v23  ;;  %5768 = vmatprep.subr.bf16.mxu0 %v6546_v63  ;;  %v9496_v12 = vld [vmem:[#allocation52_spill] sm:$0xff] }
 0x3dd   : > { %v2323_v37 = vmul.f32 %v2307_v11, %v8034_v15  ;;  %v2262_v16 = vmul.f32 1.0614054, %v8222_v40  ;;  %v2480_v55 = vsub.f32 1.0, %v2464_v46  ;;  %v2354_v2 = vmul.f32 %v2338_v43, %v8028_v32  ;;  %5687 = vmatpush3.bf16.msra.mxu1 %v6527_v9  ;;  %v6529_v53 = vld [vmem:[#allocation10 + $0x20] sm:$0xff]   ;;  %v6530_v46 = vld [vmem:[#allocation10 + $0x68] sm:$0xff]  }
 0x3de   : > { %v2369_v50 = vadd.f32 0.2548296, %v2353_v48  ;;  %v2277_v29 = vadd.f32 -1.4531521, %v2261_v34  ;;  %v2511_v27 = vsub.f32 0.0, %v2479_v20  ;;  %3191 = vmatmul.mubr.bf16.gmra.mrb[76].mxu0 %v2931_v44  ;;  %vm2497_vm11 = vcmp.ge.f32.partialorder %v9496_v12, 0.0  ;;  %5688 = vmatprep.subr.bf16.mxu1 %v6528_v26 }
 0x3df   : > { %v2324_v33 = vmul.f32 %v2308_v42, %v8040_v24  ;;  %v2339_v3 = vadd.f32 -0.28449672, %v2323_v37  ;;  %v2278_v4 = vadd.f32 -1.4531521, %v2262_v16  ;;  %v2512_v62 = vsub.f32 0.0, %v2480_v55  ;;  %3198 = vmatprep.mubr.bf16.mxu0 %v2935_v52  ;;  %v9497_v18 = vld [vmem:[#allocation53_spill] sm:$0xff]  ;;  %5769 = vmatpush3.bf16.msra.mxu0 %v6548_v35 }
 0x3e0   : > { %v2370_v17 = vadd.f32 0.2548296, %v2354_v2  ;;  %v2385_v31 = vmul.f32 %v2369_v50, %v8024_v45  ;;  %v2293_v63 = vmul.f32 %v2277_v29, %v8213_v19  ;;  %v2527_v44 = vsel %vm2495_vm9, %v2479_v20, %v2511_v27  ;;  %v6550_v52 = vld [vmem:[#allocation10 + $0x1a8] sm:$0xff]   ;;  %5770 = vmatprep.subr.bf16.mxu0 %v6549_v0  ;;  %v6551_v34 = vld [vmem:[#allocation10 + $0x1f0] sm:$0xff]  }
 0x3e1   : > { %vm2498_vm12 = vcmp.ge.f32.partialorder %v9497_v18, 0.0  ;;  %v2340_v11 = vadd.f32 -0.28449672, %v2324_v33  ;;  %v2355_v23 = vmul.f32 %v2339_v3, %v8034_v15  ;;  %v2294_v9 = vmul.f32 %v2278_v4, %v8222_v40  ;;  %v8307_v37 = vld [vmem:[#allocation2 + $0xa8] sm:$0xff]  ;;  %5689 = vmatpush3.bf16.msra.mxu1 %v6529_v53  ;;  %v6554_v53 = vld [vmem:[#allocation10 + $0x1f8] sm:$0xff]  }
 0x3e2   : > { %v2528_v45 = vsel %vm2496_vm10, %v2480_v55, %v2512_v62  ;;  %v2559_v43 = vadd.f32 1.0, %v2527_v44  ;;  %v2386_v48 = vmul.f32 %v2370_v17, %v8028_v32  ;;  %v2465_v47 = vmul.f32 %v8104_v10, %v2385_v31  ;;  %v6531_v2 = vld [vmem:[#allocation10 + $0x28] sm:$0xff]   ;;  %5690 = vmatprep.subr.bf16.mxu1 %v6530_v46  ;;  %v6553_v62 = vld [vmem:[#allocation10 + $0x1b0] sm:$0xff]  }
 0x3e3   : > { %v2560_v20 = vadd.f32 1.0, %v2528_v45  ;;  %v2356_v26 = vmul.f32 %v2340_v11, %v8040_v24  ;;  %v2371_v42 = vadd.f32 0.2548296, %v2355_v23  ;;  %v2309_v16 = vadd.f32 1.4214138, %v2293_v63  ;;  %v8313_v32 = vld [vmem:[#allocation2 + $0xc0] sm:$0xff]  ;;  %5771 = vmatpush3.bf16.msra.mxu0 %v6550_v52 }
 0x3e4   : > { %v8310_v35 = vmul.f32 %v2559_v43, %v8233_v60  ;;  %v2466_v8 = vmul.f32 %v8247_v49, %v2386_v48  ;;  %v2481_v55 = vsub.f32 1.0, %v2465_v47  ;;  %v2310_v10 = vadd.f32 1.4214138, %v2294_v9  ;;  %v6532_v60 = vld [vmem:[#allocation10 + $0x70] sm:$0xff]   ;;  %5772 = vmatprep.subr.bf16.mxu0 %v6551_v34  ;;  %v9498_v9 = vld [vmem:[#allocation37_spill] sm:$0xff]  ;;  %v6534_v43 = vld [vmem:[#allocation10 + $0x78] sm:$0xff]  }
 0x3e5   : > { %v8316_v50 = vmul.f32 %v2560_v20, %v8238_v28  ;;  %v2372_v29 = vadd.f32 0.2548296, %v2356_v26  ;;  %v2387_v0 = vmul.f32 %v2371_v42, %v8034_v15  ;;  %v2934_v27 = vpack.c.bf16 %v8313_v32, %v8307_v37  ;;  %5691 = vmatpush3.bf16.msra.mxu1 %v6531_v2  ;;  %v6533_v46 = vld [vmem:[#allocation10 + $0x30] sm:$0xff]   ;;  %v9499_v12 = vld [vmem:[#allocation54_spill] sm:$0xff]  ;;  %v6555_v20 = vld [vmem:[#allocation10 + $0x1b8] sm:$0xff]  }
 0x3e6   : > { %v2701_v49 = vrot.slane %v8310_v35, 1  ;;  %v2482_v33 = vsub.f32 1.0, %v2466_v8  ;;  %v2513_v3 = vsub.f32 0.0, %v2481_v55  ;;  %v2325_v4 = vmul.f32 %v2309_v16, %v8213_v19  ;;  %5692 = vmatprep.subr.bf16.mxu1 %v6532_v60  ;;  %v9500_v8 = vld [vmem:[#allocation55_spill] sm:$0xff] }
 0x3e7   : > { %v2702_v28 = vrot.slane %v8316_v50, 1  ;;  %v2388_v17 = vmul.f32 %v2372_v29, %v8040_v24  ;;  %v2467_v15 = vmul.f32 %v8267_v1, %v2387_v0  ;;  %3199 = vmatmul.mubr.bf16.gmra.mrb[80].mxu0 %v2934_v27  ;;  %v2938_v31 = vpack.c.bf16 %v8316_v50, %v8310_v35  ;;  %v6535_v29 = vld [vmem:[#allocation10 + $0x38] sm:$0xff]  }
 0x3e8   : > { %2733 = vst [vmem:[#allocation2 + $0x118] sm:$0x7f] %v2701_v49  ;;  %v2514_v63 = vsub.f32 0.0, %v2482_v33  ;;  %v2529_v44 = vsel %vm2497_vm11, %v2481_v55, %v2513_v3  ;;  %v2326_v11 = vmul.f32 %v2310_v10, %v8222_v40  ;;  %v2341_v23 = vadd.f32 -0.28449672, %v2325_v4  ;;  %5773 = vmatpush3.bf16.msra.mxu0 %v6553_v62  ;;  %v9501_v55 = vld [vmem:[#allocation38_spill] sm:$0xff] }
 0x3e9   : > { %2734 = vst [vmem:[#allocation2 + $0x130] sm:$0x7f] %v2702_v28  ;;  %v2546_v24 = vmul.f32 0.5, %v9498_v9  ;;  %v2561_v52 = vadd.f32 1.0, %v2529_v44  ;;  %v2468_v1 = vmul.f32 %v8272_v57, %v2388_v17  ;;  %v2483_v45 = vsub.f32 1.0, %v2467_v15  ;;  %3206 = vmatprep.mubr.bf16.mxu0 %v2938_v31  ;;  %5774 = vmatprep.subr.bf16.mxu0 %v6554_v53  ;;  %v8348_v49 = vld [vmem:[#allocation10 + $0x80] sm:$0xff]  }
 0x3ea   : > { %v2530_v48 = vsel %vm2498_vm12, %v2482_v33, %v2514_v63  ;;  %vm2499_vm13 = vcmp.ge.f32.partialorder %v9499_v12, 0.0  ;;  %v2342_v47 = vadd.f32 -0.28449672, %v2326_v11  ;;  %v2357_v34 = vmul.f32 %v2341_v23, %v8213_v19  ;;  %5693 = vmatpush3.bf16.msra.mxu1 %v6533_v46  ;;  %v9502_v31 = vld [vmem:[#allocation39_spill] sm:$0xff] }
 0x3eb   : > { %v2562_v26 = vadd.f32 1.0, %v2530_v48  ;;  %v8338_v42 = vmul.f32 %v2561_v52, %v8257_v5  ;;  %v2484_v16 = vsub.f32 1.0, %v2468_v1  ;;  %v2515_v57 = vsub.f32 0.0, %v2483_v45  ;;  %5694 = vmatprep.subr.bf16.mxu1 %v6534_v43 }
 0x3ec   : > { %vm2500_vm14 = vcmp.ge.f32.partialorder %v9500_v8, 0.0  ;;  %v2547_v2 = vmul.f32 0.5, %v9501_v55  ;;  %v2358_v18 = vmul.f32 %v2342_v47, %v8222_v40  ;;  %v2373_v10 = vadd.f32 0.2548296, %v2357_v34  ;;  %5775 = vmatpush3.bf16.msra.mxu0 %v6555_v20 }
 0x3ed   : > { %v8343_v0 = vmul.f32 %v2562_v26, %v2546_v24  ;;  %v2703_v27 = vrot.slane %v8338_v42, 1  ;;  %v2516_v60 = vsub.f32 0.0, %v2484_v16  ;;  %v2531_v5 = vsel %vm2499_vm13, %v2483_v45, %v2515_v57  ;;  %v9504_v57 = vld [vmem:[#allocation56_spill] sm:$0xff] }
 0x3ee   : > { %v2563_v33 = vadd.f32 1.0, %v2531_v5  ;;  %v2374_v3 = vadd.f32 0.2548296, %v2358_v18  ;;  %v2389_v4 = vmul.f32 %v2373_v10, %v8213_v19  ;;  %v2653_v62 = vrot.slane %v8310_v35, 7  ;;  %5695 = vmatpush3.bf16.msra.mxu1 %v6535_v29  ;;  %v9505_v18 = vld [vmem:[#allocation57_spill] sm:$0xff] }
 0x3ef   : > { %v8352_v28 = vld [vmem:[#allocation2 + $0x118] sm:$0xff]  ;;  %v2704_v17 = vrot.slane %v8343_v0, 1  ;;  %2735 = vst [vmem:[#allocation2 + $0x148] sm:$0x7f] %v2703_v27  ;;  %v2532_v15 = vsel %vm2500_vm14, %v2484_v16, %v2516_v60  ;;  %v2548_v53 = vmul.f32 0.5, %v9502_v31  ;;  %v2654_v63 = vrot.slane %v8316_v50, 7  ;;  %6020 = vmatprep.subr.bf16.mxu1 %v8348_v49 }
 0x3f0   : > { %v9503_v44 = vmov 0.0|0.0   ;;  %v2906_v11 = vld [vmem:[#allocation2 + $0x130] sm:$0xff]  ;;  %v2564_v23 = vadd.f32 1.0, %v2532_v15  ;;  %v8360_v19 = vmul.f32 %v2563_v33, %v2547_v2  ;;  %v2390_v46 = vmul.f32 %v2374_v3, %v8222_v40  ;;  %2685 = vst [vmem:[#allocation2 + $0x108] sm:$0xfe] %v2653_v62  ;;  %v9507_v33 = vld [vmem:[#allocation44_spill] sm:$0xff] }
 0x3f1   : > { %6143 = vmatprep.subr.bf16.mxu0 %v9503_v44  ;;  %v2469_v9 = vmul.f32 %v8277_v56, %v2389_v4  ;;  %v2939_v24 = vpack.c.bf16 %v2906_v11, %v8352_v28  ;;  %2736 = vst [vmem:[#allocation2 + $0x160] sm:$0x7f] %v2704_v17  ;;  %2686 = vst [vmem:[#allocation2 + $0x120] sm:$0xfe] %v2654_v63  ;;  %v2655_v52 = vrot.slane %v8338_v42, 7  ;;  %v2656_v1 = vrot.slane %v8343_v0, 7 }
 0x3f2   : > { %v2812_v45 = vpack.c.bf16 %v8176_v39, %v8164_v41  ;;  %v2580_v43 = vmul.f32 %v2564_v23, %v2548_v53  ;;  %v2705_v40 = vrot.slane %v8360_v19, 1  ;;  %v2470_v56 = vmul.f32 %v8282_v30, %v2390_v46 }
 0x3f3   : > { %v2485_v48 = vsub.f32 1.0, %v2469_v9  ;;  %6012 = vmatprep.mubr.bf16.mxu1 %v2939_v24  ;;  %2687 = vst [vmem:[#allocation2 + $0x138] sm:$0xfe] %v2655_v52  ;;  %2688 = vst [vmem:[#allocation2 + $0x150] sm:$0xfe] %v2656_v1  ;;  %v2657_v12 = vrot.slane %v8360_v19, 7  ;;  %v8375_v47 = vpack.c.bf16 %v8252_v59, %v8229_v6  ;;  %v2815_v34 = vpack.c.bf16 %v8199_v14, %v8182_v61 }
 0x3f4   : > { %v8381_v20 = vpack.c.bf16 %v8307_v37, %v8254_v21  ;;  %v2706_v26 = vrot.slane %v2580_v43, 1  ;;  %2737 = vst [vmem:[#allocation2 + $0x178] sm:$0x7f] %v2705_v40  ;;  %v2486_v30 = vsub.f32 1.0, %v2470_v56  ;;  %vm2501_vm15 = vcmp.ge.f32.partialorder %v9504_v57, 0.0  ;;  %v9506_v21 = vld [vmem:[#allocation40_spill] sm:$0xff] }
 0x3f5   : > { %v2517_v16 = vsub.f32 0.0, %v2485_v48  ;;  %v2658_v8 = vrot.slane %v2580_v43, 7  ;;  %2689 = vst [vmem:[#allocation2 + $0x168] sm:$0xfe] %v2657_v12  ;;  %v8388_v2 = vpack.c.bf16 %v8338_v42, %v8316_v50  ;;  %vm2502_vm1 = vcmp.ge.f32.partialorder %v9505_v18, 0.0  ;;  %v9511_v61 = vld [vmem:[#allocation24_spill] sm:$0xff] }
 0x3f6   : > { %v8384_v55 = vld [vmem:[#allocation2 + $0x148] sm:$0xff]  ;;  %2738 = vst [vmem:[#allocation2 + $0x190] sm:$0x7f] %v2706_v26  ;;  %v2518_v6 = vsub.f32 0.0, %v2486_v30  ;;  %v2549_v37 = vmul.f32 0.5, %v9506_v21  ;;  %v8396_v27 = vpack.c.bf16 %v8360_v19, %v8343_v0  ;;  %v2550_v3 = vmul.f32 0.5, %v9507_v33 }
 0x3f7   : > { %v2533_v59 = vsel %vm2501_vm15, %v2485_v48, %v2517_v16  ;;  %v8392_v29 = vld [vmem:[#allocation2 + $0x108] sm:$0xff]  ;;  %2690 = vst [vmem:[#allocation2 + $0x180] sm:$0xfe] %v2658_v8  ;;  %v2941_v31 = vpack.c.bf16 %v8343_v0, %v8338_v42  ;;  %v2944_v48 = vpack.c.bf16 %v2580_v43, %v8360_v19 }
 0x3f8   : > { %v2565_v10 = vadd.f32 1.0, %v2533_v59  ;;  %v2912_v60 = vld [vmem:[#allocation2 + $0x160] sm:$0xff]  ;;  %v2534_v5 = vsel %vm2502_vm1, %v2486_v30, %v2518_v6 }
 0x3f9   : > { %v8399_v4 = vld [vmem:[#allocation2 + $0x120] sm:$0xff]  ;;  %v2942_v50 = vpack.c.bf16 %v2912_v60, %v8384_v55  ;;  %v2566_v62 = vadd.f32 1.0, %v2534_v5  ;;  %v3679_v5 = vld [vmem:[#allocation2 + $0x50] sm:$0xff] }
 0x3fa   : > { %v2581_v17 = vmul.f32 %v2565_v10, %v2549_v37  ;;  %v2937_v15 = vpack.c.bf16 %v8399_v4, %v8392_v29  ;;  %v8414_v0 = vld [vmem:[#allocation2 + $0x138] sm:$0xff]  ;;  %v8416_v40 = vld [vmem:[#allocation2 + $0x150] sm:$0xff]  ;;  %v8430_v6 = vld [vmem:[#allocation2] sm:$0xff] }
 0x3fb   : > { %6013 = vmatmul.mubr.bf16.gmra.mrb[56].mxu1 %v2942_v50  ;;  %v2915_v53 = vld [vmem:[#allocation2 + $0x178] sm:$0xff]  ;;  %v8406_v63 = vmul.f32 %v2566_v62, %v2550_v3  ;;  %v2940_v56 = vpack.c.bf16 %v8416_v40, %v8414_v0  ;;  %v2806_v59 = vpack.c.bf16 %v8145_v38, %v8430_v6  ;;  %v2805_v37 = vpack.c.bf16 %v8193_v22, %v8430_v6  ;;  %v6542_v10 = vld [vmem:[#allocation10 + $0x88] sm:$0xff]  }
 0x3fc   : > { %v2707_v11 = vrot.slane %v2581_v17, 1  ;;  %3207 = vmatmul.mubr.bf16.gmra.mrb[84].mxu0 %v2937_v15  ;;  %v2659_v23 = vrot.slane %v2581_v17, 7  ;;  %v8408_v46 = vpack.c.bf16 %v2581_v17, %v2580_v43  ;;  %v8410_v9 = vpack.c.bf16 %v2915_v53, %v2912_v60  ;;  %v8425_v16 = vld [vmem:[#allocation2 + $0x168] sm:$0xff]  ;;  %v3676_v60 = vld [vmem:[#allocation2 + $0x38] sm:$0xff]  ;;  %v3675_v22 = vld [vmem:[#allocation2 + $0x30] sm:$0xff] }
 0x3fd   : > { %3214 = vmatprep.mubr.bf16.mxu0 %v2941_v31  ;;  %v2918_v24 = vld [vmem:[#allocation2 + $0x190] sm:$0xff]  ;;  %v2708_v52 = vrot.slane %v8406_v63, 1  ;;  %v2660_v1 = vrot.slane %v8406_v63, 7  ;;  %v2947_v43 = vpack.c.bf16 %v8406_v63, %v2581_v17  ;;  %v3724_v33 = vpack.c.bf16 %v3679_v5, %v3676_v60  ;;  %v6552_v50 = vld [vmem:[#allocation10 + $0x98] sm:$0xff]   ;;  %v3682_v62 = vld [vmem:[#allocation2 + $0x68] sm:$0xff] }
 0x3fe   : > { %2739 = vst [vmem:[#allocation2 + $0x1a8] sm:$0x7f] %v2707_v11  ;;  %2691 = vst [vmem:[#allocation2 + $0x198] sm:$0xfe] %v2659_v23  ;;  %v2945_v42 = vpack.c.bf16 %v2918_v24, %v2915_v53  ;;  %v8427_v57 = vld [vmem:[#allocation2 + $0x180] sm:$0xff]  ;;  %v6547_v3 = vld [vmem:[#allocation10 + $0x90] sm:$0xff]   ;;  %v3723_v17 = vpack.c.bf16 %v8227_v13, %v3675_v22  ;;  %v3727_v54 = vpack.c.bf16 %v8176_v39, %v3682_v62 }
 0x3ff   : > { %2740 = vst [vmem:[#allocation2 + $0x1c0] sm:$0x7f] %v2708_v52  ;;  %2692 = vst [vmem:[#allocation2 + $0x1b0] sm:$0xfe] %v2660_v1  ;;  %v2943_v19 = vpack.c.bf16 %v8427_v57, %v8425_v16  ;;  %v9509_v13 = vld [vmem:[#allocation22_spill] sm:$0xff]  ;;  %v6558_v39 = vld [vmem:[#allocation10 + $0xb0] sm:$0xff]   ;;  %v2818_v15 = vpack.c.bf16 %v8310_v35, %v8430_v6  ;;  %v2817_v35 = vpack.c.bf16 %v8392_v29, %v8430_v6 }
 0x400   : > { %6016 = vmatprep.mubr.bf16.mxu1 %v2945_v42  ;;  %v9513_v31 = vld [vmem:[#allocation26_spill] sm:$0xff]  ;;  %v2820_v29 = vpack.c.bf16 %v8414_v0, %v8399_v4  ;;  %v9515_v53 = vld [vmem:[#allocation28_spill] sm:$0xff] }
 0x401   : > { %v2765_v11 = vld [vmem:[#allocation2 + $0x40] sm:$0xff]  ;;  %v2768_v23 = vld [vmem:[#allocation2 + $0x58] sm:$0xff]  ;;  %v2774_v52 = vld [vmem:[#allocation2 + $0x88] sm:$0xff] }
 0x402   : > { %v2810_v1 = vpack.c.bf16 %v2768_v23, %v2765_v11  ;;  %v6561_v42 = vld [vmem:[#allocation10 + $0x208] sm:$0xff]  }
 0x404   : > { %3215 = vmatmul.mubr.bf16.gmra.mrb[88].mxu0 %v2940_v56  ;;  %v2777_v56 = vld [vmem:[#allocation2 + $0xa0] sm:$0xff] }
 0x405   : > { %v2921_v12 = vld [vmem:[#allocation2 + $0x1a8] sm:$0xff]  ;;  %3222 = vmatprep.mubr.bf16.mxu0 %v2944_v48  ;;  %v8437_v18 = vld [vmem:[#allocation2 + $0x198] sm:$0xff] }
 0x406   : > { %v8421_v26 = vpack.c.bf16 %v2921_v12, %v2918_v24  ;;  %v8423_v30 = vld [vmem:[#allocation2 + $0x1c0] sm:$0xff]  ;;  %v8439_v21 = vld [vmem:[#allocation2 + $0x1b0] sm:$0xff] }
 0x407   : > { %v2948_v8 = vpack.c.bf16 %v8423_v30, %v2921_v12  ;;  %v2946_v38 = vpack.c.bf16 %v8439_v21, %v8437_v18  ;;  %v2771_v24 = vld [vmem:[#allocation2 + $0x70] sm:$0xff]  ;;  %v3744_v0 = vpack.c.bf16 %v8430_v6, %v8439_v21  ;;  %v6563_v12 = vld [vmem:[#allocation10 + $0x218] sm:$0xff]   ;;  %v3746_v21 = vpack.c.bf16 %v8430_v6, %v8423_v30 }
 0x409   : > { %6017 = vmatmul.mubr.bf16.gmra.mrb[60].mxu1 %v2948_v8  ;;  %v2789_v8 = vld [vmem:[#allocation2 + $0x130] sm:$0xff] }
 0x40a   : > { %3512 = vmatprep.mubr.bf16.mxu1 %v2806_v59  ;;  %v2822_v59 = vpack.c.bf16 %v8384_v55, %v2789_v8  ;;  %v3695_v55 = vld [vmem:[#allocation2 + $0xd0] sm:$0xff] }
 0x40c   : > { %3223 = vmatmul.mubr.bf16.gmra.mrb[92].mxu0 %v2943_v19  ;;  %v6565_v19 = vld [vmem:[#allocation10 + $0x228] sm:$0xff]  }
 0x40d   : > { %3230 = vmatprep.mubr.bf16.mxu0 %v2947_v43  ;;  %v6566_v43 = vld [vmem:[#allocation10 + $0x230] sm:$0xff]  }
 0x411   : > { %3513 = vmatmul.mubr.bf16.vlgmr.msra.gmra.mrb[64].mxu1 %v2805_v37 }
 0x412   : > { %3520 = vmatprep.mubr.bf16.mxu1 %v2809_v25  ;;  %6021 = vmatpush3.bf16.msra.mxu1 %v8348_v49  ;;  %v9508_v25 = vld [vmem:[#allocation21_spill] sm:$0xff]  ;;  %v9510_v49 = vld [vmem:[#allocation23_spill] sm:$0xff] }
 0x413   : > { %6022 = vmatprep.subr.bf16.mxu1 %v6542_v10 }
 0x414   : > { %3231 = vmatmul.mubr.bf16.gmra.mrb[96].mxu0 %v2946_v38 }
 0x415   : > { %3972 = vmatprep.mubr.bf16.mxu0 %v3724_v33 }
 0x416   : > { %6023 = vmatpush3.bf16.msra.mxu1 %v6542_v10 }
 0x417   : > { %6024 = vmatprep.subr.bf16.mxu1 %v6547_v3 }
 0x419   : > { %3521 = vmatmul.mubr.bf16.gmra.mrb[68].mxu1 %v2808_v58  ;;  %v3688_v58 = vld [vmem:[#allocation2 + $0x98] sm:$0xff] }
 0x41a   : > { %3528 = vmatprep.mubr.bf16.mxu1 %v2812_v45  ;;  %6025 = vmatpush3.bf16.msra.mxu1 %v6547_v3  ;;  %v3730_v41 = vpack.c.bf16 %v8199_v14, %v3688_v58  ;;  %v6559_v45 = vld [vmem:[#allocation10 + $0xb8] sm:$0xff]   ;;  %v3733_v14 = vpack.c.bf16 %v8430_v6, %v8203_v7  ;;  %v3732_v7 = vpack.c.bf16 %v8430_v6, %v8313_v32 }
 0x41b   : > { %6026 = vmatprep.subr.bf16.mxu1 %v6552_v50  ;;  %v2823_v32 = vpack.c.bf16 %v8425_v16, %v8416_v40  ;;  %v6562_v40 = vld [vmem:[#allocation10 + $0x210] sm:$0xff]   ;;  %v2819_v16 = vpack.c.bf16 %v8352_v28, %v8430_v6  ;;  %v6567_v28 = vld [vmem:[#allocation10 + $0x238] sm:$0xff]  }
 0x41c   : > { %3973 = vmatmul.mubr.bf16.vlgmr.msra.gmra.mrb[100].mxu0 %v3723_v17 }
 0x41d   : > { %3980 = vmatprep.mubr.bf16.mxu0 %v3727_v54  ;;  %6145 = vmatpush3.bf16.msra.mxu0 %v9508_v25 }
 0x41e   : > { %6146 = vmatprep.subr.bf16.mxu0 %v9503_v44  ;;  %6027 = vmatpush3.bf16.msra.mxu1 %v6552_v50 }
 0x41f   : > { %6028 = vmatprep.subr.bf16.mxu1 %v6556_v36 }
 0x421   : > { %6148 = vmatpush3.bf16.msra.mxu0 %v9509_v13  ;;  %3529 = vmatmul.mubr.bf16.gmra.mrb[72].mxu1 %v8375_v47 }
 0x422   : > { %6149 = vmatprep.subr.bf16.mxu0 %v9503_v44  ;;  %3536 = vmatprep.mubr.bf16.mxu1 %v2815_v34  ;;  %v9512_v34 = vld [vmem:[#allocation25_spill] sm:$0xff] }
 0x423   : > { %6029 = vmatpush3.bf16.msra.mxu1 %v6556_v36 }
 0x424   : > { %3981 = vmatmul.mubr.bf16.gmra.mrb[104].mxu0 %v8375_v47  ;;  %6030 = vmatprep.subr.bf16.mxu1 %v6557_v51  ;;  %v6560_v47 = vld [vmem:[#allocation10 + $0x200] sm:$0xff]  }
 0x425   : > { %3988 = vmatprep.mubr.bf16.mxu0 %v3730_v41  ;;  %6151 = vmatpush3.bf16.msra.mxu0 %v9510_v49 }
 0x426   : > { %6152 = vmatprep.subr.bf16.mxu0 %v9503_v44 }
 0x427   : > { %6031 = vmatpush3.bf16.msra.mxu1 %v6557_v51 }
 0x428   : > { %6032 = vmatprep.subr.bf16.mxu1 %v6558_v39 }
 0x429   : > { %6154 = vmatpush3.bf16.msra.mxu0 %v9511_v61  ;;  %3537 = vmatmul.mubr.bf16.gmra.mrb[76].mxu1 %v8381_v20 }
 0x42a   : > { %6155 = vmatprep.subr.bf16.mxu0 %v9503_v44  ;;  %3544 = vmatprep.mubr.bf16.mxu1 %v2818_v15 }
 0x42b   : > { %6033 = vmatpush3.bf16.msra.mxu1 %v6558_v39 }
 0x42c   : > { %3989 = vmatmul.mubr.bf16.gmra.mrb[108].mxu0 %v8381_v20  ;;  %6034 = vmatprep.subr.bf16.mxu1 %v6559_v45  ;;  %v9514_v20 = vld [vmem:[#allocation27_spill] sm:$0xff] }
 0x42d   : > { %3996 = vmatprep.mubr.bf16.mxu0 %v3733_v14  ;;  %6157 = vmatpush3.bf16.msra.mxu0 %v9512_v34 }
 0x42e   : > { %6158 = vmatprep.subr.bf16.mxu0 %v9503_v44 }
 0x42f   : > { %6035 = vmatpush3.bf16.msra.mxu1 %v6559_v45 }
 0x430   : > { %6052 = vmatprep.subr.bf16.mxu1 %v6560_v47 }
 0x431   : > { %6160 = vmatpush3.bf16.msra.mxu0 %v9513_v31  ;;  %3545 = vmatmul.mubr.bf16.gmra.mrb[80].mxu1 %v2817_v35 }
 0x432   : > { %6161 = vmatprep.subr.bf16.mxu0 %v9503_v44  ;;  %3552 = vmatprep.mubr.bf16.mxu1 %v8388_v2 }
 0x434   : > { %3997 = vmatmul.mubr.bf16.gmra.mrb[112].mxu0 %v3732_v7 }
 0x435   : > { %4004 = vmatprep.mubr.bf16.mxu0 %v8388_v2  ;;  %6163 = vmatpush3.bf16.msra.mxu0 %v9514_v20  ;;  %v2826_v2 = vpack.c.bf16 %v8437_v18, %v8427_v57  ;;  %v6564_v57 = vld [vmem:[#allocation10 + $0x220] sm:$0xff]   ;;  %v3734_v18 = vpack.c.bf16 %v8430_v6, %v3695_v55 }
 0x436   : > { %6164 = vmatprep.subr.bf16.mxu0 %v9503_v44  ;;  %v2762_v44 = vld [vmem:[#allocation2 + $0x28] sm:$0xff] }
 0x437   : > { %v2807_v4 = vpack.c.bf16 %v2762_v44, %v8430_v6 }
 0x439   : > { %6166 = vmatpush3.bf16.msra.mxu0 %v9515_v53  ;;  %3553 = vmatmul.mubr.bf16.gmra.mrb[84].mxu1 %v2820_v29 }
 0x43a   : > { %3560 = vmatprep.mubr.bf16.mxu1 %v8396_v27 }
 0x43c   : > { %4005 = vmatmul.mubr.bf16.gmra.mrb[116].mxu0 %v2820_v29 }
 0x43d   : > { %4012 = vmatprep.mubr.bf16.mxu0 %v8396_v27  ;;  %v3745_v27 = vpack.c.bf16 %v8430_v6, %v8406_v63  ;;  %v2780_v63 = vld [vmem:[#allocation2 + $0xb8] sm:$0xff] }
 0x43e   : > { %v2816_v48 = vpack.c.bf16 %v2780_v63, %v2777_v56 }
 0x441   : > { %3561 = vmatmul.mubr.bf16.gmra.mrb[88].mxu1 %v2823_v32 }
 0x442   : > { %3568 = vmatprep.mubr.bf16.mxu1 %v8408_v46 }
 0x444   : > { %4013 = vmatmul.mubr.bf16.gmra.mrb[120].mxu0 %v2823_v32 }
 0x445   : > { %4020 = vmatprep.mubr.bf16.mxu0 %v8408_v46  ;;  %v2813_v46 = vpack.c.bf16 %v2774_v52, %v2771_v24 }
 0x449   : > { %3569 = vmatmul.mubr.bf16.gmra.mrb[92].mxu1 %v2826_v2 }
 0x44a   : > { %6036 = vmatprep.mubr.bf16.mxu1 %v2807_v4 }
 0x44c   : > { %4021 = vmatmul.mubr.bf16.gmra.mrb[124].mxu0 %v2826_v2 }
 0x44d   : > { %4028 = vmatprep.mubr.bf16.mxu0 %v3745_v27 }
 0x451   : > { %6037 = vmatmul.mubr.bf16.vlgmr.msra.gmra.mrb[48].mxu1 %v2810_v1 }
 0x452   : > { %6040 = vmatprep.mubr.bf16.mxu1 %v2813_v46  ;;  %6053 = vmatpush3.bf16.msra.mxu1 %v6560_v47 }
 0x453   : > { %6054 = vmatprep.subr.bf16.mxu1 %v6561_v42 }
 0x454   : > { %4029 = vmatmul.mubr.bf16.gmra.mrb[128].mxu0 %v3744_v0 }
 0x455   : > { %6116 = vmatprep.mubr.msk.f32.mxu0 %vm6938_vm0, %v8430_v6 }
 0x456   : > { %6055 = vmatpush3.bf16.msra.mxu1 %v6561_v42 }
 0x457   : > { %6056 = vmatprep.subr.bf16.mxu1 %v6562_v40 }
 0x459   : > { %6041 = vmatmul.mubr.bf16.gmra.mrb[52].mxu1 %v2816_v48 }
 0x45a   : > { %6044 = vmatprep.mubr.bf16.mxu1 %v2819_v16  ;;  %6057 = vmatpush3.bf16.msra.mxu1 %v6562_v40 }
 0x45b   : > { %6058 = vmatprep.subr.bf16.mxu1 %v6563_v12 }
 0x45e   : > { %6059 = vmatpush3.bf16.msra.mxu1 %v6563_v12 }
 0x45f   : > { %6060 = vmatprep.subr.bf16.mxu1 %v6564_v57 }
 0x461   : > { %6045 = vmatmul.mubr.bf16.gmra.mrb[56].mxu1 %v2822_v59 }
 0x462   : > { %6048 = vmatprep.mubr.bf16.mxu1 %v8410_v9  ;;  %6061 = vmatpush3.bf16.msra.mxu1 %v6564_v57 }
 0x463   : > { %6062 = vmatprep.subr.bf16.mxu1 %v6565_v19 }
 0x466   : > { %6063 = vmatpush3.bf16.msra.mxu1 %v6565_v19 }
 0x467   : > { %6064 = vmatprep.subr.bf16.mxu1 %v6566_v43 }
 0x469   : > { %6049 = vmatmul.mubr.bf16.gmra.mrb[60].mxu1 %v8421_v26 }
 0x46a   : > { %6065 = vmatpush3.bf16.msra.mxu1 %v6566_v43  ;;  %6068 = vmatprep.mubr.bf16.mxu1 %v2810_v1 }
 0x46b   : > { %6066 = vmatprep.subr.bf16.mxu1 %v6567_v28 }
 0x46e   : > { %6067 = vmatpush3.bf16.msra.mxu1 %v6567_v28 }
 0x471   : > { %6069 = vmatmul.mubr.bf16.vlgmr.msra.gmra.mrb[48].mxu1 %v2813_v46 }
 0x472   : > { %6072 = vmatprep.mubr.bf16.mxu1 %v2816_v48 }
 0x479   : > { %6073 = vmatmul.mubr.bf16.gmra.mrb[52].mxu1 %v3734_v18 }
 0x47a   : > { %6076 = vmatprep.mubr.bf16.mxu1 %v2822_v59 }
 0x481   : > { %6077 = vmatmul.mubr.bf16.gmra.mrb[56].mxu1 %v8410_v9 }
 0x482   : > { %6080 = vmatprep.mubr.bf16.mxu1 %v8421_v26 }
 0x489   : > { %6081 = vmatmul.mubr.bf16.gmra.mrb[60].mxu1 %v3746_v21 }
 0x4a1   : > { %v5616_v37 = vpop.f32.mrb[68].mxu0 }
 0x4a2   : > { %v5617_v10 = vpop.f32.mrb[69].mxu0 }
 0x4a3   : > { %v5618_v60 = vadd.f32 %v5617_v10, %v5616_v37  ;;  %v5619_v5 = vpop.f32.mrb[70].mxu0 }
 0x4a4   : > { %v5620_v38 = vpop.f32.mrb[71].mxu0 }
 0x4a5   : > { %v5621_v33 = vadd.f32 %v5620_v38, %v5619_v5 }
 0x4a9   : > { %v5622_v3 = vpop.f32.mrb[72].mxu0 }
 0x4aa   : > { %v5623_v22 = vpop.f32.mrb[73].mxu0 }
 0x4ab   : > { %v5624_v50 = vadd.f32 %v5623_v22, %v5622_v3  ;;  %v5625_v62 = vpop.f32.mrb[74].mxu0 }
 0x4ac   : > { %v5626_v17 = vpop.f32.mrb[75].mxu0 }
 0x4ad   : > { %v5627_v54 = vadd.f32 %v5626_v17, %v5625_v62 }
 0x4b1   : > { %v5628_v36 = vpop.f32.mrb[76].mxu0 }
 0x4b2   : > { %v5629_v9 = vpop.f32.mrb[77].mxu0 }
 0x4b3   : > { %v8517_v25 = vadd.f32 %v5629_v9, %v5628_v36  ;;  %v5631_v26 = vpop.f32.mrb[78].mxu0 }
 0x4b4   : > { %v5632_v51 = vpop.f32.mrb[79].mxu0 }
 0x4b5   : > { %v8519_v30 = vadd.f32 %v5632_v51, %v5631_v26 }
 0x4ba   : > { %v5634_v6 = vpop.f32.mrb[80].mxu0 }
 0x4bb   : > { %v5635_v58 = vpop.f32.mrb[81].mxu0 }
 0x4bc   : > { %v8521_v13 = vadd.f32 %v5635_v58, %v5634_v6  ;;  %v5637_v41 = vpop.f32.mrb[82].mxu0 }
 0x4bd   : > { %v5638_v39 = vpop.f32.mrb[83].mxu0 }
 0x4be   : > { %v8523_v49 = vadd.f32 %v5638_v39, %v5637_v41 }
 0x4cf   : > { %v5640_v45 = vpop.f32.mrb[84].mxu0 }
 0x4d0   : > { %v5641_v15 = vpop.f32.mrb[85].mxu0 }
 0x4d1   : > { %v8525_v61 = vadd.f32 %v5641_v15, %v5640_v45  ;;  %v5643_v14 = vpop.f32.mrb[86].mxu0 }
 0x4d2   : > { %v5644_v47 = vpop.f32.mrb[87].mxu0 }
 0x4d3   : > { %v8527_v34 = vadd.f32 %v5644_v47, %v5643_v14 }
 0x4d7   : > { %v5646_v35 = vpop.f32.mrb[88].mxu0 }
 0x4d8   : > { %v5647_v31 = vpop.f32.mrb[89].mxu0 }
 0x4d9   : > { %v8529_v7 = vadd.f32 %v5647_v31, %v5646_v35  ;;  %v5649_v20 = vpop.f32.mrb[90].mxu0 }
 0x4da   : > { %v5650_v29 = vpop.f32.mrb[91].mxu0 }
 0x4db   : > { %v8531_v53 = vadd.f32 %v5650_v29, %v5649_v20 }
 0x4df   : > { %v5652_v32 = vpop.f32.mrb[92].mxu0 }
 0x4e0   : > { %v5653_v44 = vpop.f32.mrb[93].mxu0 }
 0x4e1   : > { %v8533_v2 = vadd.f32 %v5653_v44, %v5652_v32  ;;  %v5655_v4 = vpop.f32.mrb[94].mxu0 }
 0x4e2   : > { %v5656_v27 = vpop.f32.mrb[95].mxu0 }
 0x4e3   : > { %v8535_v11 = vadd.f32 %v5656_v27, %v5655_v4 }
 0x4e4   : > { %v5696_v23 = vpop.f32.mrb[64].mxu1 }
 0x4e5   : > { %v5697_v24 = vpop.f32.mrb[65].mxu1 }
 0x4e6   : > { %v5698_v52 = vadd.f32 %v5697_v24, %v5696_v23  ;;  %v5699_v1 = vpop.f32.mrb[66].mxu1 }
 0x4e7   : > { %v5658_v42 = vpop.f32.mrb[96].mxu0  ;;  %v5700_v46 = vpop.f32.mrb[67].mxu1 }
 0x4e8   : > { %v5659_v0 = vpop.f32.mrb[97].mxu0  ;;  %v6218_v40 = vadd.f32 %v5698_v52, %v5618_v60  ;;  %v5701_v56 = vadd.f32 %v5700_v46, %v5699_v1 }
 0x4e9   : > { %v8537_v63 = vadd.f32 %v5659_v0, %v5658_v42  ;;  %v5661_v48 = vpop.f32.mrb[98].mxu0 }
 0x4ea   : > { %v5662_v12 = vpop.f32.mrb[99].mxu0  ;;  %v6224_v16 = vadd.f32 %v5701_v56, %v5621_v33 }
 0x4eb   : > { %v8539_v57 = vadd.f32 %v5662_v12, %v5661_v48 }
 0x4ec   : > { %v5702_v8 = vpop.f32.mrb[68].mxu1 }
 0x4ed   : > { %v5703_v59 = vpop.f32.mrb[69].mxu1 }
 0x4ee   : > { %v5704_v19 = vadd.f32 %v5703_v59, %v5702_v8  ;;  %v5705_v43 = vpop.f32.mrb[70].mxu1 }
 0x4ef   : > { %v5776_v28 = vpop.f32.mrb[100].mxu0  ;;  %v5706_v55 = vpop.f32.mrb[71].mxu1 }
 0x4f0   : > { %v5777_v18 = vpop.f32.mrb[101].mxu0  ;;  %v6215_v21 = vadd.f32 %v5704_v19, %v5624_v50  ;;  %v5707_v37 = vadd.f32 %v5706_v55, %v5705_v43 }
 0x4f1   : > { %v5778_v10 = vadd.f32 %v5777_v18, %v5776_v28  ;;  %v5779_v5 = vpop.f32.mrb[102].mxu0 }
 0x4f2   : > { %v5780_v60 = vpop.f32.mrb[103].mxu0  ;;  %v6221_v38 = vadd.f32 %v5707_v37, %v5627_v54 }
 0x4f3   : > { %v5781_v3 = vadd.f32 %v5780_v60, %v5779_v5  ;;  %v8541_v22 = vadd.f32 %v6218_v40, %v5778_v10 }
 0x4f4   : > { %v5708_v62 = vpop.f32.mrb[72].mxu1 }
 0x4f5   : > { %v8543_v33 = vadd.f32 %v6224_v16, %v5781_v3  ;;  %v5709_v17 = vpop.f32.mrb[73].mxu1 }
 0x4f6   : > { %v5710_v36 = vadd.f32 %v5709_v17, %v5708_v62  ;;  %v5711_v9 = vpop.f32.mrb[74].mxu1 }
 0x4f7   : > { %v5782_v26 = vpop.f32.mrb[104].mxu0  ;;  %v5712_v51 = vpop.f32.mrb[75].mxu1 }
 0x4f8   : > { %v5783_v6 = vpop.f32.mrb[105].mxu0  ;;  %v6230_v58 = vadd.f32 %v5710_v36, %v8517_v25  ;;  %v5713_v50 = vadd.f32 %v5712_v51, %v5711_v9 }
 0x4f9   : > { %v5784_v41 = vadd.f32 %v5783_v6, %v5782_v26  ;;  %v5785_v39 = vpop.f32.mrb[106].mxu0 }
 0x4fa   : > { %v5786_v45 = vpop.f32.mrb[107].mxu0  ;;  %v6236_v54 = vadd.f32 %v5713_v50, %v8519_v30 }
 0x4fb   : > { %v5787_v15 = vadd.f32 %v5786_v45, %v5785_v39  ;;  %v8547_v14 = vadd.f32 %v6215_v21, %v5784_v41 }
 0x4fc   : > { %v5714_v47 = vpop.f32.mrb[76].mxu1 }
 0x4fd   : > { %v8549_v35 = vadd.f32 %v6221_v38, %v5787_v15  ;;  %v5715_v31 = vpop.f32.mrb[77].mxu1 }
 0x4fe   : > { %v5716_v20 = vadd.f32 %v5715_v31, %v5714_v47  ;;  %v5717_v29 = vpop.f32.mrb[78].mxu1 }
 0x4ff   : > { %v5788_v32 = vpop.f32.mrb[108].mxu0  ;;  %v5718_v44 = vpop.f32.mrb[79].mxu1 }
 0x500   : > { %v5789_v4 = vpop.f32.mrb[109].mxu0  ;;  %v6227_v25 = vadd.f32 %v5716_v20, %v8521_v13  ;;  %v5719_v27 = vadd.f32 %v5718_v44, %v5717_v29 }
 0x501   : > { %v5790_v23 = vadd.f32 %v5789_v4, %v5788_v32  ;;  %v5791_v24 = vpop.f32.mrb[110].mxu0 }
 0x502   : > { %v5792_v52 = vpop.f32.mrb[111].mxu0  ;;  %v6233_v30 = vadd.f32 %v5719_v27, %v8523_v49 }
 0x503   : > { %v5793_v1 = vadd.f32 %v5792_v52, %v5791_v24  ;;  %v8553_v42 = vadd.f32 %v6230_v58, %v5790_v23 }
 0x504   : > { %v5720_v46 = vpop.f32.mrb[80].mxu1 }
 0x505   : > { %v8555_v0 = vadd.f32 %v6236_v54, %v5793_v1  ;;  %v5721_v40 = vpop.f32.mrb[81].mxu1 }
 0x506   : > { %v5722_v56 = vadd.f32 %v5721_v40, %v5720_v46  ;;  %v5723_v48 = vpop.f32.mrb[82].mxu1 }
 0x507   : > { %v5794_v12 = vpop.f32.mrb[112].mxu0  ;;  %v5724_v16 = vpop.f32.mrb[83].mxu1 }
 0x508   : > { %v5795_v8 = vpop.f32.mrb[113].mxu0  ;;  %v6242_v13 = vadd.f32 %v5722_v56, %v8525_v61  ;;  %v5725_v59 = vadd.f32 %v5724_v16, %v5723_v48 }
 0x509   : > { %v5796_v19 = vadd.f32 %v5795_v8, %v5794_v12  ;;  %v5797_v43 = vpop.f32.mrb[114].mxu0 }
 0x50a   : > { %v5798_v28 = vpop.f32.mrb[115].mxu0  ;;  %v6248_v49 = vadd.f32 %v5725_v59, %v8527_v34 }
 0x50b   : > { %v5799_v55 = vadd.f32 %v5798_v28, %v5797_v43  ;;  %v8559_v18 = vadd.f32 %v6227_v25, %v5796_v19 }
 0x50c   : > { %v5726_v21 = vpop.f32.mrb[84].mxu1 }
 0x50d   : > { %v8561_v37 = vadd.f32 %v6233_v30, %v5799_v55  ;;  %v5727_v10 = vpop.f32.mrb[85].mxu1 }
 0x50e   : > { %v5728_v5 = vadd.f32 %v5727_v10, %v5726_v21  ;;  %v5729_v60 = vpop.f32.mrb[86].mxu1 }
 0x50f   : > { %v5800_v38 = vpop.f32.mrb[116].mxu0  ;;  %v5730_v3 = vpop.f32.mrb[87].mxu1 }
 0x510   : > { %v5801_v62 = vpop.f32.mrb[117].mxu0  ;;  %v6239_v61 = vadd.f32 %v5728_v5, %v8529_v7  ;;  %v5731_v17 = vadd.f32 %v5730_v3, %v5729_v60 }
 0x511   : > { %v5802_v36 = vadd.f32 %v5801_v62, %v5800_v38  ;;  %v5803_v9 = vpop.f32.mrb[118].mxu0 }
 0x512   : > { %v5804_v26 = vpop.f32.mrb[119].mxu0  ;;  %v6245_v34 = vadd.f32 %v5731_v17, %v8531_v53 }
 0x513   : > { %v5805_v51 = vadd.f32 %v5804_v26, %v5803_v9  ;;  %v8565_v6 = vadd.f32 %v6242_v13, %v5802_v36 }
 0x514   : > { %v5732_v58 = vpop.f32.mrb[88].mxu1 }
 0x515   : > { %v8567_v50 = vadd.f32 %v6248_v49, %v5805_v51  ;;  %v5733_v41 = vpop.f32.mrb[89].mxu1 }
 0x516   : > { %v5734_v39 = vadd.f32 %v5733_v41, %v5732_v58  ;;  %v5735_v45 = vpop.f32.mrb[90].mxu1 }
 0x517   : > { %v5806_v54 = vpop.f32.mrb[120].mxu0  ;;  %v5736_v15 = vpop.f32.mrb[91].mxu1 }
 0x518   : > { %v5807_v47 = vpop.f32.mrb[121].mxu0  ;;  %v6254_v7 = vadd.f32 %v5734_v39, %v8533_v2  ;;  %v5737_v31 = vadd.f32 %v5736_v15, %v5735_v45 }
 0x519   : > { %v5808_v20 = vadd.f32 %v5807_v47, %v5806_v54  ;;  %v5809_v29 = vpop.f32.mrb[122].mxu0 }
 0x51a   : > { %v5810_v32 = vpop.f32.mrb[123].mxu0  ;;  %v6260_v53 = vadd.f32 %v5737_v31, %v8535_v11 }
 0x51b   : > { %v5811_v44 = vadd.f32 %v5810_v32, %v5809_v29  ;;  %v6240_v4 = vadd.f32 %v6239_v61, %v5808_v20 }
 0x51c   : > { %v5738_v25 = vpop.f32.mrb[92].mxu1 }
 0x51d   : > { %v8571_v27 = vadd.f32 %v6245_v34, %v5811_v44  ;;  %v5739_v23 = vpop.f32.mrb[93].mxu1 }
 0x51e   : > { %v5740_v24 = vadd.f32 %v5739_v23, %v5738_v25  ;;  %v5741_v52 = vpop.f32.mrb[94].mxu1 }
 0x51f   : > { %v5812_v30 = vpop.f32.mrb[124].mxu0  ;;  %v5742_v1 = vpop.f32.mrb[95].mxu1 }
 0x520   : > { %v5813_v46 = vpop.f32.mrb[125].mxu0  ;;  %v6251_v40 = vadd.f32 %v5740_v24, %v8537_v63  ;;  %v5743_v2 = vadd.f32 %v5742_v1, %v5741_v52 }
 0x521   : > { %v5814_v56 = vadd.f32 %v5813_v46, %v5812_v30  ;;  %v5815_v48 = vpop.f32.mrb[126].mxu0 }
 0x522   : > { %v5816_v12 = vpop.f32.mrb[127].mxu0  ;;  %v6257_v16 = vadd.f32 %v5743_v2, %v8539_v57 }
 0x523   : > { %v5817_v11 = vadd.f32 %v5816_v12, %v5815_v48  ;;  %v8575_v8 = vadd.f32 %v6254_v7, %v5814_v56 }
 0x525   : > { %v8577_v13 = vadd.f32 %v6260_v53, %v5817_v11 }
 0x527   : > { %v5818_v59 = vpop.f32.mrb[128].mxu0 }
 0x528   : > { %v5819_v19 = vpop.f32.mrb[129].mxu0 }
 0x529   : > { %v5820_v43 = vadd.f32 %v5819_v19, %v5818_v59  ;;  %v5821_v28 = vpop.f32.mrb[130].mxu0 }
 0x52a   : > { %v5822_v49 = vpop.f32.mrb[131].mxu0 }
 0x52b   : > { %v5823_v55 = vadd.f32 %v5822_v49, %v5821_v28  ;;  %v6252_v21 = vadd.f32 %v6251_v40, %v5820_v43 }
 0x52d   : > { %v8579_v10 = vadd.f32 %v6257_v16, %v5823_v55 }
 0x544   : > { %v6070_v63 = vpop.f32.mrb[48].mxu1 }
 0x545   : > { %v8582_v5 = vadd.f32 %v8547_v14, %v6070_v63  ;;  %v4071_v60 = vpop.f32.mrb[49].mxu1 }
 0x546   : > { %v8585_v57 = vadd.f32 %v8541_v22, %v4071_v60  ;;  %v6071_v38 = vpop.f32.mrb[50].mxu1 }
 0x547   : > { %v8588_v3 = vadd.f32 %v8549_v35, %v6071_v38  ;;  %v4074_v62 = vpop.f32.mrb[51].mxu1  ;;  %v4168_v22 = vmul.f32 %v8582_v5, %v8582_v5 }
 0x548   : > { %v8591_v61 = vadd.f32 %v8543_v33, %v4074_v62  ;;  %v4166_v17 = vmul.f32 %v8585_v57, %v8585_v57 }
 0x549   : > { %v4169_v51 = vmul.f32 %v8588_v3, %v8588_v3 }
 0x54a   : > { %v4152_v36 = vadd.f32 %v8591_v61, %v8585_v57  ;;  %v4167_v14 = vmul.f32 %v8591_v61, %v8591_v61 }
 0x54c   : > { %v4153_v9 = vadd.f32 %v8582_v5, %v4152_v36  ;;  %v4174_v35 = vadd.f32 %v4167_v14, %v4166_v17  ;;  %v6074_v26 = vpop.f32.mrb[52].mxu1 }
 0x54d   : > { %v8603_v34 = vadd.f32 %v8559_v18, %v6074_v26  ;;  %v4087_v33 = vpop.f32.mrb[53].mxu1 }
 0x54e   : > { %v4175_v58 = vadd.f32 %v4174_v35, %v4168_v22  ;;  %v8608_v41 = vadd.f32 %v8553_v42, %v4087_v33  ;;  %v4154_v39 = vadd.f32 %v8588_v3, %v4153_v9  ;;  %v6075_v45 = vpop.f32.mrb[54].mxu1 }
 0x54f   : > { %v8612_v54 = vadd.f32 %v8561_v37, %v6075_v45  ;;  %v4090_v15 = vpop.f32.mrb[55].mxu1  ;;  %v4172_v37 = vmul.f32 %v8603_v34, %v8603_v34 }
 0x550   : > { %v4155_v47 = vadd.f32 %v8608_v41, %v4154_v39  ;;  %v4170_v18 = vmul.f32 %v8608_v41, %v8608_v41  ;;  %v4176_v7 = vadd.f32 %v4175_v58, %v4169_v51  ;;  %v8618_v31 = vadd.f32 %v8555_v0, %v4090_v15 }
 0x551   : > { %v4173_v0 = vmul.f32 %v8612_v54, %v8612_v54 }
 0x552   : > { %v4177_v20 = vadd.f32 %v4176_v7, %v4170_v18  ;;  %v4156_v42 = vadd.f32 %v8618_v31, %v4155_v47  ;;  %v4171_v29 = vmul.f32 %v8618_v31, %v8618_v31 }
 0x554   : > { %v4157_v32 = vadd.f32 %v8603_v34, %v4156_v42  ;;  %v4178_v53 = vadd.f32 %v4177_v20, %v4171_v29  ;;  %v6078_v44 = vpop.f32.mrb[56].mxu1 }
 0x555   : > { %v8626_v25 = vadd.f32 %v6240_v4, %v6078_v44  ;;  %v4103_v23 = vpop.f32.mrb[57].mxu1 }
 0x556   : > { %v4158_v24 = vadd.f32 %v8612_v54, %v4157_v32  ;;  %v4179_v52 = vadd.f32 %v4178_v53, %v4172_v37  ;;  %v8632_v30 = vadd.f32 %v8565_v6, %v4103_v23  ;;  %v6079_v1 = vpop.f32.mrb[58].mxu1 }
 0x557   : > { %v8635_v46 = vadd.f32 %v8571_v27, %v6079_v1  ;;  %v4106_v40 = vpop.f32.mrb[59].mxu1  ;;  %v4204_v27 = vmul.f32 %v8626_v25, %v8626_v25 }
 0x558   : > { %v4159_v2 = vrot.slane %v4158_v24, 4  ;;  %v4180_v56 = vadd.f32 %v4179_v52, %v4173_v0  ;;  %v8638_v4 = vadd.f32 %v8567_v50, %v4106_v40  ;;  %v4202_v48 = vmul.f32 %v8632_v30, %v8632_v30 }
 0x559   : > { %v4205_v49 = vmul.f32 %v8635_v46, %v8635_v46 }
 0x55a   : > { %v4160_v12 = vadd.f32 %v4159_v2, %v4158_v24  ;;  %v4181_v16 = vrot.slane %v4180_v56, 4  ;;  %v4188_v11 = vadd.f32 %v8638_v4, %v8632_v30  ;;  %v4203_v6 = vmul.f32 %v8638_v4, %v8638_v4 }
 0x55c   : > { %v4161_v59 = vrot.slane %v4160_v12, 2  ;;  %v4182_v19 = vadd.f32 %v4181_v16, %v4180_v56  ;;  %v4189_v43 = vadd.f32 %v8626_v25, %v4188_v11  ;;  %v4210_v50 = vadd.f32 %v4203_v6, %v4202_v48  ;;  %v6082_v28 = vpop.f32.mrb[60].mxu1 }
 0x55d   : > { %v8651_v55 = vadd.f32 %v6252_v21, %v6082_v28  ;;  %v4119_v63 = vpop.f32.mrb[61].mxu1 }
 0x55e   : > { %v4162_v60 = vadd.f32 %v4161_v59, %v4160_v12  ;;  %v4183_v38 = vrot.slane %v4182_v19, 2  ;;  %v4211_v62 = vadd.f32 %v4210_v50, %v4204_v27  ;;  %v8654_v17 = vadd.f32 %v8575_v8, %v4119_v63  ;;  %v6083_v36 = vpop.f32.mrb[62].mxu1  ;;  %v9516_v63 = vld [vmem:[#allocation29_spill] sm:$0xff] }
 0x55f   : > { %v4190_v14 = vadd.f32 %v8635_v46, %v4189_v43  ;;  %v8658_v22 = vadd.f32 %v8579_v10, %v6083_v36  ;;  %v4122_v9 = vpop.f32.mrb[63].mxu1  ;;  %v4208_v18 = vmul.f32 %v8651_v55, %v8651_v55  ;;  %v5331_v43 = vld [vmem:[%s9304_s7] ss:$0 sm:$0xff] }
 0x560   : > { %v4163_v35 = vrot.slane %v4162_v60, 1  ;;  %v4184_v26 = vadd.f32 %v4183_v38, %v4182_v19  ;;  %v4206_v21 = vmul.f32 %v8654_v17, %v8654_v17  ;;  %v4212_v33 = vadd.f32 %v4211_v62, %v4205_v49  ;;  %v5332_v38 = vld [vmem:[%s9305_s8] ss:$0 sm:$0xff] }
 0x561   : > { %v4191_v51 = vadd.f32 %v8654_v17, %v4190_v14  ;;  %v8664_v58 = vadd.f32 %v8577_v13, %v4122_v9  ;;  %v4209_v13 = vmul.f32 %v8658_v22, %v8658_v22 }
 0x562   : > { %v4164_v8 = vadd.f32 %v4163_v35, %v4162_v60  ;;  %v4185_v39 = vrot.slane %v4184_v26, 1  ;;  %v4213_v45 = vadd.f32 %v4212_v33, %v4206_v21 }
 0x563   : > { %v4192_v15 = vadd.f32 %v8664_v58, %v4191_v51  ;;  %v4207_v10 = vmul.f32 %v8664_v58, %v8664_v58  ;;  %v9517_v51 = vld [vmem:[#allocation30_spill] sm:$0xff] }
 0x564   : > { %4165 = vst [vmem:[#allocation3] sm:$0x1] %v4164_v8  ;;  %v4186_v47 = vadd.f32 %v4185_v39, %v4184_v26 }
 0x565   : > { %v4193_v7 = vadd.f32 %v8651_v55, %v4192_v15  ;;  %v4214_v20 = vadd.f32 %v4213_v45, %v4207_v10 }
 0x566   : > { %4187 = vst [vmem:[#allocation3 + $0x2] sm:$0x1] %v4186_v47 }
 0x567   : > { %v4194_v42 = vadd.f32 %v8658_v22, %v4193_v7  ;;  %v4215_v29 = vadd.f32 %v4214_v20, %v4208_v18 }
 0x569   : > { %v4195_v37 = vrot.slane %v4194_v42, 4  ;;  %v4216_v32 = vadd.f32 %v4215_v29, %v4209_v13 }
 0x56b   : > { %v4196_v53 = vadd.f32 %v4195_v37, %v4194_v42  ;;  %v4217_v44 = vrot.slane %v4216_v32, 4 }
 0x56d   : > { %v4197_v23 = vrot.slane %v4196_v53, 2  ;;  %v4218_v0 = vadd.f32 %v4217_v44, %v4216_v32 }
 0x56f   : > { %v4198_v24 = vadd.f32 %v4197_v23, %v4196_v53  ;;  %v4219_v52 = vrot.slane %v4218_v0, 2  ;;  %v4420_v23 = vld [vmem:[%s7245_s19 + $0x8] sm:$0xff] }
 0x571   : > { %v4199_v1 = vrot.slane %v4198_v24, 1  ;;  %v4220_v40 = vadd.f32 %v4219_v52, %v4218_v0  ;;  %v4421_v0 = vld [vmem:[%s7245_s19 + $0x10] sm:$0xff] }
 0x573   : > { %v4200_v2 = vadd.f32 %v4199_v1, %v4198_v24  ;;  %v4221_v56 = vrot.slane %v4220_v40, 1  ;;  %v4423_v1 = vld [vmem:[%s7245_s19 + $0x20] sm:$0xff] }
 0x575   : > { %4201 = vst [vmem:[#allocation3 + $0x1] sm:$0x1] %v4200_v2  ;;  %v4222_v48 = vadd.f32 %v4221_v56, %v4220_v40  ;;  %v4424_v40 = vld [vmem:[%s7245_s19 + $0x28] sm:$0xff] }
 0x577   : > { %4223 = vst [vmem:[#allocation3 + $0x3] sm:$0x1] %v4222_v48 }
 0x57e   : > { %v4224_v12 = vld [vmem:[#allocation3] sm:$0xf] }
 0x57f   : > { %6117 = vmatmul.mubr.f32.vlgmr.msra.gmra.mrb[66].mxu0 %v4224_v12  ;;  %v4425_v12 = vld [vmem:[%s7245_s19 + $0x30] sm:$0xff] }
 0x652   : > { %v4291_v16 = vpop.f32.mrb[66].mxu0 }
 0x653   : > { %v4295_v11 = vmul.f32 %v4291_v16, %v4291_v16  ;;  %v6118_v6 = vpop.f32.mrb[67].mxu0 }
 0x655   : > { %v4297_v27 = vrot.slane %v4295_v11, 6  ;;  %v4427_v11 = vld [vmem:[%s7245_s19 + $0x40] sm:$0xff] }
 0x657   : > { %v4299_v59 = vsub.f32 %v4291_v16, %v4297_v27 }
 0x659   : > { %v4300_v19 = vadd.f32 1e-05, %v4299_v59 }
 0x65b   : > { %6634 = vrsqrt.f32 %v4300_v19  ;;  %v4428_v19 = vld [vmem:[%s7245_s19 + $0x48] sm:$0xff] }
 0x665   : > { %v6635_v50 = vpop.eup %6634 }
 0x666   : > { %v4308_v28 = vmul.f32 %v6635_v50, %v5331_v43  ;;  %v4429_v43 = vld [vmem:[%s7245_s19 + $0x50] sm:$0xff]  ;;  %v4430_v50 = vld [vmem:[%s7245_s19 + $0x58] sm:$0xff] }
 0x668   : > { %v4310_v49 = vrot.slane %v4308_v28, 2  ;;  %v4326_v60 = vrot.slane %v4308_v28, %v9516_v63 }
 0x66a   : > { %v4312_v62 = vmul.f32 %v4310_v49, %v4291_v16  ;;  %v4327_v36 = vcombine.high %v4326_v60, %v4326_v60  ;;  %v4334_v14 = vrot.slane %v4326_v60, %v9516_v63  ;;  %v4426_v16 = vld [vmem:[%s7245_s19 + $0x38] sm:$0xff]  ;;  %v4432_v60 = vld [vmem:[%s7245_s19 + $0x68] sm:$0xff] }
 0x66c   : > { %v4319_v9 = vsub.f32 %v5332_v38, %v4312_v62  ;;  %v4341_v35 = vrot.slane %v4327_v36, %v9516_v63  ;;  %v4342_v26 = vcombine.high %v4334_v14, %v4334_v14  ;;  %v4433_v38 = vld [vmem:[%s7245_s19 + $0x70] sm:$0xff] }
 0x66e   : > { %v4343_v21 = vcombine.high %v4341_v35, %v4341_v35  ;;  %v4377_v33 = vrot.slane %v4319_v9, %v9516_v63  ;;  %v4347_v8 = vrot.slane %v4342_v26, %v9517_v51  ;;  %v4434_v9 = vld [vmem:[%s7245_s19 + $0x78] sm:$0xff] }
 0x670   : > { %v4351_v39 = vrot.slane %v4343_v21, %v9517_v51  ;;  %v4378_v45 = vcombine.high %v4377_v33, %v4377_v33  ;;  %v4385_v15 = vrot.slane %v4377_v33, %v9516_v63  ;;  %v4354_v10 = vmul.f32 %v8585_v57, %v4347_v8 }
 0x671   : > { %v4355_v47 = vmul.f32 %v8591_v61, %v4347_v8  ;;  %v4356_v18 = vmul.f32 %v8582_v5, %v4347_v8  ;;  %v4357_v7 = vmul.f32 %v8588_v3, %v4347_v8  ;;  %v4358_v20 = vmul.f32 %v8608_v41, %v4347_v8 }
 0x672   : > { %v4392_v13 = vrot.slane %v4378_v45, %v9516_v63  ;;  %v4396_v42 = vrot.slane %v4385_v15, %v9517_v51  ;;  %v4359_v29 = vmul.f32 %v8618_v31, %v4347_v8  ;;  %v4360_v37 = vmul.f32 %v8603_v34, %v4347_v8  ;;  %v4431_v63 = vld [vmem:[%s7245_s19 + $0x60] sm:$0xff] }
 0x673   : > { %v4361_v57 = vmul.f32 %v8612_v54, %v4347_v8  ;;  %v4362_v61 = vmul.f32 %v8632_v30, %v4351_v39  ;;  %v4363_v5 = vmul.f32 %v8638_v4, %v4351_v39  ;;  %v4364_v3 = vmul.f32 %v8626_v25, %v4351_v39 }
 0x674   : > { %v4365_v41 = vmul.f32 %v8635_v46, %v4351_v39  ;;  %v4400_v32 = vrot.slane %v4392_v13, %v9517_v51  ;;  %v4366_v31 = vmul.f32 %v8654_v17, %v4351_v39  ;;  %v4367_v34 = vmul.f32 %v8664_v58, %v4351_v39  ;;  %v4419_v46 = vld [vmem:[%s7245_s19] sm:$0xff] }
 0x675   : > { %v4368_v54 = vmul.f32 %v8651_v55, %v4351_v39  ;;  %v4403_v53 = vadd.f32 %v4396_v42, %v4354_v10  ;;  %v4369_v30 = vmul.f32 %v8658_v22, %v4351_v39  ;;  %v4404_v44 = vadd.f32 %v4396_v42, %v4355_v47  ;;  %v4422_v55 = vld [vmem:[%s7245_s19 + $0x18] sm:$0xff]  ;;  %s6849_s19 = sshll.u32 %s6940_s17, 4  ;;  %s6850_s19 = int_to_ptr.vmem [resolvable:$false] %s6849_s19 }
 0x676   : > { %v4405_v4 = vadd.f32 %v4396_v42, %v4356_v18  ;;  %v4406_v25 = vadd.f32 %v4396_v42, %v4357_v7  ;;  %v4407_v24 = vadd.f32 %v4396_v42, %v4358_v20  ;;  %v4408_v17 = vadd.f32 %v4396_v42, %v4359_v29  ;;  %s6851_s15 = scalar_lea.vmem %s6850_s19, 4096  ;;  %p6852_p8 = scmp.lt.s32.totalorder %s9241_s25, %s6850_s19 }
 0x677   : > { %v4409_v52 = vadd.f32 %v4396_v42, %v4360_v37  ;;  %v4410_v58 = vadd.f32 %v4396_v42, %v4361_v57  ;;  %v4411_v22 = vadd.f32 %v4400_v32, %v4362_v61  ;;  %v4412_v2 = vadd.f32 %v4400_v32, %v4363_v5  ;;  %p6853_p6 = scmp.lt.s32.totalorder %s6851_s15, %s6845_s3 }
 0x678   : > { %v4413_v56 = vadd.f32 %v4400_v32, %v4364_v3  ;;  %v4414_v48 = vadd.f32 %v4400_v32, %v4365_v41  ;;  %v4415_v6 = vadd.f32 %v4400_v32, %v4366_v31  ;;  %v4416_v27 = vadd.f32 %v4400_v32, %v4367_v34 }
 0x679   : > { %v4417_v59 = vadd.f32 %v4400_v32, %v4368_v54  ;;  %v8719_v28 = vadd.f32 %v4419_v46, %v4403_v53  ;;  %v4418_v49 = vadd.f32 %v4400_v32, %v4369_v30  ;;  %v8724_v62 = vadd.f32 %v4420_v23, %v4404_v44  ;;  %p6854_p10 = por %p6853_p6, %p6852_p8 }
 0x67a   : > { %v8726_v36 = vadd.f32 %v4421_v0, %v4405_v4  ;;  %v8728_v14 = vadd.f32 %v4422_v55, %v4406_v25  ;;  %v8731_v35 = vadd.f32 %v4423_v1, %v4407_v24  ;;  %v8733_v26 = vadd.f32 %v4424_v40, %v4408_v17 }
 0x67b   : > { %9518 = vst [vmem:[#allocation41_spill] sm:$0xff] %v8719_v28  ;;  %9519 = vst [vmem:[#allocation42_spill] sm:$0xff] %v8724_v62  ;;  %v8735_v21 = vadd.f32 %v4425_v12, %v4409_v52  ;;  %v8737_v33 = vadd.f32 %v4426_v16, %v4410_v58  ;;  %v8739_v51 = vadd.f32 %v4427_v11, %v4411_v22  ;;  %v8754_v18 = vmul.f32 0.70710677, %v8719_v28  ;;  %p6855_p3 = pnand %p6854_p10, %p6848_p0 }
 0x67c   : > { %9520 = vst [vmem:[#allocation43_spill] sm:$0xff] %v8726_v36  ;;  %9521 = vst [vmem:[#allocation45_spill] sm:$0xff] %v8728_v14  ;;  %v8741_v8 = vadd.f32 %v4428_v19, %v4412_v2  ;;  %v8743_v39 = vadd.f32 %v4429_v43, %v4413_v56  ;;  %v8745_v45 = vadd.f32 %v4430_v50, %v4414_v48  ;;  %v8759_v20 = vmul.f32 0.70710677, %v8724_v62 }
 0x67d   : > { %9522 = vst [vmem:[#allocation46_spill] sm:$0xff] %v8731_v35  ;;  %9523 = vst [vmem:[#allocation47_spill] sm:$0xff] %v8733_v26  ;;  %v8747_v15 = vadd.f32 %v4431_v63, %v4415_v6  ;;  %v8749_v10 = vadd.f32 %v4432_v60, %v4416_v27  ;;  %v8751_v47 = vadd.f32 %v4433_v38, %v4417_v59  ;;  %v8762_v13 = vmul.f32 0.70710677, %v8726_v36 }
 0x67e   : > { %9524 = vst [vmem:[#allocation31_spill] sm:$0xff] %v8735_v21  ;;  %9525 = vst [vmem:[#allocation48_spill] sm:$0xff] %v8737_v33  ;;  %v8756_v7 = vadd.f32 %v4434_v9, %v4418_v49  ;;  %v8765_v42 = vmul.f32 0.70710677, %v8728_v14  ;;  %v8768_v29 = vmul.f32 0.70710677, %v8731_v35 }
 0x67f   : > { %9526 = vst [vmem:[#allocation49_spill] sm:$0xff] %v8739_v51  ;;  %9527 = vst [vmem:[#allocation32_spill] sm:$0xff] %v8741_v8  ;;  %v8771_v37 = vmul.f32 0.70710677, %v8733_v26  ;;  %v8774_v57 = vmul.f32 0.70710677, %v8735_v21 }
 0x680   : > { %9528 = vst [vmem:[#allocation33_spill] sm:$0xff] %v8743_v39  ;;  %9529 = vst [vmem:[#allocation34_spill] sm:$0xff] %v8745_v45  ;;  %v8777_v61 = vmul.f32 0.70710677, %v8737_v33  ;;  %v8780_v5 = vmul.f32 0.70710677, %v8739_v51 }
 0x681   : > { %9530 = vst [vmem:[#allocation35_spill] sm:$0xff] %v8747_v15  ;;  %9531 = vst [vmem:[#allocation36_spill] sm:$0xff] %v8749_v10  ;;  %v8783_v3 = vmul.f32 0.70710677, %v8741_v8  ;;  %v8786_v41 = vmul.f32 0.70710677, %v8743_v39 }
 0x682   : > { %9532 = vst [vmem:[#allocation50_spill] sm:$0xff] %v8751_v47  ;;  %9533 = vst [vmem:[#allocation51_spill] sm:$0xff] %v8754_v18  ;;  %v8789_v32 = vmul.f32 0.70710677, %v8745_v45  ;;  %v8792_v31 = vmul.f32 0.70710677, %v8747_v15 }
 0x683   : > { %9534 = vst [vmem:[#allocation52_spill] sm:$0xff] %v8756_v7  ;;  %9535 = vst [vmem:[#allocation53_spill] sm:$0xff] %v8759_v20  ;;  %v8795_v34 = vmul.f32 0.70710677, %v8749_v10  ;;  %v8798_v54 = vmul.f32 0.70710677, %v8751_v47 }
 0x684   : > { %9536 = vst [vmem:[#allocation37_spill] sm:$0xff] %v8762_v13  ;;  %9537 = vst [vmem:[#allocation54_spill] sm:$0xff] %v8765_v42  ;;  %v8801_v53 = vmul.f32 0.70710677, %v8756_v7  ;;  %v8804_v30 = vand.u32 2147483647, %v8754_v18 }
 0x685   : > { %9538 = vst [vmem:[#allocation55_spill] sm:$0xff] %v8768_v29  ;;  %9539 = vst [vmem:[#allocation38_spill] sm:$0xff] %v8771_v37  ;;  %v8807_v44 = vand.u32 2147483647, %v8759_v20  ;;  %v8810_v4 = vand.u32 2147483647, %v8762_v13 }
 0x686   : > { %9540 = vst [vmem:[#allocation39_spill] sm:$0xff] %v8774_v57  ;;  %9541 = vst [vmem:[#allocation56_spill] sm:$0xff] %v8777_v61  ;;  %v8813_v25 = vand.u32 2147483647, %v8765_v42  ;;  %v8816_v46 = vand.u32 2147483647, %v8768_v29 }
 0x687   : > { %9542 = vst [vmem:[#allocation57_spill] sm:$0xff] %v8780_v5  ;;  %9543 = vst [vmem:[#allocation40_spill] sm:$0xff] %v8783_v3  ;;  %v8819_v23 = vand.u32 2147483647, %v8771_v37  ;;  %v8822_v0 = vand.u32 2147483647, %v8774_v57 }
 0x688   : > { %9544 = vst [vmem:[#allocation44_spill] sm:$0xff] %v8786_v41  ;;  %9545 = vst [vmem:[#allocation21_spill] sm:$0xff] %v8789_v32  ;;  %v8825_v24 = vand.u32 2147483647, %v8777_v61  ;;  %v8828_v17 = vand.u32 2147483647, %v8780_v5 }
 0x689   : > { %9546 = vst [vmem:[#allocation22_spill] sm:$0xff] %v8792_v31  ;;  %9547 = vst [vmem:[#allocation23_spill] sm:$0xff] %v8795_v34  ;;  %v8831_v52 = vand.u32 2147483647, %v8783_v3  ;;  %v8834_v58 = vand.u32 2147483647, %v8786_v41 }
 0x68a   : > { %9548 = vst [vmem:[#allocation24_spill] sm:$0xff] %v8798_v54  ;;  %9549 = vst [vmem:[#allocation25_spill] sm:$0xff] %v8801_v53  ;;  %v8837_v55 = vand.u32 2147483647, %v8789_v32  ;;  %v8840_v1 = vand.u32 2147483647, %v8792_v31 }
 0x68b   : > { %v8843_v40 = vand.u32 2147483647, %v8795_v34  ;;  %v8846_v22 = vand.u32 2147483647, %v8798_v54  ;;  %v8849_v2 = vand.u32 2147483647, %v8801_v53 }
 0x68c   : > { %v4483_v56 = vmul.f32 0.3275911, %v8804_v30  ;;  %v4484_v48 = vmul.f32 0.3275911, %v8807_v44  ;;  %v4485_v12 = vmul.f32 0.3275911, %v8810_v4 }
 0x68d   : > { %v4486_v16 = vmul.f32 0.3275911, %v8813_v25  ;;  %v4487_v11 = vmul.f32 0.3275911, %v8816_v46  ;;  %v4488_v6 = vmul.f32 0.3275911, %v8819_v23 }
 0x68e   : > { %v4489_v27 = vmul.f32 0.3275911, %v8822_v0  ;;  %v4490_v59 = vmul.f32 0.3275911, %v8825_v24  ;;  %v4491_v19 = vmul.f32 0.3275911, %v8828_v17 }
 0x68f   : > { %v4492_v43 = vmul.f32 0.3275911, %v8831_v52  ;;  %v4493_v50 = vmul.f32 0.3275911, %v8834_v58  ;;  %v4494_v49 = vmul.f32 0.3275911, %v8837_v55 }
 0x690   : > { %v4495_v63 = vmul.f32 0.3275911, %v8840_v1  ;;  %v4499_v60 = vadd.f32 1.0, %v4483_v56  ;;  %v4496_v38 = vmul.f32 0.3275911, %v8843_v40  ;;  %v4500_v7 = vadd.f32 1.0, %v4484_v48 }
 0x691   : > { %v4497_v9 = vmul.f32 0.3275911, %v8846_v22  ;;  %v4498_v47 = vmul.f32 0.3275911, %v8849_v2  ;;  %v8867_v10 = vadd.f32 1.0, %v4485_v12  ;;  %v8869_v15 = vadd.f32 1.0, %v4486_v16 }
 0x692   : > { %v8871_v45 = vadd.f32 1.0, %v4487_v11  ;;  %v8873_v39 = vadd.f32 1.0, %v4488_v6  ;;  %v8875_v8 = vadd.f32 1.0, %v4489_v27  ;;  %v8877_v51 = vadd.f32 1.0, %v4490_v59 }
 0x693   : > { %v8879_v56 = vadd.f32 1.0, %v4491_v19  ;;  %v8881_v33 = vadd.f32 1.0, %v4492_v43  ;;  %v8883_v21 = vadd.f32 1.0, %v4493_v50  ;;  %v8885_v48 = vadd.f32 1.0, %v4494_v49 }
 0x694   : > { %6636 = vrcp.f32 %v4499_v60  ;;  %v8887_v12 = vadd.f32 1.0, %v4495_v63  ;;  %v8889_v16 = vadd.f32 1.0, %v4496_v38  ;;  %v8891_v11 = vadd.f32 1.0, %v4497_v9 }
 0x695   : > { %6638 = vrcp.f32 %v4500_v7  ;;  %v8893_v6 = vadd.f32 1.0, %v4498_v47  ;;  %v4723_v27 = vsub.f32 0.0, %v8804_v30  ;;  %v4724_v59 = vsub.f32 0.0, %v8807_v44 }
 0x696   : > { %6640 = vrcp.f32 %v8867_v10  ;;  %v4725_v19 = vsub.f32 0.0, %v8810_v4  ;;  %v4726_v43 = vsub.f32 0.0, %v8813_v25  ;;  %v4727_v50 = vsub.f32 0.0, %v8816_v46 }
 0x697   : > { %6642 = vrcp.f32 %v8869_v15  ;;  %v4728_v49 = vsub.f32 0.0, %v8819_v23  ;;  %v4729_v47 = vsub.f32 0.0, %v8822_v0  ;;  %v4730_v63 = vsub.f32 0.0, %v8825_v24 }
 0x698   : > { %6644 = vrcp.f32 %v8871_v45  ;;  %v4731_v38 = vsub.f32 0.0, %v8828_v17  ;;  %v4732_v9 = vsub.f32 0.0, %v8831_v52  ;;  %v4733_v26 = vsub.f32 0.0, %v8834_v58 }
 0x699   : > { %6646 = vrcp.f32 %v8873_v39  ;;  %v4734_v35 = vsub.f32 0.0, %v8837_v55  ;;  %v4739_v53 = vmul.f32 %v4723_v27, %v8804_v30  ;;  %v4740_v54 = vmul.f32 %v4724_v59, %v8807_v44 }
 0x69a   : > { %6648 = vrcp.f32 %v8875_v8  ;;  %v4741_v34 = vmul.f32 %v4725_v19, %v8810_v4  ;;  %v4742_v31 = vmul.f32 %v4726_v43, %v8813_v25  ;;  %v4743_v36 = vmul.f32 %v4727_v50, %v8816_v46 }
 0x69b   : > { %6650 = vrcp.f32 %v8877_v51  ;;  %v4744_v14 = vmul.f32 %v4728_v49, %v8819_v23  ;;  %v4745_v62 = vmul.f32 %v4729_v47, %v8822_v0  ;;  %v8928_v30 = vmul.f32 %v4730_v63, %v8825_v24 }
 0x69c   : > { %6652 = vrcp.f32 %v8879_v56  ;;  %v8931_v44 = vmul.f32 %v4731_v38, %v8828_v17  ;;  %v8934_v4 = vmul.f32 %v4732_v9, %v8831_v52  ;;  %v8938_v23 = vmul.f32 %v4733_v26, %v8834_v58 }
 0x69d   : > { %6654 = vrcp.f32 %v8881_v33  ;;  %v8941_v0 = vmul.f32 %v4734_v35, %v8837_v55  ;;  %v8944_v59 = vmul.f32 1.442695, %v4739_v53  ;;  %v8946_v17 = vmul.f32 1.442695, %v4740_v54 }
 0x69e   : > { %v6637_v32 = vpop.eup %6636  ;;  %6656 = vrcp.f32 %v8883_v21  ;;  %v8950_v43 = vmul.f32 1.442695, %v4741_v34  ;;  %v8954_v55 = vmul.f32 1.442695, %v4742_v31  ;;  %v8963_v63 = vmul.f32 1.442695, %v4743_v36 }
 0x69f   : > { %v6639_v25 = vpop.eup %6638  ;;  %6658 = vrcp.f32 %v8885_v48  ;;  %v4531_v46 = vmul.f32 %v6637_v32, %v4499_v60 }
 0x6a0   : > { %v6641_v27 = vpop.eup %6640  ;;  %6660 = vrcp.f32 %v8887_v12  ;;  %v4532_v24 = vmul.f32 %v6639_v25, %v4500_v7 }
 0x6a1   : > { %v6643_v52 = vpop.eup %6642  ;;  %6662 = vrcp.f32 %v8889_v16  ;;  %v4533_v19 = vmul.f32 %v6641_v27, %v8867_v10  ;;  %v4547_v60 = vsub.f32 2.0, %v4531_v46  ;;  %v8968_v46 = vmul.f32 1.442695, %v4744_v14 }
 0x6a2   : > { %v6645_v26 = vpop.eup %6644  ;;  %6664 = vrcp.f32 %v8891_v11  ;;  %v4534_v35 = vmul.f32 %v6643_v52, %v8869_v15  ;;  %v4548_v58 = vsub.f32 2.0, %v4532_v24 }
 0x6a3   : > { %v6647_v7 = vpop.eup %6646  ;;  %6666 = vrcp.f32 %v8893_v6  ;;  %v4535_v54 = vmul.f32 %v6645_v26, %v8871_v45  ;;  %v4549_v53 = vsub.f32 2.0, %v4533_v19  ;;  %v8958_v50 = vmul.f32 %v6637_v32, %v4547_v60 }
 0x6a4   : > { %v6649_v10 = vpop.eup %6648  ;;  %v4536_v34 = vmul.f32 %v6647_v7, %v8873_v39  ;;  %v4550_v49 = vsub.f32 2.0, %v4534_v35  ;;  %v8961_v47 = vmul.f32 %v6639_v25, %v4548_v58  ;;  %v8973_v39 = vmul.f32 1.442695, %v4745_v62 }
 0x6a5   : > { %v6651_v15 = vpop.eup %6650  ;;  %v4537_v31 = vmul.f32 %v6649_v10, %v8875_v8  ;;  %v4551_v38 = vsub.f32 2.0, %v4535_v54  ;;  %v8966_v9 = vmul.f32 %v6641_v27, %v4549_v53  ;;  %v4579_v8 = vmul.f32 1.0614054, %v8958_v50 }
 0x6a6   : > { %v6653_v45 = vpop.eup %6652  ;;  %v4538_v32 = vmul.f32 %v6651_v15, %v8877_v51  ;;  %v4552_v24 = vsub.f32 2.0, %v4536_v34  ;;  %v8971_v19 = vmul.f32 %v6643_v52, %v4550_v49  ;;  %v4580_v51 = vmul.f32 1.0614054, %v8961_v47 }
 0x6a7   : > { %v6655_v25 = vpop.eup %6654  ;;  %v4539_v36 = vmul.f32 %v6653_v45, %v8879_v56  ;;  %v4553_v60 = vsub.f32 2.0, %v4537_v31  ;;  %v8976_v35 = vmul.f32 %v6645_v26, %v4551_v38  ;;  %v4581_v56 = vmul.f32 1.0614054, %v8966_v9 }
 0x6a8   : > { %v6657_v27 = vpop.eup %6656  ;;  %v4540_v14 = vmul.f32 %v6655_v25, %v8881_v33  ;;  %v4554_v58 = vsub.f32 2.0, %v4538_v32  ;;  %v8980_v54 = vmul.f32 %v6647_v7, %v4552_v24  ;;  %v4582_v33 = vmul.f32 1.0614054, %v8971_v19 }
 0x6a9   : > { %v6659_v52 = vpop.eup %6658  ;;  %v4541_v62 = vmul.f32 %v6657_v27, %v8883_v21  ;;  %v4555_v53 = vsub.f32 2.0, %v4539_v36  ;;  %v8984_v34 = vmul.f32 %v6649_v10, %v4553_v60  ;;  %v4583_v21 = vmul.f32 1.0614054, %v8976_v35 }
 0x6aa   : > { %v6661_v26 = vpop.eup %6660  ;;  %v4542_v49 = vmul.f32 %v6659_v52, %v8885_v48  ;;  %v4556_v31 = vsub.f32 2.0, %v4540_v14  ;;  %v8988_v38 = vmul.f32 %v6651_v15, %v4554_v58  ;;  %v4584_v48 = vmul.f32 1.0614054, %v8980_v54 }
 0x6ab   : > { %v6663_v7 = vpop.eup %6662  ;;  %v4543_v32 = vmul.f32 %v6661_v26, %v8887_v12  ;;  %v4557_v24 = vsub.f32 2.0, %v4541_v62  ;;  %v8992_v28 = vmul.f32 %v6653_v45, %v4555_v53  ;;  %v4585_v12 = vmul.f32 1.0614054, %v8984_v34 }
 0x6ac   : > { %v6665_v10 = vpop.eup %6664  ;;  %v4544_v36 = vmul.f32 %v6663_v7, %v8889_v16  ;;  %v4558_v60 = vsub.f32 2.0, %v4542_v49  ;;  %v8996_v41 = vmul.f32 %v6655_v25, %v4556_v31  ;;  %v4586_v16 = vmul.f32 1.0614054, %v8988_v38 }
 0x6ad   : > { %v6667_v15 = vpop.eup %6666  ;;  %v4545_v14 = vmul.f32 %v6665_v10, %v8891_v11  ;;  %v4559_v58 = vsub.f32 2.0, %v4543_v32  ;;  %v9000_v3 = vmul.f32 %v6657_v27, %v4557_v24  ;;  %v4587_v31 = vmul.f32 1.0614054, %v8992_v28 }
 0x6ae   : > { %v4546_v45 = vmul.f32 %v6667_v15, %v8893_v6  ;;  %v4560_v62 = vsub.f32 2.0, %v4544_v36  ;;  %v9004_v53 = vmul.f32 %v6659_v52, %v4558_v60  ;;  %v4588_v5 = vmul.f32 1.0614054, %v8996_v41 }
 0x6af   : > { %v4561_v49 = vsub.f32 2.0, %v4545_v14  ;;  %v9007_v25 = vmul.f32 %v6661_v26, %v4559_v58  ;;  %v4589_v27 = vmul.f32 1.0614054, %v9000_v3  ;;  %v4595_v24 = vadd.f32 -1.4531521, %v4579_v8 }
 0x6b0   : > { %v4562_v11 = vsub.f32 2.0, %v4546_v45  ;;  %v9011_v32 = vmul.f32 %v6663_v7, %v4560_v62  ;;  %v4590_v6 = vmul.f32 1.0614054, %v9004_v53  ;;  %v4596_v36 = vadd.f32 -1.4531521, %v4580_v51 }
 0x6b1   : > { %v9014_v61 = vmul.f32 %v6665_v10, %v4561_v49  ;;  %v4591_v52 = vmul.f32 1.0614054, %v9007_v25  ;;  %v4597_v14 = vadd.f32 -1.4531521, %v4581_v56  ;;  %v4598_v58 = vadd.f32 -1.4531521, %v4582_v33 }
 0x6b2   : > { %v9018_v60 = vmul.f32 %v6667_v15, %v4562_v11  ;;  %v4592_v26 = vmul.f32 1.0614054, %v9011_v32  ;;  %v4599_v7 = vadd.f32 -1.4531521, %v4583_v21  ;;  %v4600_v62 = vadd.f32 -1.4531521, %v4584_v48 }
 0x6b3   : > { %v4593_v45 = vmul.f32 1.0614054, %v9014_v61  ;;  %v9550_v8 = vsub.f32 0.0, %v8840_v1  ;;  %v4601_v57 = vadd.f32 -1.4531521, %v4585_v12  ;;  %v9551_v51 = vsub.f32 0.0, %v8843_v40 }
 0x6b4   : > { %v4594_v49 = vmul.f32 1.0614054, %v9018_v60  ;;  %v4602_v37 = vadd.f32 -1.4531521, %v4586_v16  ;;  %v4603_v56 = vadd.f32 -1.4531521, %v4587_v31  ;;  %v4611_v42 = vmul.f32 %v4595_v24, %v8958_v50 }
 0x6b5   : > { %v9025_v10 = vmul.f32 %v9550_v8, %v8840_v1  ;;  %v9031_v15 = vmul.f32 %v9551_v51, %v8843_v40  ;;  %v4604_v33 = vadd.f32 -1.4531521, %v4588_v5  ;;  %v4605_v11 = vadd.f32 -1.4531521, %v4589_v27 }
 0x6b6   : > { %v9552_v21 = vsub.f32 0.0, %v8846_v22  ;;  %v4606_v29 = vadd.f32 -1.4531521, %v4590_v6  ;;  %v4607_v1 = vadd.f32 -1.4531521, %v4591_v52  ;;  %v4612_v16 = vmul.f32 %v4596_v36, %v8961_v47 }
 0x6b7   : > { %v4608_v8 = vadd.f32 -1.4531521, %v4592_v26  ;;  %v4609_v12 = vadd.f32 -1.4531521, %v4593_v45  ;;  %v4613_v13 = vmul.f32 %v4597_v14, %v8966_v9  ;;  %v4614_v40 = vmul.f32 %v4598_v58, %v8971_v19 }
 0x6b8   : > { %v9036_v48 = vmul.f32 %v9552_v21, %v8846_v22  ;;  %v4610_v31 = vadd.f32 -1.4531521, %v4594_v49  ;;  %v4615_v5 = vmul.f32 %v4599_v7, %v8976_v35  ;;  %v4616_v27 = vmul.f32 %v4600_v62, %v8980_v54 }
 0x6b9   : > { %v4617_v22 = vmul.f32 %v4601_v57, %v8984_v34  ;;  %v4618_v6 = vmul.f32 %v4602_v37, %v8988_v38  ;;  %v4619_v52 = vmul.f32 %v4603_v56, %v8992_v28  ;;  %v4620_v24 = vmul.f32 %v4604_v33, %v8996_v41 }
 0x6ba   : > { %v4621_v26 = vmul.f32 %v4605_v11, %v9000_v3  ;;  %v4622_v36 = vmul.f32 %v4606_v29, %v9004_v53  ;;  %v4623_v14 = vmul.f32 %v4607_v1, %v9007_v25  ;;  %v4624_v58 = vmul.f32 %v4608_v8, %v9011_v32 }
 0x6bb   : > { %v4627_v45 = vadd.f32 1.4214138, %v4611_v42  ;;  %v4625_v7 = vmul.f32 %v4609_v12, %v9014_v61  ;;  %v4628_v62 = vadd.f32 1.4214138, %v4612_v16  ;;  %v4629_v49 = vadd.f32 1.4214138, %v4613_v13 }
 0x6bc   : > { %v4630_v57 = vadd.f32 1.4214138, %v4614_v40  ;;  %v4626_v37 = vmul.f32 %v4610_v31, %v9018_v60  ;;  %v4631_v51 = vadd.f32 1.4214138, %v4615_v5  ;;  %v4632_v56 = vadd.f32 1.4214138, %v4616_v27 }
 0x6bd   : > { %v4633_v21 = vadd.f32 1.4214138, %v4617_v22  ;;  %v4634_v33 = vadd.f32 1.4214138, %v4618_v6  ;;  %v4635_v20 = vadd.f32 1.4214138, %v4619_v52  ;;  %6668 = vpow2.f32 %v8944_v59 }
 0x6be   : > { %v4636_v11 = vadd.f32 1.4214138, %v4620_v24  ;;  %v4637_v29 = vadd.f32 1.4214138, %v4621_v26  ;;  %v4638_v1 = vadd.f32 1.4214138, %v4622_v36  ;;  %6670 = vpow2.f32 %v8946_v17 }
 0x6bf   : > { %v4639_v18 = vadd.f32 1.4214138, %v4623_v14  ;;  %v4640_v42 = vadd.f32 1.4214138, %v4624_v58  ;;  %v4641_v8 = vadd.f32 1.4214138, %v4625_v7  ;;  %v4643_v13 = vmul.f32 %v4627_v45, %v8958_v50 }
 0x6c0   : > { %v4644_v12 = vmul.f32 %v4628_v62, %v8961_v47  ;;  %v4642_v16 = vadd.f32 1.4214138, %v4626_v37  ;;  %v4645_v40 = vmul.f32 %v4629_v49, %v8966_v9  ;;  %v4646_v31 = vmul.f32 %v4630_v57, %v8971_v19 }
 0x6c1   : > { %v4647_v5 = vmul.f32 %v4631_v51, %v8976_v35  ;;  %v4648_v59 = vmul.f32 %v4632_v56, %v8980_v54  ;;  %v4649_v27 = vmul.f32 %v4633_v21, %v8984_v34  ;;  %v4650_v22 = vmul.f32 %v4634_v33, %v8988_v38 }
 0x6c2   : > { %v4651_v17 = vmul.f32 %v4635_v20, %v8992_v28  ;;  %v4652_v6 = vmul.f32 %v4636_v11, %v8996_v41  ;;  %v4653_v52 = vmul.f32 %v4637_v29, %v9000_v3  ;;  %v4654_v24 = vmul.f32 %v4638_v1, %v9004_v53 }
 0x6c3   : > { %v4655_v26 = vmul.f32 %v4639_v18, %v9007_v25  ;;  %v4656_v36 = vmul.f32 %v4640_v42, %v9011_v32  ;;  %v4657_v14 = vmul.f32 %v4641_v8, %v9014_v61  ;;  %v4659_v58 = vadd.f32 -0.28449672, %v4643_v13 }
 0x6c4   : > { %v4660_v45 = vadd.f32 -0.28449672, %v4644_v12  ;;  %v4658_v7 = vmul.f32 %v4642_v16, %v9018_v60  ;;  %v4661_v62 = vadd.f32 -0.28449672, %v4645_v40  ;;  %v4662_v49 = vadd.f32 -0.28449672, %v4646_v31 }
 0x6c5   : > { %v4663_v57 = vadd.f32 -0.28449672, %v4647_v5  ;;  %v4664_v20 = vadd.f32 -0.28449672, %v4648_v59  ;;  %v4665_v37 = vadd.f32 -0.28449672, %v4649_v27  ;;  %6672 = vpow2.f32 %v8950_v43 }
 0x6c6   : > { %v4666_v51 = vadd.f32 -0.28449672, %v4650_v22  ;;  %v4667_v56 = vadd.f32 -0.28449672, %v4651_v17  ;;  %v4668_v21 = vadd.f32 -0.28449672, %v4652_v6  ;;  %6674 = vpow2.f32 %v8954_v55 }
 0x6c7   : > { %v4669_v33 = vadd.f32 -0.28449672, %v4653_v52  ;;  %v9074_v18 = vpop.eup %6668  ;;  %v4670_v11 = vadd.f32 -0.28449672, %v4654_v24  ;;  %v4671_v29 = vadd.f32 -0.28449672, %v4655_v26  ;;  %v4675_v1 = vmul.f32 %v4659_v58, %v8958_v50 }
 0x6c8   : > { %v4676_v42 = vmul.f32 %v4660_v45, %v8961_v47  ;;  %v9078_v8 = vpop.eup %6670  ;;  %v4672_v13 = vadd.f32 -0.28449672, %v4656_v36  ;;  %v4673_v12 = vadd.f32 -0.28449672, %v4657_v14  ;;  %v4674_v16 = vadd.f32 -0.28449672, %v4658_v7 }
 0x6c9   : > { %v4677_v43 = vmul.f32 %v4661_v62, %v8966_v9  ;;  %v4678_v40 = vmul.f32 %v4662_v49, %v8971_v19  ;;  %v4679_v31 = vmul.f32 %v4663_v57, %v8976_v35  ;;  %v4680_v55 = vmul.f32 %v4664_v20, %v8980_v54 }
 0x6ca   : > { %v4681_v5 = vmul.f32 %v4665_v37, %v8984_v34  ;;  %v4682_v59 = vmul.f32 %v4666_v51, %v8988_v38  ;;  %v4683_v27 = vmul.f32 %v4667_v56, %v8992_v28  ;;  %v4684_v22 = vmul.f32 %v4668_v21, %v8996_v41 }
 0x6cb   : > { %v4685_v17 = vmul.f32 %v4669_v33, %v9000_v3  ;;  %v4686_v6 = vmul.f32 %v4670_v11, %v9004_v53  ;;  %v4687_v52 = vmul.f32 %v4671_v29, %v9007_v25  ;;  %v4691_v24 = vadd.f32 0.2548296, %v4675_v1 }
 0x6cc   : > { %v4692_v26 = vadd.f32 0.2548296, %v4676_v42  ;;  %v4688_v36 = vmul.f32 %v4672_v13, %v9011_v32  ;;  %v4689_v14 = vmul.f32 %v4673_v12, %v9014_v61  ;;  %v4693_v58 = vadd.f32 0.2548296, %v4677_v43 }
 0x6cd   : > { %6676 = vpow2.f32 %v8963_v63  ;;  %v4690_v45 = vmul.f32 %v4674_v16, %v9018_v60  ;;  %v4694_v7 = vadd.f32 0.2548296, %v4678_v40  ;;  %v4695_v62 = vadd.f32 0.2548296, %v4679_v31 }
 0x6ce   : > { %v4696_v49 = vadd.f32 0.2548296, %v4680_v55  ;;  %v4697_v57 = vadd.f32 0.2548296, %v4681_v5  ;;  %v4698_v20 = vadd.f32 0.2548296, %v4682_v59  ;;  %v4707_v29 = vmul.f32 %v4691_v24, %v8958_v50 }
 0x6cf   : > { %v4699_v37 = vadd.f32 0.2548296, %v4683_v27  ;;  %v9553_v51 = vsub.f32 0.0, %v8849_v2  ;;  %v6673_v21 = vpop.eup %6672  ;;  %v4700_v33 = vadd.f32 0.2548296, %v4684_v22  ;;  %v4708_v1 = vmul.f32 %v4692_v26, %v8961_v47  ;;  %v9558_v24 = vld [vmem:[#allocation55_spill] sm:$0xff] }
 0x6d0   : > { %v4701_v11 = vadd.f32 0.2548296, %v4685_v17  ;;  %v6675_v63 = vpop.eup %6674  ;;  %v4702_v42 = vadd.f32 0.2548296, %v4686_v6  ;;  %v4703_v13 = vadd.f32 0.2548296, %v4687_v52  ;;  %v4709_v16 = vmul.f32 %v4693_v58, %v8966_v9 }
 0x6d1   : > { %v4754_v56 = vmul.f32 %v9553_v51, %v8849_v2  ;;  %v4704_v12 = vadd.f32 0.2548296, %v4688_v36  ;;  %v4705_v43 = vadd.f32 0.2548296, %v4689_v14  ;;  %v4706_v40 = vadd.f32 0.2548296, %v4690_v45 }
 0x6d2   : > { %v4710_v31 = vmul.f32 %v4694_v7, %v8971_v19  ;;  %v4711_v55 = vmul.f32 %v4695_v62, %v8976_v35  ;;  %v4712_v2 = vmul.f32 %v4696_v49, %v8980_v54  ;;  %v4713_v5 = vmul.f32 %v4697_v57, %v8984_v34  ;;  %v9554_v17 = vld [vmem:[#allocation51_spill] sm:$0xff]  ;;  %v9555_v52 = vld [vmem:[#allocation53_spill] sm:$0xff]  ;;  %v9559_v26 = vld [vmem:[#allocation38_spill] sm:$0xff] }
 0x6d3   : > { %v4714_v50 = vmul.f32 %v4698_v20, %v8988_v38  ;;  %v9107_v47 = vmul.f32 %v4699_v37, %v8992_v28  ;;  %6678 = vpow2.f32 %v8968_v46  ;;  %v4769_v59 = vmul.f32 1.442695, %v8928_v30  ;;  %v9560_v36 = vld [vmem:[#allocation39_spill] sm:$0xff]  ;;  %v9561_v45 = vld [vmem:[#allocation56_spill] sm:$0xff]  ;;  %v9562_v7 = vld [vmem:[#allocation57_spill] sm:$0xff] }
 0x6d4   : > { %v4771_v9 = vmul.f32 1.442695, %v8931_v44  ;;  %v4773_v27 = vmul.f32 1.442695, %v8934_v4  ;;  %v9114_v19 = vmul.f32 %v4700_v33, %v8996_v41  ;;  %v9117_v35 = vmul.f32 %v4701_v11, %v9000_v3  ;;  %v9563_v20 = vld [vmem:[#allocation40_spill] sm:$0xff] }
 0x6d5   : > { %6680 = vpow2.f32 %v8973_v39  ;;  %v4775_v54 = vmul.f32 1.442695, %v8938_v23  ;;  %v9122_v28 = vmul.f32 %v4702_v42, %v9004_v53  ;;  %v4777_v30 = vmul.f32 1.442695, %v8941_v0 }
 0x6d6   : > { %6682 = vpow2.f32 %v4769_v59  ;;  %v4779_v44 = vmul.f32 1.442695, %v9025_v10  ;;  %v4781_v41 = vmul.f32 1.442695, %v9031_v15  ;;  %v4787_v4 = vmul.f32 %v9074_v18, %v4707_v29  ;;  %v9564_v29 = vld [vmem:[#allocation44_spill] sm:$0xff] }
 0x6d7   : > { %v6677_v46 = vpop.eup %6676  ;;  %6684 = vpow2.f32 %v4771_v9  ;;  %v4788_v3 = vmul.f32 %v9078_v8, %v4708_v1  ;;  %v4789_v39 = vmul.f32 %v6673_v21, %v4709_v16  ;;  %v4790_v34 = vmul.f32 %v6675_v63, %v4710_v31  ;;  %v9565_v16 = vld [vmem:[#allocation21_spill] sm:$0xff] }
 0x6d8   : > { %6686 = vpow2.f32 %v4773_v27  ;;  %v4791_v23 = vmul.f32 %v6677_v46, %v4711_v55  ;;  %v9130_v38 = vmul.f32 %v4703_v13, %v9007_v25  ;;  %v9133_v53 = vmul.f32 %v4704_v12, %v9011_v32 }
 0x6d9   : > { %6688 = vpow2.f32 %v4775_v54  ;;  %v4783_v0 = vmul.f32 1.442695, %v9036_v48  ;;  %v9137_v10 = vmul.f32 %v4705_v43, %v9014_v61  ;;  %v9140_v15 = vmul.f32 %v4706_v40, %v9018_v60  ;;  %v9556_v48 = vld [vmem:[#allocation37_spill] sm:$0xff]  ;;  %v9557_v61 = vld [vmem:[#allocation54_spill] sm:$0xff]  ;;  %v9567_v54 = vld [vmem:[#allocation23_spill] sm:$0xff] }
 0x6da   : > { %6690 = vpow2.f32 %v4777_v30  ;;  %v4785_v18 = vmul.f32 1.442695, %v4754_v56  ;;  %v4803_v8 = vsub.f32 1.0, %v4787_v4  ;;  %v4804_v22 = vsub.f32 1.0, %v4788_v3  ;;  %v9568_v4 = vld [vmem:[#allocation24_spill] sm:$0xff] }
 0x6db   : > { %6692 = vpow2.f32 %v4779_v44  ;;  %vm4819_vm0 = vcmp.ge.f32.partialorder %v9554_v17, 0.0  ;;  %v4805_v25 = vsub.f32 1.0, %v4789_v39  ;;  %v4806_v32 = vsub.f32 1.0, %v4790_v34 }
 0x6dc   : > { %6694 = vpow2.f32 %v4781_v41  ;;  %v4807_v6 = vsub.f32 1.0, %v4791_v23  ;;  %vm4820_vm2 = vcmp.ge.f32.partialorder %v9555_v52, 0.0  ;;  %vm4821_vm3 = vcmp.ge.f32.partialorder %v9556_v48, 0.0 }
 0x6dd   : > { %6696 = vpow2.f32 %v4783_v0  ;;  %vm4822_vm4 = vcmp.ge.f32.partialorder %v9557_v61, 0.0  ;;  %v6679_v60 = vpop.eup %6678  ;;  %vm4823_vm5 = vcmp.ge.f32.partialorder %v9558_v24, 0.0  ;;  %vm4824_vm6 = vcmp.ge.f32.partialorder %v9559_v26, 0.0  ;;  %v9569_v0 = vld [vmem:[#allocation25_spill] sm:$0xff] }
 0x6de   : > { %6698 = vpow2.f32 %v4785_v18  ;;  %vm4825_vm7 = vcmp.ge.f32.partialorder %v9560_v36, 0.0  ;;  %v4792_v58 = vmul.f32 %v6679_v60, %v4712_v2  ;;  %vm4826_vm8 = vcmp.ge.f32.partialorder %v9561_v45, 0.0  ;;  %v9570_v45 = vld [vmem:[#allocation41_spill] sm:$0xff] }
 0x6df   : > { %v6681_v14 = vpop.eup %6680  ;;  %vm4827_vm9 = vcmp.ge.f32.partialorder %v9562_v7, 0.0  ;;  %v4835_v62 = vsub.f32 0.0, %v4803_v8  ;;  %vm4828_vm10 = vcmp.ge.f32.partialorder %v9563_v20, 0.0  ;;  %v4836_v37 = vsub.f32 0.0, %v4804_v22  ;;  %v9572_v20 = vld [vmem:[#allocation43_spill] sm:$0xff] }
 0x6e0   : > { %v6683_v49 = vpop.eup %6682  ;;  %v4793_v57 = vmul.f32 %v6681_v14, %v4713_v5  ;;  %v4837_v51 = vsub.f32 0.0, %v4805_v25  ;;  %v4838_v56 = vsub.f32 0.0, %v4806_v32  ;;  %v4808_v11 = vsub.f32 1.0, %v4792_v58  ;;  %v9566_v5 = vld [vmem:[#allocation22_spill] sm:$0xff] }
 0x6e1   : > { %v6685_v21 = vpop.eup %6684  ;;  %v4794_v33 = vmul.f32 %v6683_v49, %v4714_v50  ;;  %vm4829_vm11 = vcmp.ge.f32.partialorder %v9564_v29, 0.0  ;;  %v4839_v1 = vsub.f32 0.0, %v4807_v6  ;;  %v9155_v63 = vsel %vm4819_vm0, %v4803_v8, %v4835_v62 }
 0x6e2   : > { %v6687_v42 = vpop.eup %6686  ;;  %v4795_v13 = vmul.f32 %v6685_v21, %v9107_v47  ;;  %v4809_v12 = vsub.f32 1.0, %v4793_v57  ;;  %vm4830_vm12 = vcmp.ge.f32.partialorder %v9565_v16, 0.0  ;;  %v9161_v43 = vsel %vm4820_vm2, %v4804_v22, %v4836_v37  ;;  %v9571_v57 = vld [vmem:[#allocation42_spill] sm:$0xff]  ;;  %v9573_v21 = vld [vmem:[#allocation45_spill] sm:$0xff] }
 0x6e3   : > { %v9165_v40 = vsel %vm4821_vm3, %v4805_v25, %v4837_v51  ;;  %v6689_v31 = vpop.eup %6688  ;;  %v4796_v55 = vmul.f32 %v6687_v42, %v9114_v19  ;;  %v4810_v2 = vsub.f32 1.0, %v4794_v33  ;;  %vm4831_vm13 = vcmp.ge.f32.partialorder %v9566_v5, 0.0 }
 0x6e4   : > { %v4840_v50 = vsub.f32 0.0, %v4808_v11  ;;  %v9171_v47 = vsel %vm4822_vm4, %v4806_v32, %v4838_v56  ;;  %v6691_v59 = vpop.eup %6690  ;;  %v4797_v9 = vmul.f32 %v6689_v31, %v9117_v35  ;;  %v4811_v27 = vsub.f32 1.0, %v4795_v13  ;;  %v9575_v13 = vld [vmem:[#allocation47_spill] sm:$0xff] }
 0x6e5   : > { %vm4832_vm14 = vcmp.ge.f32.partialorder %v9567_v54, 0.0  ;;  %v4841_v30 = vsub.f32 0.0, %v4809_v12  ;;  %v4855_v44 = vsel %vm4823_vm5, %v4807_v6, %v4839_v1  ;;  %v6693_v46 = vpop.eup %6692  ;;  %v4798_v19 = vmul.f32 %v6691_v59, %v9122_v28  ;;  %v9574_v1 = vld [vmem:[#allocation46_spill] sm:$0xff]  ;;  %v9576_v31 = vld [vmem:[#allocation31_spill] sm:$0xff]  ;;  %v9580_v54 = vld [vmem:[#allocation33_spill] sm:$0xff] }
 0x6e6   : > { %v4812_v41 = vsub.f32 1.0, %v4796_v55  ;;  %vm4833_vm15 = vcmp.ge.f32.partialorder %v9568_v4, 0.0  ;;  %v4842_v3 = vsub.f32 0.0, %v4810_v2  ;;  %v4856_v39 = vsel %vm4824_vm6, %v4808_v11, %v4840_v50  ;;  %v6695_v34 = vpop.eup %6694  ;;  %v9578_v50 = vld [vmem:[#allocation49_spill] sm:$0xff] }
 0x6e7   : > { %v4799_v35 = vmul.f32 %v6693_v46, %v9130_v38  ;;  %v4813_v23 = vsub.f32 1.0, %v4797_v9  ;;  %vm4834_vm1 = vcmp.ge.f32.partialorder %v9569_v0, 0.0  ;;  %v4843_v18 = vsub.f32 0.0, %v4811_v27  ;;  %v6697_v22 = vpop.eup %6696 }
 0x6e8   : > { %v4857_v8 = vsel %vm4825_vm7, %v4809_v12, %v4841_v30  ;;  %v4800_v28 = vmul.f32 %v6695_v34, %v9133_v53  ;;  %v4814_v17 = vsub.f32 1.0, %v4798_v19  ;;  %v4844_v25 = vsub.f32 0.0, %v4812_v41  ;;  %v6699_v6 = vpop.eup %6698  ;;  %v9581_v19 = vld [vmem:[#allocation34_spill] sm:$0xff] }
 0x6e9   : > { %v4858_v32 = vsel %vm4826_vm8, %v4810_v2, %v4842_v3  ;;  %v4801_v52 = vmul.f32 %v6697_v22, %v9137_v10  ;;  %v4815_v48 = vsub.f32 1.0, %v4799_v35  ;;  %v4845_v38 = vsub.f32 0.0, %v4813_v23  ;;  %v9577_v2 = vld [vmem:[#allocation48_spill] sm:$0xff]  ;;  %v9582_v3 = vld [vmem:[#allocation35_spill] sm:$0xff] }
 0x6ea   : > { %v4859_v61 = vsel %vm4827_vm9, %v4811_v27, %v4843_v18  ;;  %v4802_v60 = vmul.f32 %v6699_v6, %v9140_v15  ;;  %v4816_v24 = vsub.f32 1.0, %v4800_v28  ;;  %v4846_v26 = vsub.f32 0.0, %v4814_v17  ;;  %v9579_v27 = vld [vmem:[#allocation32_spill] sm:$0xff] }
 0x6eb   : > { %v4860_v53 = vsel %vm4828_vm10, %v4812_v41, %v4844_v25  ;;  %v4817_v36 = vsub.f32 1.0, %v4801_v52  ;;  %v4847_v14 = vsub.f32 0.0, %v4815_v48  ;;  %v4861_v58 = vsel %vm4829_vm11, %v4813_v23, %v4845_v38  ;;  %v9583_v35 = vld [vmem:[#allocation36_spill] sm:$0xff]  ;;  %v9584_v23 = vld [vmem:[#allocation50_spill] sm:$0xff] }
 0x6ec   : > { %v4867_v62 = vmul.f32 0.5, %v9570_v45  ;;  %v4818_v10 = vsub.f32 1.0, %v4802_v60  ;;  %v4848_v49 = vsub.f32 0.0, %v4816_v24  ;;  %v4862_v7 = vsel %vm4830_vm12, %v4814_v17, %v4846_v26  ;;  %v9585_v22 = vld [vmem:[#allocation52_spill] sm:$0xff] }
 0x6ed   : > { %v4868_v37 = vmul.f32 0.5, %v9571_v57  ;;  %v4849_v15 = vsub.f32 0.0, %v4817_v36  ;;  %v4863_v51 = vsel %vm4831_vm13, %v4815_v48, %v4847_v14  ;;  %v4869_v56 = vmul.f32 0.5, %v9572_v20 }
 0x6ee   : > { %v4870_v33 = vmul.f32 0.5, %v9573_v21  ;;  %v4850_v11 = vsub.f32 0.0, %v4818_v10  ;;  %v4864_v29 = vsel %vm4832_vm14, %v4816_v24, %v4848_v49  ;;  %v4871_v42 = vmul.f32 0.5, %v9574_v1 }
 0x6ef   : > { %v4872_v12 = vmul.f32 0.5, %v9575_v13  ;;  %v4865_v16 = vsel %vm4833_vm15, %v4817_v36, %v4849_v15  ;;  %v4873_v55 = vmul.f32 0.5, %v9576_v31  ;;  %v4874_v5 = vmul.f32 0.5, %v9577_v2 }
 0x6f0   : > { %v4875_v59 = vmul.f32 0.5, %v9578_v50  ;;  %v4866_v9 = vsel %vm4834_vm1, %v4818_v10, %v4850_v11  ;;  %v4876_v30 = vmul.f32 0.5, %v9579_v27  ;;  %v4877_v46 = vmul.f32 0.5, %v9580_v54 }
 0x6f1   : > { %v4878_v41 = vmul.f32 0.5, %v9581_v19  ;;  %v4879_v34 = vmul.f32 0.5, %v9582_v3  ;;  %v4880_v4 = vmul.f32 0.5, %v9583_v35  ;;  %v4881_v18 = vmul.f32 0.5, %v9584_v23 }
 0x6f2   : > { %v4882_v28 = vmul.f32 0.5, %v9585_v22  ;;  %v4883_v17 = vadd.f32 1.0, %v9155_v63  ;;  %v4884_v0 = vadd.f32 1.0, %v9161_v43  ;;  %v4885_v25 = vadd.f32 1.0, %v9165_v40 }
 0x6f3   : > { %v4886_v6 = vadd.f32 1.0, %v9171_v47  ;;  %v4887_v52 = vadd.f32 1.0, %v4855_v44  ;;  %v4888_v48 = vadd.f32 1.0, %v4856_v39  ;;  %v4889_v38 = vadd.f32 1.0, %v4857_v8 }
 0x6f4   : > { %v4890_v60 = vadd.f32 1.0, %v4858_v32  ;;  %v4891_v24 = vadd.f32 1.0, %v4859_v61  ;;  %v4892_v26 = vadd.f32 1.0, %v4860_v53  ;;  %v4893_v36 = vadd.f32 1.0, %v4861_v58 }
 0x6f5   : > { %v4894_v14 = vadd.f32 1.0, %v4862_v7  ;;  %v4895_v45 = vadd.f32 1.0, %v4863_v51  ;;  %v4896_v10 = vadd.f32 1.0, %v4864_v29  ;;  %v4897_v49 = vadd.f32 1.0, %v4865_v16 }
 0x6f6   : > { %v4898_v63 = vadd.f32 1.0, %v4866_v9  ;;  %v4899_v43 = vmul.f32 %v4883_v17, %v4867_v62  ;;  %v4900_v40 = vmul.f32 %v4884_v0, %v4868_v37  ;;  %v4901_v47 = vmul.f32 %v4885_v25, %v4869_v56 }
 0x6f7   : > { %v4902_v44 = vmul.f32 %v4886_v6, %v4870_v33  ;;  %v4903_v39 = vmul.f32 %v4887_v52, %v4871_v42  ;;  %v4904_v8 = vmul.f32 %v4888_v48, %v4872_v12  ;;  %v4905_v32 = vmul.f32 %v4889_v38, %v4873_v55 }
 0x6f8   : > { %v4906_v61 = vmul.f32 %v4890_v60, %v4874_v5  ;;  %v4907_v53 = vmul.f32 %v4891_v24, %v4875_v59  ;;  %v4908_v58 = vmul.f32 %v4892_v26, %v4876_v30  ;;  %v4909_v7 = vmul.f32 %v4893_v36, %v4877_v46  ;;  %4915 = vst [vmem:[%s9229_s4] sm:$0xff] %v4899_v43 }
 0x6f9   : > { %v4910_v57 = vmul.f32 %v4894_v14, %v4878_v41  ;;  %4916 = vst [vmem:[%s9229_s4 + $0x8] sm:$0xff] %v4900_v40  ;;  %4917 = vst [vmem:[%s9229_s4 + $0x10] sm:$0xff] %v4901_v47  ;;  %v4911_v62 = vmul.f32 %v4895_v45, %v4879_v34  ;;  %v4912_v37 = vmul.f32 %v4896_v10, %v4880_v4 }
 0x6fa   : > { %4918 = vst [vmem:[%s9229_s4 + $0x18] sm:$0xff] %v4902_v44  ;;  %v4913_v15 = vmul.f32 %v4897_v49, %v4881_v18  ;;  %v4914_v51 = vmul.f32 %v4898_v63, %v4882_v28  ;;  %4919 = vst [vmem:[%s9229_s4 + $0x20] sm:$0xff] %v4903_v39 }
 0x6fb   : > { %4920 = vst [vmem:[%s9229_s4 + $0x28] sm:$0xff] %v4904_v8  ;;  %4921 = vst [vmem:[%s9229_s4 + $0x30] sm:$0xff] %v4905_v32 }
 0x6fc   : > { %4922 = vst [vmem:[%s9229_s4 + $0x38] sm:$0xff] %v4906_v61  ;;  %4923 = vst [vmem:[%s9229_s4 + $0x40] sm:$0xff] %v4907_v53 }
 0x6fd   : > { %4924 = vst [vmem:[%s9229_s4 + $0x48] sm:$0xff] %v4908_v58  ;;  %4925 = vst [vmem:[%s9229_s4 + $0x50] sm:$0xff] %v4909_v7 }
 0x6fe   : > { %4926 = vst [vmem:[%s9229_s4 + $0x58] sm:$0xff] %v4910_v57  ;;  %4927 = vst [vmem:[%s9229_s4 + $0x60] sm:$0xff] %v4911_v62 }
 0x6ff   : > { %4928 = vst [vmem:[%s9229_s4 + $0x68] sm:$0xff] %v4912_v37  ;;  %4929 = vst [vmem:[%s9229_s4 + $0x70] sm:$0xff] %v4913_v15 }
 0x700   : > { %4930 = vst [vmem:[%s9229_s4 + $0x78] sm:$0xff] %v4914_v51 }
 0x701   : > { %6858 = shalt.err (!%p6855_p3)
}
 0x702   : > { %s6859_s24 = scalar_lea.hbm %s9239_s23, 2048  ;;  %s6863_s30 = scalar_lea.hbm %s9586_s28, 4096 }
 0x703   : > { %p6860_p9 = scmp.ne.s32.totalorder %s9239_s23, %s6859_s24  ;;  %p6864_p7 = scmp.lt.u32.totalorder %s9239_s23, %s9586_s28 }
 0x704   : > { %p6865_p12 = scmp.lt.u32.totalorder %s6863_s30, %s6859_s24  ;;  %p6867_p1 = scmp.lt.u32.totalorder %s6859_s24, %s9239_s23 }
 0x705   : > { %p6861_p13 = pnand %p6860_p9, %p7141_p5 }
 0x706   : > { %p6866_p2 = por %p6865_p12, %p6864_p7 }
 0x707   : > { %p6862_p11 = pneg %p6861_p13 }
 0x708   : > { %p6868_p4 = por %p6867_p1, %p6866_p2 }
 0x70a   : > { %p6869_p0 = pnand %p6868_p4, %p6862_p11 }
 0x70c   : > { %6872 = shalt.err (!%p6869_p0)
}
 0x70d   : > { %s6941_s18 = smov 128   ;;  %s6942_s21 = smov 8  }
 0x70e   : > { %6346 = dma.vmem_to_hbm [thread:$0]  (%p7141_p5), %s9241_s25, 2048, %s9239_s23, %s4932_s2, %s6941_s18, %s6941_s18, %s6942_s21  }
 0x70f PF: > { %s9587_s4 = sld [smem:[#allocation19_spill]]  ;;  %s9588_s13 = sld [smem:[#allocation20_spill]] }
 0x710   : > { %p9590_p6 = scmp.ge.s32.totalorder %s6923_s12, 2 }
 0x715   : > { %s4961_s22 = sand.u32 1, %s9587_s4   ;;  %p9589_p8 = scmp.ne.s32.totalorder %s9588_s13, 0 }
 0x716   : > { %s4962_s3 = scalar_lea.sflag [#allocation6], %s4961_s22 }
 0x717   : > { %p6366_p10 = pnand %p9590_p6, %p9589_p8 }
 0x719   : > { %6906 = dma.done.wait (!%p6366_p10), %s4962_s3, 2048  }
 0x71a   : > { %6908 = vsyncadd (!%p6366_p10), %s4962_s3, 4294965248  ;;  %p26_p3 = scmp.ge.s32.totalorder %s7127_s9, 4   ;;  %s9591_s30 = smov %s6915_s10 }
 0x71b   : > { %s9592_s10 = smov %s6919_s11  ;;  %s9593_s11 = smov %s7137_s27 }
 0x71c   : > { %s9594_s12 = smov %s7127_s9  ;;  %28 = sbr.rel (!%p26_p3) target bundleno = 14 (0xe), region = 135 }
 0x723   :  { %4967 = vsyncpa [#allocation5], 1 }
 0x724   :  { %4969 = vsyncpa [#allocation5 + $0x1], 1 }
 0x725   :  { %4970 = vsyncpa [#allocation8], 1 }
 0x726   :  { %4972 = vsyncpa [#allocation8 + $0x1], 1 }
 0x727   :  { %4973 = vsyncpa [#allocation11], 1 }
 0x728   :  { %4974 = vsyncpa [#allocation6], 1 }
 0x729   :  { %4976 = vsyncpa [#allocation6 + $0x1], 1 }

</bundles_post_ra>
